<compile_context>
chip_gen: v6e
topology: v6e:2x2x1
jax: 0.10.0
libtpu: 0.0.40
codegen_flags: <defaults>
</compile_context>

<pallas_src>
import functools
import math

import jax
import jax.numpy as jnp
from jax import lax
from jax.experimental import pallas as pl
from jax.experimental.pallas import tpu as pltpu

EPS = 1e-5              # torch BatchNorm2d default eps
NEG_SLOPE = 0.2         # LeakyReLU slope
LANE = 128
MAX_TM = 1024           # per-step footprint at tm=1024, k_p<=1024 is ~4 MiB
FUSE_BUDGET = 24 * 1024 * 1024   # cap for the resident f32 y scratch (v7x-safe)
VMEM_LIMIT = 32 * 1024 * 1024    # <= scoped default on v6e/v7x, < physical on v5e


def _round_up(x, m):
    return ((x + m - 1) // m) * m


def _choose_tm(m, cap=MAX_TM):
    """Balanced M tiles rounded to 16 sublanes (bf16 packing), no empty tail."""
    m16 = _round_up(max(m, 1), 16)
    if m16 <= cap:
        return m16, m16
    n_tiles = -(-m16 // cap)
    tm = _round_up(-(-m16 // n_tiles), 16)
    return tm, tm * n_tiles


# --------------------------------------------------------------------------- #
# Pallas kernels
# --------------------------------------------------------------------------- #
def _fused_downblock_kernel(cols_ref, w_ref, gb_ref, out_ref,
                            y_ref, acc_ref, ss_ref, *, inv_m):
    """Fused conv-as-matmul + BatchNorm (batch stats) + LeakyReLU.

    Grid is (2, m_tiles):
      phase 0: y_tile = cols_tile @ w (MXU, bf16 -> f32); keep y_tile resident
               in the y_ref VMEM scratch; accumulate per-channel sum / sumsq.
      phase 1: at i==0 fold mean/var/gamma/beta into scale/shift (f32); then
               normalize + LeakyReLU each resident tile and store bf16 at the
               real channel width.
    """
    phase = pl.program_id(0)
    i = pl.program_id(1)
    tm = cols_ref.shape[0]
    row = pl.multiple_of(i * tm, tm)

    @pl.when(phase == 0)
    def _conv_and_stats():
        @pl.when(i == 0)
        def _init():
            acc_ref[...] = jnp.zeros_like(acc_ref)

        y = jnp.dot(cols_ref[...], w_ref[...],
                    preferred_element_type=jnp.float32)
        y_ref[pl.ds(row, tm), :] = y
        acc_ref[...] += jnp.concatenate(
            [jnp.sum(y, axis=0, keepdims=True),
             jnp.sum(y * y, axis=0, keepdims=True)], axis=0)

    @pl.when(phase == 1)
    def _bn_lrelu():
        @pl.when(i == 0)
        def _fold():
            mean = acc_ref[0:1, :] * inv_m
            var = jnp.maximum(acc_ref[1:2, :] * inv_m - mean * mean, 0.0)
            scale = gb_ref[0:1, :] * lax.rsqrt(var + EPS)
            shift = gb_ref[1:2, :] - mean * scale
            ss_ref[...] = jnp.concatenate([scale, shift], axis=0)

        z = y_ref[pl.ds(row, tm), :] * ss_ref[0:1, :] + ss_ref[1:2, :]
        z = jnp.where(z >= 0.0, z, NEG_SLOPE * z)
        out_ref[...] = z[:, :out_ref.shape[1]].astype(out_ref.dtype)


def _matmul_stats_kernel(cols_ref, w_ref, y_ref, stats_ref):
    """Fallback phase 1: conv matmul (single K pass) + per-tile channel stats."""
    y = jnp.dot(cols_ref[...], w_ref[...], preferred_element_type=jnp.float32)
    y_ref[...] = y
    stats_ref[0] = jnp.concatenate(
        [jnp.sum(y, axis=0, keepdims=True),
         jnp.sum(y * y, axis=0, keepdims=True)], axis=0)


def _bn_lrelu_kernel(y_ref, ss_ref, out_ref):
    """Fallback phase 2: apply pre-folded scale/shift + LeakyReLU, emit bf16."""
    z = y_ref[...] * ss_ref[0:1, :] + ss_ref[1:2, :]
    z = jnp.where(z >= 0.0, z, NEG_SLOPE * z)
    out_ref[...] = z[:, :out_ref.shape[1]].astype(out_ref.dtype)


def _classifier_kernel(cols_ref, w_ref, out_ref):
    """Final 1-channel conv as a VPU dot (mul + lane reduce) + sigmoid."""
    x = cols_ref[...].astype(jnp.float32)            # (tm, k_p)
    w = w_ref[...].astype(jnp.float32)               # (1,  k_p)
    s = jnp.sum(x * w, axis=1, keepdims=True)        # (tm, 1)
    out_ref[...] = pl.reciprocal(1.0 + jnp.exp(-s), approx=True)


# --------------------------------------------------------------------------- #
# pallas_call wrappers
# --------------------------------------------------------------------------- #
def pallas_fused_downblock(cols_p, w_p, gb, m, cout, tm):
    m_p, k_p = cols_p.shape
    cout_p = w_p.shape[1]
    nm = m_p // tm
    kernel = functools.partial(_fused_downblock_kernel, inv_m=1.0 / m)
    return pl.pallas_call(
        kernel,
        out_shape=jax.ShapeDtypeStruct((m_p, cout), jnp.bfloat16),
        grid_spec=pltpu.PrefetchScalarGridSpec(
            num_scalar_prefetch=0,
            grid=(2, nm),
            in_specs=[
                # phase 0 walks the M tiles; phase 1 pins the last-seen block
                # so no cols DMAs are issued while applying BN.
                pl.BlockSpec((tm, k_p),
                             lambda p, i: ((1 - p) * i + p * (nm - 1), 0)),
                pl.BlockSpec((k_p, cout_p), lambda p, i: (0, 0)),
                pl.BlockSpec((2, cout_p), lambda p, i: (0, 0)),
            ],
            # out index constant during phase 0 (nothing written yet) and walks
            # the M tiles in phase 1, so each block is flushed exactly once.
            out_specs=pl.BlockSpec((tm, cout), lambda p, i: (p * i, 0)),
            scratch_shapes=[
                pltpu.VMEM((m_p, cout_p), jnp.float32),   # resident conv output
                pltpu.VMEM((2, cout_p), jnp.float32),     # sum / sumsq
                pltpu.VMEM((2, cout_p), jnp.float32),     # scale / shift
            ]),
        compiler_params=pltpu.CompilerParams(
            dimension_semantics=("arbitrary", "arbitrary"),
            vmem_limit_bytes=VMEM_LIMIT),
    )(cols_p, w_p, gb)


def pallas_downblock_twopass(cols_p, w_p, gb, m, cout, tm):
    """Fallback when the resident y scratch would not fit VMEM (huge batch)."""
    m_p, k_p = cols_p.shape
    cout_p = w_p.shape[1]
    nm = m_p // tm
    # TODO(synk): tile K here as well for very large Cin (not needed for this
    # model's shapes, K_pad <= 16 * Cin stays comfortably in VMEM).
    y, stats = pl.pallas_call(
        _matmul_stats_kernel,
        out_shape=(jax.ShapeDtypeStruct((m_p, cout_p), jnp.float32),
                   jax.ShapeDtypeStruct((nm, 2, cout_p), jnp.float32)),
        grid_spec=pltpu.PrefetchScalarGridSpec(
            num_scalar_prefetch=0,
            grid=(nm,),
            in_specs=[pl.BlockSpec((tm, k_p), lambda i: (i, 0)),
                      pl.BlockSpec((k_p, cout_p), lambda i: (0, 0))],
            out_specs=[pl.BlockSpec((tm, cout_p), lambda i: (i, 0)),
                       pl.BlockSpec((1, 2, cout_p), lambda i: (i, 0, 0))]),
        compiler_params=pltpu.CompilerParams(
            dimension_semantics=("parallel",),
            vmem_limit_bytes=VMEM_LIMIT),
    )(cols_p, w_p)

    mean = jnp.sum(stats[:, 0, :], axis=0) / m
    var = jnp.maximum(jnp.sum(stats[:, 1, :], axis=0) / m - mean * mean, 0.0)
    scale = gb[0] * lax.rsqrt(var + EPS)
    shift = gb[1] - mean * scale
    ss = jnp.stack([scale, shift])                    # (2, cout_p) f32

    return pl.pallas_call(
        _bn_lrelu_kernel,
        out_shape=jax.ShapeDtypeStruct((m_p, cout), jnp.bfloat16),
        grid_spec=pltpu.PrefetchScalarGridSpec(
            num_scalar_prefetch=0,
            grid=(nm,),
            in_specs=[pl.BlockSpec((tm, cout_p), lambda i: (i, 0)),
                      pl.BlockSpec((2, cout_p), lambda i: (0, 0))],
            out_specs=pl.BlockSpec((tm, cout), lambda i: (i, 0))),
        compiler_params=pltpu.CompilerParams(
            dimension_semantics=("parallel",),
            vmem_limit_bytes=VMEM_LIMIT),
    )(y, ss)


def pallas_classifier(cols_p, w_row, tm):
    m_p, k_p = cols_p.shape
    nm = m_p // tm
    return pl.pallas_call(
        _classifier_kernel,
        out_shape=jax.ShapeDtypeStruct((m_p, 1), jnp.float32),
        grid_spec=pltpu.PrefetchScalarGridSpec(
            num_scalar_prefetch=0,
            grid=(nm,),
            in_specs=[pl.BlockSpec((tm, k_p), lambda i: (i, 0)),
                      pl.BlockSpec((1, k_p), lambda i: (0, 0))],
            out_specs=pl.BlockSpec((tm, 1), lambda i: (i, 0))),
        compiler_params=pltpu.CompilerParams(
            dimension_semantics=("parallel",),
            vmem_limit_bytes=VMEM_LIMIT),
    )(cols_p, w_row)


# --------------------------------------------------------------------------- #
# Plain-JAX glue: im2col, parameter setup
# --------------------------------------------------------------------------- #
def im2col(x_nhwc, kernel, stride, padding):
    """bf16 patch extraction; column order is kh-major, kw, then channels."""
    if padding:
        x_nhwc = jnp.pad(x_nhwc, ((0, 0), (padding, padding),
                                  (padding, padding), (0, 0)))
    N, Hp, Wp, C = x_nhwc.shape
    OH = (Hp - kernel) // stride + 1
    OW = (Wp - kernel) // stride + 1
    patches = [x_nhwc[:, kh:kh + stride * OH:stride,
                      kw:kw + stride * OW:stride, :]
               for kh in range(kernel) for kw in range(kernel)]
    cols = jnp.concatenate(patches, axis=-1)          # (N, OH, OW, k*k*C)
    return cols.reshape(N * OH * OW, kernel * kernel * C), (N, OH, OW)


def kaiming_normal(key, shape, a=0.2):
    # shape: (Cout, Cin, KH, KW); fan_in = Cin * KH * KW
    fan_in = shape[1] * shape[2] * shape[3]
    gain = math.sqrt(2.0 / (1.0 + a * a))
    std = gain / math.sqrt(fan_in)
    return std * jax.random.normal(key, shape, dtype=jnp.float32)


def spectral_normalize(w, n_iter=30):
    # Approximates torch.nn.utils.spectral_norm: divide by the largest singular
    # value of the (Cout, Cin*KH*KW) matricization (converged power iteration
    # instead of torch's single stored-u iteration per forward).
    wm = w.reshape(w.shape[0], -1)
    v = jnp.full((wm.shape[1],), 1.0 / math.sqrt(wm.shape[1]), dtype=jnp.float32)
    for _ in range(n_iter):
        u = wm @ v
        u = u / (jnp.linalg.norm(u) + 1e-12)
        v = wm.T @ u
        v = v / (jnp.linalg.norm(v) + 1e-12)
    sigma = u @ (wm @ v)
    return w / sigma


def init_discriminator_params(key, image_size, filter_dim=16, n_blocks=3,
                              use_sn=True):
    C, H, W = image_size
    max_blocks = max(int(math.log2(min(H, W))) - 2, 1)
    n_blocks = min(n_blocks, max_blocks)
    keys = jax.random.split(key, 2 * n_blocks + 1)
    blocks = []
    in_ch = C
    for i in range(n_blocks):
        out_ch = filter_dim * (2 ** i)
        w = kaiming_normal(keys[2 * i], (out_ch, in_ch, 4, 4))
        if use_sn:
            w = spectral_normalize(w)
        gamma = 1.0 + 0.02 * jax.random.normal(keys[2 * i + 1], (out_ch,),
                                               dtype=jnp.float32)
        beta = jnp.zeros((out_ch,), dtype=jnp.float32)
        blocks.append((w, gamma, beta))
        in_ch = out_ch
    w_final = kaiming_normal(keys[-1], (1, in_ch, 4, 4))
    if use_sn:
        w_final = spectral_normalize(w_final)
    return {"blocks": blocks, "final_w": w_final}


# --------------------------------------------------------------------------- #
# Forward pass (Pallas) and pure-JAX reference
# --------------------------------------------------------------------------- #
def downblock_forward(x_nhwc, w, gamma, beta):
    cout = w.shape[0]
    cols, (n, oh, ow) = im2col(x_nhwc, kernel=4, stride=2, padding=1)
    m, k = cols.shape
    cout_p = _round_up(cout, LANE)
    k_p = _round_up(k, LANE)
    tm, m_p = _choose_tm(m)

    cols_p = jnp.pad(cols, ((0, m_p - m), (0, k_p - k)))          # bf16
    w_mat = jnp.transpose(w, (2, 3, 1, 0)).reshape(k, cout)
    w_p = jnp.pad(w_mat, ((0, k_p - k), (0, cout_p - cout))).astype(jnp.bfloat16)
    gb = jnp.stack([jnp.pad(gamma, (0, cout_p - cout)),
                    jnp.pad(beta, (0, cout_p - cout))]).astype(jnp.float32)

    if m_p * cout_p * 4 <= FUSE_BUDGET:
        out = pallas_fused_downblock(cols_p, w_p, gb, m, cout, tm)
    else:
        out = pallas_downblock_twopass(cols_p, w_p, gb, m, cout, tm)
    return out[:m].reshape(n, oh, ow, cout)                       # bf16 NHWC


def classifier_forward(x_nhwc, w_final):
    cols, _ = im2col(x_nhwc, kernel=4, stride=1, padding=0)
    m, k = cols.shape
    k_p = _round_up(k, LANE)
    tm, m_p = _choose_tm(m, cap=256)

    cols_p = jnp.pad(cols, ((0, m_p - m), (0, k_p - k)))          # bf16
    w_row = jnp.pad(jnp.transpose(w_final, (2, 3, 1, 0)).reshape(1, k),
                    ((0, 0), (0, k_p - k))).astype(jnp.bfloat16)

    out = pallas_classifier(cols_p, w_row, tm)                    # (m_p, 1) f32
    return out[:m, 0]                                             # == .view(-1)


def discriminator_forward(params, x_nchw):
    # NCHW -> NHWC, bf16 activations end-to-end (MXU operands; all BN /
    # LeakyReLU / sigmoid math stays in f32 inside the kernels).
    x = jnp.transpose(x_nchw, (0, 2, 3, 1)).astype(jnp.bfloat16)
    for (w, gamma, beta) in params["blocks"]:
        x = downblock_forward(x, w, gamma, beta)
    return classifier_forward(x, params["final_w"])


def reference_forward(params, x_nchw):
    # Pure-JAX reference with the same bf16 operands / f32 accumulation as the
    # Pallas path (BN / activation / sigmoid in f32).
    x = jnp.transpose(x_nchw, (0, 2, 3, 1)).astype(jnp.float32)
    for (w, gamma, beta) in params["blocks"]:
        w_hwio = jnp.transpose(w, (2, 3, 1, 0))
        y = lax.conv_general_dilated(
            x.astype(jnp.bfloat16), w_hwio.astype(jnp.bfloat16),
            (2, 2), [(1, 1), (1, 1)],
            dimension_numbers=("NHWC", "HWIO", "NHWC"),
            preferred_element_type=jnp.float32)
        mean = jnp.mean(y, axis=(0, 1, 2), keepdims=True)
        var = jnp.mean((y - mean) ** 2, axis=(0, 1, 2), keepdims=True)
        y = (y - mean) * lax.rsqrt(var + EPS) * gamma + beta
        x = jnp.where(y >= 0, y, NEG_SLOPE * y)
    w_hwio = jnp.transpose(params["final_w"], (2, 3, 1, 0))
    y = lax.conv_general_dilated(
        x.astype(jnp.bfloat16), w_hwio.astype(jnp.bfloat16),
        (1, 1), [(0, 0), (0, 0)],
        dimension_numbers=("NHWC", "HWIO", "NHWC"),
        preferred_element_type=jnp.float32)
    return jax.nn.sigmoid(y).reshape(-1)


# --------------------------------------------------------------------------- #
if __name__ == "__main__":
    key = jax.random.PRNGKey(0)
    k_param, k_x = jax.random.split(key)

    # Small shapes consistent with the module: image_size=(3, 32, 32),
    # filter_dim=16, n_blocks=3  →  32→16→8→4, final 4x4 conv → one logit/sample.
    image_size = (3, 32, 32)
    batch = 2
    params = init_discriminator_params(k_param, image_size,
                                       filter_dim=16, n_blocks=3, use_sn=True)
    x = jax.random.normal(k_x, (batch,) + image_size, dtype=jnp.float32)  # NCHW

    fwd = jax.jit(discriminator_forward)
    out = jax.block_until_ready(fwd(params, x))
    assert out.shape == (batch,), out.shape
    assert bool(jnp.all(jnp.isfinite(out)))

    ref = jax.block_until_ready(jax.jit(reference_forward)(params, x))
    assert jnp.allclose(out, ref, atol=3e-3, rtol=3e-3), (out, ref)

    print("KERNEL_OK")
</pallas_src>

<mosaic_0001>
module attributes {stable_mosaic.version = 11 : i64} {
  func.func @_fused_downblock_kernel(%arg0: i32, %arg1: i32, %arg2: memref<512x128xbf16, #tpu.memory_space<vmem>>, %arg3: memref<128x128xbf16, #tpu.memory_space<vmem>>, %arg4: memref<2x128xf32, #tpu.memory_space<vmem>>, %arg5: memref<512x16xbf16, #tpu.memory_space<vmem>>, %arg6: memref<512x128xf32, #tpu.memory_space<vmem>>, %arg7: memref<2x128xf32, #tpu.memory_space<vmem>>, %arg8: memref<2x128xf32, #tpu.memory_space<vmem>>) attributes {dimension_semantics = [#tpu.dimension_semantics<arbitrary>, #tpu.dimension_semantics<arbitrary>], iteration_bounds = array<i64: 2, 1>, scalar_prefetch = 0 : i64, scratch_operands = 3 : i64, tpu.core_type = #tpu.core_type<tc>, window_params = [{transform_indices = @transform_0, window_bounds = array<i64: 512, 128>}, {pipeline_mode = #tpu.pipeline_mode<synchronous>, transform_indices = @transform_1, window_bounds = array<i64: 128, 128>}, {pipeline_mode = #tpu.pipeline_mode<synchronous>, transform_indices = @transform_2, window_bounds = array<i64: 2, 128>}, {transform_indices = @transform_3, window_bounds = array<i64: 512, 16>}]} {
    %c512_i32 = arith.constant 512 : i32
    %0 = arith.muli %arg1, %c512_i32 : i32
    %1 = tpu.assume_multiple %0, 512 : i32
    %c0_i32 = arith.constant 0 : i32
    %2 = arith.cmpi eq, %arg0, %c0_i32 : i32
    %3 = arith.extui %2 : i1 to i32
    %c0_i32_0 = arith.constant 0 : i32
    %4 = arith.cmpi ne, %3, %c0_i32_0 : i32
    scf.if %4 {
      %c0_i32_2 = arith.constant 0 : i32
      %8 = arith.cmpi eq, %arg1, %c0_i32_2 : i32
      %9 = arith.extui %8 : i1 to i32
      %c0_i32_3 = arith.constant 0 : i32
      %10 = arith.cmpi ne, %9, %c0_i32_3 : i32
      scf.if %10 {
        %cst_14 = arith.constant 0.000000e+00 : f32
        %25 = vector.broadcast %cst_14 : f32 to vector<2x128xf32>
        %c0_15 = arith.constant 0 : index
        %c0_16 = arith.constant 0 : index
        %26 = vector.load %arg7[%c0_15, %c0_16] : memref<2x128xf32, #tpu.memory_space<vmem>>, vector<2x128xf32>
        tpu.vector_store %arg7[%c0_15, %c0_16], %25 {strides = array<i32>} : memref<2x128xf32, #tpu.memory_space<vmem>>, vector<2x128xf32>,
      } else {
      }
      %c0 = arith.constant 0 : index
      %c0_4 = arith.constant 0 : index
      %11 = vector.load %arg2[%c0, %c0_4] : memref<512x128xbf16, #tpu.memory_space<vmem>>, vector<512x128xbf16>
      %c0_5 = arith.constant 0 : index
      %c0_6 = arith.constant 0 : index
      %12 = vector.load %arg3[%c0_5, %c0_6] : memref<128x128xbf16, #tpu.memory_space<vmem>>, vector<128x128xbf16>
      %cst = arith.constant dense<0.000000e+00> : vector<512x128xf32>
      %13 = tpu.matmul %11, %12, %cst {dimension_numbers = #tpu.dot_dimension_numbers<[1], [0], [0], [1], [0, 0, 1, 1], [], []>} : vector<512x128xbf16>, vector<128x128xbf16>, vector<512x128xf32> -> vector<512x128xf32>
      %14 = arith.index_cast %1 : i32 to index
      %c0_7 = arith.constant 0 : index
      %15 = vector.load %arg6[%14, %c0_7] : memref<512x128xf32, #tpu.memory_space<vmem>>, vector<512x128xf32>
      tpu.vector_store %arg6[%14, %c0_7], %13 {strides = array<i32>} : memref<512x128xf32, #tpu.memory_space<vmem>>, vector<512x128xf32>,
      %c0_8 = arith.constant 0 : index
      %c0_9 = arith.constant 0 : index
      %16 = vector.load %arg7[%c0_8, %c0_9] : memref<2x128xf32, #tpu.memory_space<vmem>>, vector<2x128xf32>
      %cst_10 = arith.constant dense<0.000000e+00> : vector<128xf32>
      %17 = vector.multi_reduction <add>, %13, %cst_10 [0] : vector<512x128xf32> to vector<128xf32>
      %18 = vector.shape_cast %17 : vector<128xf32> to vector<1x128xf32>
      %19 = arith.mulf %13, %13 : vector<512x128xf32>
      %cst_11 = arith.constant dense<0.000000e+00> : vector<128xf32>
      %20 = vector.multi_reduction <add>, %19, %cst_11 [0] : vector<512x128xf32> to vector<128xf32>
      %21 = vector.shape_cast %20 : vector<128xf32> to vector<1x128xf32>
      %22 = tpu.concatenate %18, %21 in 0 : vector<1x128xf32>, vector<1x128xf32> -> vector<2x128xf32>
      %23 = arith.addf %16, %22 : vector<2x128xf32>
      %c0_12 = arith.constant 0 : index
      %c0_13 = arith.constant 0 : index
      %24 = vector.load %arg7[%c0_12, %c0_13] : memref<2x128xf32, #tpu.memory_space<vmem>>, vector<2x128xf32>
      tpu.vector_store %arg7[%c0_12, %c0_13], %23 {strides = array<i32>} : memref<2x128xf32, #tpu.memory_space<vmem>>, vector<2x128xf32>,
    } else {
    }
    %c1_i32 = arith.constant 1 : i32
    %5 = arith.cmpi eq, %arg0, %c1_i32 : i32
    %6 = arith.extui %5 : i1 to i32
    %c0_i32_1 = arith.constant 0 : i32
    %7 = arith.cmpi ne, %6, %c0_i32_1 : i32
    scf.if %7 {
      %c0_i32_2 = arith.constant 0 : i32
      %8 = arith.cmpi eq, %arg1, %c0_i32_2 : i32
      %9 = arith.extui %8 : i1 to i32
      %c0_i32_3 = arith.constant 0 : i32
      %10 = arith.cmpi ne, %9, %c0_i32_3 : i32
      scf.if %10 {
        %c0_10 = arith.constant 0 : index
        %c0_11 = arith.constant 0 : index
        %27 = vector.load %arg7[%c0_10, %c0_11] : memref<2x128xf32, #tpu.memory_space<vmem>>, vector<1x128xf32>
        %cst_12 = arith.constant 0.001953125 : f32
        %28 = vector.broadcast %cst_12 : f32 to vector<1x128xf32>
        %29 = arith.mulf %27, %28 : vector<1x128xf32>
        %c1_13 = arith.constant 1 : index
        %c0_14 = arith.constant 0 : index
        %30 = vector.load %arg7[%c1_13, %c0_14] : memref<2x128xf32, #tpu.memory_space<vmem>>, vector<1x128xf32>
        %cst_15 = arith.constant 0.001953125 : f32
        %31 = vector.broadcast %cst_15 : f32 to vector<1x128xf32>
        %32 = arith.mulf %30, %31 : vector<1x128xf32>
        %33 = arith.mulf %29, %29 : vector<1x128xf32>
        %34 = arith.subf %32, %33 : vector<1x128xf32>
        %cst_16 = arith.constant 0.000000e+00 : f32
        %35 = vector.broadcast %cst_16 : f32 to vector<1x128xf32>
        %36 = arith.maximumf %34, %35 : vector<1x128xf32>
        %c0_17 = arith.constant 0 : index
        %c0_18 = arith.constant 0 : index
        %37 = vector.load %arg4[%c0_17, %c0_18] : memref<2x128xf32, #tpu.memory_space<vmem>>, vector<1x128xf32>
        %cst_19 = arith.constant 9.99999974E-6 : f32
        %38 = vector.broadcast %cst_19 : f32 to vector<1x128xf32>
        %39 = arith.addf %36, %38 : vector<1x128xf32>
        %40 = math.rsqrt %39 : vector<1x128xf32>
        %41 = arith.mulf %37, %40 : vector<1x128xf32>
        %c1_20 = arith.constant 1 : index
        %c0_21 = arith.constant 0 : index
        %42 = vector.load %arg4[%c1_20, %c0_21] : memref<2x128xf32, #tpu.memory_space<vmem>>, vector<1x128xf32>
        %43 = arith.mulf %29, %41 : vector<1x128xf32>
        %44 = arith.subf %42, %43 : vector<1x128xf32>
        %45 = tpu.concatenate %41, %44 in 0 : vector<1x128xf32>, vector<1x128xf32> -> vector<2x128xf32>
        %c0_22 = arith.constant 0 : index
        %c0_23 = arith.constant 0 : index
        %46 = vector.load %arg8[%c0_22, %c0_23] : memref<2x128xf32, #tpu.memory_space<vmem>>, vector<2x128xf32>
        tpu.vector_store %arg8[%c0_22, %c0_23], %45 {strides = array<i32>} : memref<2x128xf32, #tpu.memory_space<vmem>>, vector<2x128xf32>,
      } else {
      }
      %11 = arith.index_cast %1 : i32 to index
      %c0 = arith.constant 0 : index
      %12 = vector.load %arg6[%11, %c0] : memref<512x128xf32, #tpu.memory_space<vmem>>, vector<512x128xf32>
      %c0_4 = arith.constant 0 : index
      %c0_5 = arith.constant 0 : index
      %13 = vector.load %arg8[%c0_4, %c0_5] : memref<2x128xf32, #tpu.memory_space<vmem>>, vector<1x128xf32>
      %14 = vector.broadcast %13 : vector<1x128xf32> to vector<512x128xf32>
      %15 = arith.mulf %12, %14 : vector<512x128xf32>
      %c1 = arith.constant 1 : index
      %c0_6 = arith.constant 0 : index
      %16 = vector.load %arg8[%c1, %c0_6] : memref<2x128xf32, #tpu.memory_space<vmem>>, vector<1x128xf32>
      %17 = vector.broadcast %16 : vector<1x128xf32> to vector<512x128xf32>
      %18 = arith.addf %15, %17 : vector<512x128xf32>
      %cst = arith.constant 0.000000e+00 : f32
      %19 = vector.broadcast %cst : f32 to vector<512x128xf32>
      %20 = arith.cmpf oge, %18, %19 : vector<512x128xf32>
      %cst_7 = arith.constant 2.000000e-01 : f32
      %21 = vector.broadcast %cst_7 : f32 to vector<512x128xf32>
      %22 = arith.mulf %21, %18 : vector<512x128xf32>
      %23 = arith.select %20, %18, %22 : vector<512x128xi1>, vector<512x128xf32>
      %24 = vector.extract_strided_slice %23 {offsets = [0, 0], sizes = [512, 16], strides = [1, 1]} : vector<512x128xf32> to vector<512x16xf32>
      %25 = arith.truncf %24 : vector<512x16xf32> to vector<512x16xbf16>
      %c0_8 = arith.constant 0 : index
      %c0_9 = arith.constant 0 : index
      %26 = vector.load %arg5[%c0_8, %c0_9] : memref<512x16xbf16, #tpu.memory_space<vmem>>, vector<512x16xbf16>
      tpu.vector_store %arg5[%c0_8, %c0_9], %25 {strides = array<i32>} : memref<512x16xbf16, #tpu.memory_space<vmem>>, vector<512x16xbf16>,
    } else {
    }
    return
  }
  func.func @transform_0(%arg0: i32, %arg1: i32) -> (i32, i32) {
    %c1_i32 = arith.constant 1 : i32
    %0 = arith.subi %c1_i32, %arg0 : i32
    %1 = arith.muli %0, %arg1 : i32
    %c0_i32 = arith.constant 0 : i32
    %2 = arith.muli %arg0, %c0_i32 : i32
    %3 = arith.addi %1, %2 : i32
    %c0_i32_0 = arith.constant 0 : i32
    %c0_i32_1 = arith.constant 0 : i32
    return %3, %c0_i32_0 : i32, i32
  }
  func.func @transform_1(%arg0: i32, %arg1: i32) -> (i32, i32) {
    %c0_i32 = arith.constant 0 : i32
    %c0_i32_0 = arith.constant 0 : i32
    %c0_i32_1 = arith.constant 0 : i32
    return %c0_i32, %c0_i32_0 : i32, i32
  }
  func.func @transform_2(%arg0: i32, %arg1: i32) -> (i32, i32) {
    %c0_i32 = arith.constant 0 : i32
    %c0_i32_0 = arith.constant 0 : i32
    %c0_i32_1 = arith.constant 0 : i32
    return %c0_i32, %c0_i32_0 : i32, i32
  }
  func.func @transform_3(%arg0: i32, %arg1: i32) -> (i32, i32) {
    %0 = arith.muli %arg0, %arg1 : i32
    %c0_i32 = arith.constant 0 : i32
    %c0_i32_0 = arith.constant 0 : i32
    return %0, %c0_i32 : i32, i32
  }
}

module attributes {stable_mosaic.version = 11 : i64} {
  func.func @_fused_downblock_kernel(%arg0: i32, %arg1: i32, %arg2: memref<128x256xbf16, #tpu.memory_space<vmem>>, %arg3: memref<256x128xbf16, #tpu.memory_space<vmem>>, %arg4: memref<2x128xf32, #tpu.memory_space<vmem>>, %arg5: memref<128x32xbf16, #tpu.memory_space<vmem>>, %arg6: memref<128x128xf32, #tpu.memory_space<vmem>>, %arg7: memref<2x128xf32, #tpu.memory_space<vmem>>, %arg8: memref<2x128xf32, #tpu.memory_space<vmem>>) attributes {dimension_semantics = [#tpu.dimension_semantics<arbitrary>, #tpu.dimension_semantics<arbitrary>], iteration_bounds = array<i64: 2, 1>, scalar_prefetch = 0 : i64, scratch_operands = 3 : i64, tpu.core_type = #tpu.core_type<tc>, window_params = [{transform_indices = @transform_0, window_bounds = array<i64: 128, 256>}, {pipeline_mode = #tpu.pipeline_mode<synchronous>, transform_indices = @transform_1, window_bounds = array<i64: 256, 128>}, {pipeline_mode = #tpu.pipeline_mode<synchronous>, transform_indices = @transform_2, window_bounds = array<i64: 2, 128>}, {transform_indices = @transform_3, window_bounds = array<i64: 128, 32>}]} {
    %c128_i32 = arith.constant 128 : i32
    %0 = arith.muli %arg1, %c128_i32 : i32
    %1 = tpu.assume_multiple %0, 128 : i32
    %c0_i32 = arith.constant 0 : i32
    %2 = arith.cmpi eq, %arg0, %c0_i32 : i32
    %3 = arith.extui %2 : i1 to i32
    %c0_i32_0 = arith.constant 0 : i32
    %4 = arith.cmpi ne, %3, %c0_i32_0 : i32
    scf.if %4 {
      %c0_i32_2 = arith.constant 0 : i32
      %8 = arith.cmpi eq, %arg1, %c0_i32_2 : i32
      %9 = arith.extui %8 : i1 to i32
      %c0_i32_3 = arith.constant 0 : i32
      %10 = arith.cmpi ne, %9, %c0_i32_3 : i32
      scf.if %10 {
        %cst_14 = arith.constant 0.000000e+00 : f32
        %25 = vector.broadcast %cst_14 : f32 to vector<2x128xf32>
        %c0_15 = arith.constant 0 : index
        %c0_16 = arith.constant 0 : index
        %26 = vector.load %arg7[%c0_15, %c0_16] : memref<2x128xf32, #tpu.memory_space<vmem>>, vector<2x128xf32>
        tpu.vector_store %arg7[%c0_15, %c0_16], %25 {strides = array<i32>} : memref<2x128xf32, #tpu.memory_space<vmem>>, vector<2x128xf32>,
      } else {
      }
      %c0 = arith.constant 0 : index
      %c0_4 = arith.constant 0 : index
      %11 = vector.load %arg2[%c0, %c0_4] : memref<128x256xbf16, #tpu.memory_space<vmem>>, vector<128x256xbf16>
      %c0_5 = arith.constant 0 : index
      %c0_6 = arith.constant 0 : index
      %12 = vector.load %arg3[%c0_5, %c0_6] : memref<256x128xbf16, #tpu.memory_space<vmem>>, vector<256x128xbf16>
      %cst = arith.constant dense<0.000000e+00> : vector<128x128xf32>
      %13 = tpu.matmul %11, %12, %cst {dimension_numbers = #tpu.dot_dimension_numbers<[1], [0], [0], [1], [0, 0, 1, 1], [], []>} : vector<128x256xbf16>, vector<256x128xbf16>, vector<128x128xf32> -> vector<128x128xf32>
      %14 = arith.index_cast %1 : i32 to index
      %c0_7 = arith.constant 0 : index
      %15 = vector.load %arg6[%14, %c0_7] : memref<128x128xf32, #tpu.memory_space<vmem>>, vector<128x128xf32>
      tpu.vector_store %arg6[%14, %c0_7], %13 {strides = array<i32>} : memref<128x128xf32, #tpu.memory_space<vmem>>, vector<128x128xf32>,
      %c0_8 = arith.constant 0 : index
      %c0_9 = arith.constant 0 : index
      %16 = vector.load %arg7[%c0_8, %c0_9] : memref<2x128xf32, #tpu.memory_space<vmem>>, vector<2x128xf32>
      %cst_10 = arith.constant dense<0.000000e+00> : vector<128xf32>
      %17 = vector.multi_reduction <add>, %13, %cst_10 [0] : vector<128x128xf32> to vector<128xf32>
      %18 = vector.shape_cast %17 : vector<128xf32> to vector<1x128xf32>
      %19 = arith.mulf %13, %13 : vector<128x128xf32>
      %cst_11 = arith.constant dense<0.000000e+00> : vector<128xf32>
      %20 = vector.multi_reduction <add>, %19, %cst_11 [0] : vector<128x128xf32> to vector<128xf32>
      %21 = vector.shape_cast %20 : vector<128xf32> to vector<1x128xf32>
      %22 = tpu.concatenate %18, %21 in 0 : vector<1x128xf32>, vector<1x128xf32> -> vector<2x128xf32>
      %23 = arith.addf %16, %22 : vector<2x128xf32>
      %c0_12 = arith.constant 0 : index
      %c0_13 = arith.constant 0 : index
      %24 = vector.load %arg7[%c0_12, %c0_13] : memref<2x128xf32, #tpu.memory_space<vmem>>, vector<2x128xf32>
      tpu.vector_store %arg7[%c0_12, %c0_13], %23 {strides = array<i32>} : memref<2x128xf32, #tpu.memory_space<vmem>>, vector<2x128xf32>,
    } else {
    }
    %c1_i32 = arith.constant 1 : i32
    %5 = arith.cmpi eq, %arg0, %c1_i32 : i32
    %6 = arith.extui %5 : i1 to i32
    %c0_i32_1 = arith.constant 0 : i32
    %7 = arith.cmpi ne, %6, %c0_i32_1 : i32
    scf.if %7 {
      %c0_i32_2 = arith.constant 0 : i32
      %8 = arith.cmpi eq, %arg1, %c0_i32_2 : i32
      %9 = arith.extui %8 : i1 to i32
      %c0_i32_3 = arith.constant 0 : i32
      %10 = arith.cmpi ne, %9, %c0_i32_3 : i32
      scf.if %10 {
        %c0_10 = arith.constant 0 : index
        %c0_11 = arith.constant 0 : index
        %27 = vector.load %arg7[%c0_10, %c0_11] : memref<2x128xf32, #tpu.memory_space<vmem>>, vector<1x128xf32>
        %cst_12 = arith.constant 7.812500e-03 : f32
        %28 = vector.broadcast %cst_12 : f32 to vector<1x128xf32>
        %29 = arith.mulf %27, %28 : vector<1x128xf32>
        %c1_13 = arith.constant 1 : index
        %c0_14 = arith.constant 0 : index
        %30 = vector.load %arg7[%c1_13, %c0_14] : memref<2x128xf32, #tpu.memory_space<vmem>>, vector<1x128xf32>
        %cst_15 = arith.constant 7.812500e-03 : f32
        %31 = vector.broadcast %cst_15 : f32 to vector<1x128xf32>
        %32 = arith.mulf %30, %31 : vector<1x128xf32>
        %33 = arith.mulf %29, %29 : vector<1x128xf32>
        %34 = arith.subf %32, %33 : vector<1x128xf32>
        %cst_16 = arith.constant 0.000000e+00 : f32
        %35 = vector.broadcast %cst_16 : f32 to vector<1x128xf32>
        %36 = arith.maximumf %34, %35 : vector<1x128xf32>
        %c0_17 = arith.constant 0 : index
        %c0_18 = arith.constant 0 : index
        %37 = vector.load %arg4[%c0_17, %c0_18] : memref<2x128xf32, #tpu.memory_space<vmem>>, vector<1x128xf32>
        %cst_19 = arith.constant 9.99999974E-6 : f32
        %38 = vector.broadcast %cst_19 : f32 to vector<1x128xf32>
        %39 = arith.addf %36, %38 : vector<1x128xf32>
        %40 = math.rsqrt %39 : vector<1x128xf32>
        %41 = arith.mulf %37, %40 : vector<1x128xf32>
        %c1_20 = arith.constant 1 : index
        %c0_21 = arith.constant 0 : index
        %42 = vector.load %arg4[%c1_20, %c0_21] : memref<2x128xf32, #tpu.memory_space<vmem>>, vector<1x128xf32>
        %43 = arith.mulf %29, %41 : vector<1x128xf32>
        %44 = arith.subf %42, %43 : vector<1x128xf32>
        %45 = tpu.concatenate %41, %44 in 0 : vector<1x128xf32>, vector<1x128xf32> -> vector<2x128xf32>
        %c0_22 = arith.constant 0 : index
        %c0_23 = arith.constant 0 : index
        %46 = vector.load %arg8[%c0_22, %c0_23] : memref<2x128xf32, #tpu.memory_space<vmem>>, vector<2x128xf32>
        tpu.vector_store %arg8[%c0_22, %c0_23], %45 {strides = array<i32>} : memref<2x128xf32, #tpu.memory_space<vmem>>, vector<2x128xf32>,
      } else {
      }
      %11 = arith.index_cast %1 : i32 to index
      %c0 = arith.constant 0 : index
      %12 = vector.load %arg6[%11, %c0] : memref<128x128xf32, #tpu.memory_space<vmem>>, vector<128x128xf32>
      %c0_4 = arith.constant 0 : index
      %c0_5 = arith.constant 0 : index
      %13 = vector.load %arg8[%c0_4, %c0_5] : memref<2x128xf32, #tpu.memory_space<vmem>>, vector<1x128xf32>
      %14 = vector.broadcast %13 : vector<1x128xf32> to vector<128x128xf32>
      %15 = arith.mulf %12, %14 : vector<128x128xf32>
      %c1 = arith.constant 1 : index
      %c0_6 = arith.constant 0 : index
      %16 = vector.load %arg8[%c1, %c0_6] : memref<2x128xf32, #tpu.memory_space<vmem>>, vector<1x128xf32>
      %17 = vector.broadcast %16 : vector<1x128xf32> to vector<128x128xf32>
      %18 = arith.addf %15, %17 : vector<128x128xf32>
      %cst = arith.constant 0.000000e+00 : f32
      %19 = vector.broadcast %cst : f32 to vector<128x128xf32>
      %20 = arith.cmpf oge, %18, %19 : vector<128x128xf32>
      %cst_7 = arith.constant 2.000000e-01 : f32
      %21 = vector.broadcast %cst_7 : f32 to vector<128x128xf32>
      %22 = arith.mulf %21, %18 : vector<128x128xf32>
      %23 = arith.select %20, %18, %22 : vector<128x128xi1>, vector<128x128xf32>
      %24 = vector.extract_strided_slice %23 {offsets = [0, 0], sizes = [128, 32], strides = [1, 1]} : vector<128x128xf32> to vector<128x32xf32>
      %25 = arith.truncf %24 : vector<128x32xf32> to vector<128x32xbf16>
      %c0_8 = arith.constant 0 : index
      %c0_9 = arith.constant 0 : index
      %26 = vector.load %arg5[%c0_8, %c0_9] : memref<128x32xbf16, #tpu.memory_space<vmem>>, vector<128x32xbf16>
      tpu.vector_store %arg5[%c0_8, %c0_9], %25 {strides = array<i32>} : memref<128x32xbf16, #tpu.memory_space<vmem>>, vector<128x32xbf16>,
    } else {
    }
    return
  }
  func.func @transform_0(%arg0: i32, %arg1: i32) -> (i32, i32) {
    %c1_i32 = arith.constant 1 : i32
    %0 = arith.subi %c1_i32, %arg0 : i32
    %1 = arith.muli %0, %arg1 : i32
    %c0_i32 = arith.constant 0 : i32
    %2 = arith.muli %arg0, %c0_i32 : i32
    %3 = arith.addi %1, %2 : i32
    %c0_i32_0 = arith.constant 0 : i32
    %c0_i32_1 = arith.constant 0 : i32
    return %3, %c0_i32_0 : i32, i32
  }
  func.func @transform_1(%arg0: i32, %arg1: i32) -> (i32, i32) {
    %c0_i32 = arith.constant 0 : i32
    %c0_i32_0 = arith.constant 0 : i32
    %c0_i32_1 = arith.constant 0 : i32
    return %c0_i32, %c0_i32_0 : i32, i32
  }
  func.func @transform_2(%arg0: i32, %arg1: i32) -> (i32, i32) {
    %c0_i32 = arith.constant 0 : i32
    %c0_i32_0 = arith.constant 0 : i32
    %c0_i32_1 = arith.constant 0 : i32
    return %c0_i32, %c0_i32_0 : i32, i32
  }
  func.func @transform_3(%arg0: i32, %arg1: i32) -> (i32, i32) {
    %0 = arith.muli %arg0, %arg1 : i32
    %c0_i32 = arith.constant 0 : i32
    %c0_i32_0 = arith.constant 0 : i32
    return %0, %c0_i32 : i32, i32
  }
}

module attributes {stable_mosaic.version = 11 : i64} {
  func.func @_fused_downblock_kernel(%arg0: i32, %arg1: i32, %arg2: memref<32x512xbf16, #tpu.memory_space<vmem>>, %arg3: memref<512x128xbf16, #tpu.memory_space<vmem>>, %arg4: memref<2x128xf32, #tpu.memory_space<vmem>>, %arg5: memref<32x64xbf16, #tpu.memory_space<vmem>>, %arg6: memref<32x128xf32, #tpu.memory_space<vmem>>, %arg7: memref<2x128xf32, #tpu.memory_space<vmem>>, %arg8: memref<2x128xf32, #tpu.memory_space<vmem>>) attributes {dimension_semantics = [#tpu.dimension_semantics<arbitrary>, #tpu.dimension_semantics<arbitrary>], iteration_bounds = array<i64: 2, 1>, scalar_prefetch = 0 : i64, scratch_operands = 3 : i64, tpu.core_type = #tpu.core_type<tc>, window_params = [{transform_indices = @transform_0, window_bounds = array<i64: 32, 512>}, {pipeline_mode = #tpu.pipeline_mode<synchronous>, transform_indices = @transform_1, window_bounds = array<i64: 512, 128>}, {pipeline_mode = #tpu.pipeline_mode<synchronous>, transform_indices = @transform_2, window_bounds = array<i64: 2, 128>}, {transform_indices = @transform_3, window_bounds = array<i64: 32, 64>}]} {
    %c32_i32 = arith.constant 32 : i32
    %0 = arith.muli %arg1, %c32_i32 : i32
    %1 = tpu.assume_multiple %0, 32 : i32
    %c0_i32 = arith.constant 0 : i32
    %2 = arith.cmpi eq, %arg0, %c0_i32 : i32
    %3 = arith.extui %2 : i1 to i32
    %c0_i32_0 = arith.constant 0 : i32
    %4 = arith.cmpi ne, %3, %c0_i32_0 : i32
    scf.if %4 {
      %c0_i32_2 = arith.constant 0 : i32
      %8 = arith.cmpi eq, %arg1, %c0_i32_2 : i32
      %9 = arith.extui %8 : i1 to i32
      %c0_i32_3 = arith.constant 0 : i32
      %10 = arith.cmpi ne, %9, %c0_i32_3 : i32
      scf.if %10 {
        %cst_14 = arith.constant 0.000000e+00 : f32
        %25 = vector.broadcast %cst_14 : f32 to vector<2x128xf32>
        %c0_15 = arith.constant 0 : index
        %c0_16 = arith.constant 0 : index
        %26 = vector.load %arg7[%c0_15, %c0_16] : memref<2x128xf32, #tpu.memory_space<vmem>>, vector<2x128xf32>
        tpu.vector_store %arg7[%c0_15, %c0_16], %25 {strides = array<i32>} : memref<2x128xf32, #tpu.memory_space<vmem>>, vector<2x128xf32>,
      } else {
      }
      %c0 = arith.constant 0 : index
      %c0_4 = arith.constant 0 : index
      %11 = vector.load %arg2[%c0, %c0_4] : memref<32x512xbf16, #tpu.memory_space<vmem>>, vector<32x512xbf16>
      %c0_5 = arith.constant 0 : index
      %c0_6 = arith.constant 0 : index
      %12 = vector.load %arg3[%c0_5, %c0_6] : memref<512x128xbf16, #tpu.memory_space<vmem>>, vector<512x128xbf16>
      %cst = arith.constant dense<0.000000e+00> : vector<32x128xf32>
      %13 = tpu.matmul %11, %12, %cst {dimension_numbers = #tpu.dot_dimension_numbers<[1], [0], [0], [1], [0, 0, 1, 1], [], []>} : vector<32x512xbf16>, vector<512x128xbf16>, vector<32x128xf32> -> vector<32x128xf32>
      %14 = arith.index_cast %1 : i32 to index
      %c0_7 = arith.constant 0 : index
      %15 = vector.load %arg6[%14, %c0_7] : memref<32x128xf32, #tpu.memory_space<vmem>>, vector<32x128xf32>
      tpu.vector_store %arg6[%14, %c0_7], %13 {strides = array<i32>} : memref<32x128xf32, #tpu.memory_space<vmem>>, vector<32x128xf32>,
      %c0_8 = arith.constant 0 : index
      %c0_9 = arith.constant 0 : index
      %16 = vector.load %arg7[%c0_8, %c0_9] : memref<2x128xf32, #tpu.memory_space<vmem>>, vector<2x128xf32>
      %cst_10 = arith.constant dense<0.000000e+00> : vector<128xf32>
      %17 = vector.multi_reduction <add>, %13, %cst_10 [0] : vector<32x128xf32> to vector<128xf32>
      %18 = vector.shape_cast %17 : vector<128xf32> to vector<1x128xf32>
      %19 = arith.mulf %13, %13 : vector<32x128xf32>
      %cst_11 = arith.constant dense<0.000000e+00> : vector<128xf32>
      %20 = vector.multi_reduction <add>, %19, %cst_11 [0] : vector<32x128xf32> to vector<128xf32>
      %21 = vector.shape_cast %20 : vector<128xf32> to vector<1x128xf32>
      %22 = tpu.concatenate %18, %21 in 0 : vector<1x128xf32>, vector<1x128xf32> -> vector<2x128xf32>
      %23 = arith.addf %16, %22 : vector<2x128xf32>
      %c0_12 = arith.constant 0 : index
      %c0_13 = arith.constant 0 : index
      %24 = vector.load %arg7[%c0_12, %c0_13] : memref<2x128xf32, #tpu.memory_space<vmem>>, vector<2x128xf32>
      tpu.vector_store %arg7[%c0_12, %c0_13], %23 {strides = array<i32>} : memref<2x128xf32, #tpu.memory_space<vmem>>, vector<2x128xf32>,
    } else {
    }
    %c1_i32 = arith.constant 1 : i32
    %5 = arith.cmpi eq, %arg0, %c1_i32 : i32
    %6 = arith.extui %5 : i1 to i32
    %c0_i32_1 = arith.constant 0 : i32
    %7 = arith.cmpi ne, %6, %c0_i32_1 : i32
    scf.if %7 {
      %c0_i32_2 = arith.constant 0 : i32
      %8 = arith.cmpi eq, %arg1, %c0_i32_2 : i32
      %9 = arith.extui %8 : i1 to i32
      %c0_i32_3 = arith.constant 0 : i32
      %10 = arith.cmpi ne, %9, %c0_i32_3 : i32
      scf.if %10 {
        %c0_10 = arith.constant 0 : index
        %c0_11 = arith.constant 0 : index
        %27 = vector.load %arg7[%c0_10, %c0_11] : memref<2x128xf32, #tpu.memory_space<vmem>>, vector<1x128xf32>
        %cst_12 = arith.constant 3.125000e-02 : f32
        %28 = vector.broadcast %cst_12 : f32 to vector<1x128xf32>
        %29 = arith.mulf %27, %28 : vector<1x128xf32>
        %c1_13 = arith.constant 1 : index
        %c0_14 = arith.constant 0 : index
        %30 = vector.load %arg7[%c1_13, %c0_14] : memref<2x128xf32, #tpu.memory_space<vmem>>, vector<1x128xf32>
        %cst_15 = arith.constant 3.125000e-02 : f32
        %31 = vector.broadcast %cst_15 : f32 to vector<1x128xf32>
        %32 = arith.mulf %30, %31 : vector<1x128xf32>
        %33 = arith.mulf %29, %29 : vector<1x128xf32>
        %34 = arith.subf %32, %33 : vector<1x128xf32>
        %cst_16 = arith.constant 0.000000e+00 : f32
        %35 = vector.broadcast %cst_16 : f32 to vector<1x128xf32>
        %36 = arith.maximumf %34, %35 : vector<1x128xf32>
        %c0_17 = arith.constant 0 : index
        %c0_18 = arith.constant 0 : index
        %37 = vector.load %arg4[%c0_17, %c0_18] : memref<2x128xf32, #tpu.memory_space<vmem>>, vector<1x128xf32>
        %cst_19 = arith.constant 9.99999974E-6 : f32
        %38 = vector.broadcast %cst_19 : f32 to vector<1x128xf32>
        %39 = arith.addf %36, %38 : vector<1x128xf32>
        %40 = math.rsqrt %39 : vector<1x128xf32>
        %41 = arith.mulf %37, %40 : vector<1x128xf32>
        %c1_20 = arith.constant 1 : index
        %c0_21 = arith.constant 0 : index
        %42 = vector.load %arg4[%c1_20, %c0_21] : memref<2x128xf32, #tpu.memory_space<vmem>>, vector<1x128xf32>
        %43 = arith.mulf %29, %41 : vector<1x128xf32>
        %44 = arith.subf %42, %43 : vector<1x128xf32>
        %45 = tpu.concatenate %41, %44 in 0 : vector<1x128xf32>, vector<1x128xf32> -> vector<2x128xf32>
        %c0_22 = arith.constant 0 : index
        %c0_23 = arith.constant 0 : index
        %46 = vector.load %arg8[%c0_22, %c0_23] : memref<2x128xf32, #tpu.memory_space<vmem>>, vector<2x128xf32>
        tpu.vector_store %arg8[%c0_22, %c0_23], %45 {strides = array<i32>} : memref<2x128xf32, #tpu.memory_space<vmem>>, vector<2x128xf32>,
      } else {
      }
      %11 = arith.index_cast %1 : i32 to index
      %c0 = arith.constant 0 : index
      %12 = vector.load %arg6[%11, %c0] : memref<32x128xf32, #tpu.memory_space<vmem>>, vector<32x128xf32>
      %c0_4 = arith.constant 0 : index
      %c0_5 = arith.constant 0 : index
      %13 = vector.load %arg8[%c0_4, %c0_5] : memref<2x128xf32, #tpu.memory_space<vmem>>, vector<1x128xf32>
      %14 = vector.broadcast %13 : vector<1x128xf32> to vector<32x128xf32>
      %15 = arith.mulf %12, %14 : vector<32x128xf32>
      %c1 = arith.constant 1 : index
      %c0_6 = arith.constant 0 : index
      %16 = vector.load %arg8[%c1, %c0_6] : memref<2x128xf32, #tpu.memory_space<vmem>>, vector<1x128xf32>
      %17 = vector.broadcast %16 : vector<1x128xf32> to vector<32x128xf32>
      %18 = arith.addf %15, %17 : vector<32x128xf32>
      %cst = arith.constant 0.000000e+00 : f32
      %19 = vector.broadcast %cst : f32 to vector<32x128xf32>
      %20 = arith.cmpf oge, %18, %19 : vector<32x128xf32>
      %cst_7 = arith.constant 2.000000e-01 : f32
      %21 = vector.broadcast %cst_7 : f32 to vector<32x128xf32>
      %22 = arith.mulf %21, %18 : vector<32x128xf32>
      %23 = arith.select %20, %18, %22 : vector<32x128xi1>, vector<32x128xf32>
      %24 = vector.extract_strided_slice %23 {offsets = [0, 0], sizes = [32, 64], strides = [1, 1]} : vector<32x128xf32> to vector<32x64xf32>
      %25 = arith.truncf %24 : vector<32x64xf32> to vector<32x64xbf16>
      %c0_8 = arith.constant 0 : index
      %c0_9 = arith.constant 0 : index
      %26 = vector.load %arg5[%c0_8, %c0_9] : memref<32x64xbf16, #tpu.memory_space<vmem>>, vector<32x64xbf16>
      tpu.vector_store %arg5[%c0_8, %c0_9], %25 {strides = array<i32>} : memref<32x64xbf16, #tpu.memory_space<vmem>>, vector<32x64xbf16>,
    } else {
    }
    return
  }
  func.func @transform_0(%arg0: i32, %arg1: i32) -> (i32, i32) {
    %c1_i32 = arith.constant 1 : i32
    %0 = arith.subi %c1_i32, %arg0 : i32
    %1 = arith.muli %0, %arg1 : i32
    %c0_i32 = arith.constant 0 : i32
    %2 = arith.muli %arg0, %c0_i32 : i32
    %3 = arith.addi %1, %2 : i32
    %c0_i32_0 = arith.constant 0 : i32
    %c0_i32_1 = arith.constant 0 : i32
    return %3, %c0_i32_0 : i32, i32
  }
  func.func @transform_1(%arg0: i32, %arg1: i32) -> (i32, i32) {
    %c0_i32 = arith.constant 0 : i32
    %c0_i32_0 = arith.constant 0 : i32
    %c0_i32_1 = arith.constant 0 : i32
    return %c0_i32, %c0_i32_0 : i32, i32
  }
  func.func @transform_2(%arg0: i32, %arg1: i32) -> (i32, i32) {
    %c0_i32 = arith.constant 0 : i32
    %c0_i32_0 = arith.constant 0 : i32
    %c0_i32_1 = arith.constant 0 : i32
    return %c0_i32, %c0_i32_0 : i32, i32
  }
  func.func @transform_3(%arg0: i32, %arg1: i32) -> (i32, i32) {
    %0 = arith.muli %arg0, %arg1 : i32
    %c0_i32 = arith.constant 0 : i32
    %c0_i32_0 = arith.constant 0 : i32
    return %0, %c0_i32 : i32, i32
  }
}

module attributes {stable_mosaic.version = 11 : i64} {
  func.func @_classifier_kernel(%arg0: i32, %arg1: memref<16x1024xbf16, #tpu.memory_space<vmem>>, %arg2: memref<1x1024xbf16, #tpu.memory_space<vmem>>, %arg3: memref<16x1xf32, #tpu.memory_space<vmem>>) attributes {dimension_semantics = [#tpu.dimension_semantics<parallel>], iteration_bounds = array<i64: 1>, scalar_prefetch = 0 : i64, scratch_operands = 0 : i64, tpu.core_type = #tpu.core_type<tc>, window_params = [{transform_indices = @transform_0, window_bounds = array<i64: 16, 1024>}, {pipeline_mode = #tpu.pipeline_mode<synchronous>, transform_indices = @transform_1, window_bounds = array<i64: 1, 1024>}, {transform_indices = @transform_2, window_bounds = array<i64: 16, 1>}]} {
    %c0 = arith.constant 0 : index
    %c0_0 = arith.constant 0 : index
    %0 = vector.load %arg1[%c0, %c0_0] : memref<16x1024xbf16, #tpu.memory_space<vmem>>, vector<16x1024xbf16>
    %1 = arith.extf %0 : vector<16x1024xbf16> to vector<16x1024xf32>
    %c0_1 = arith.constant 0 : index
    %c0_2 = arith.constant 0 : index
    %2 = vector.load %arg2[%c0_1, %c0_2] : memref<1x1024xbf16, #tpu.memory_space<vmem>>, vector<1x1024xbf16>
    %3 = arith.extf %2 : vector<1x1024xbf16> to vector<1x1024xf32>
    %4 = vector.broadcast %3 : vector<1x1024xf32> to vector<16x1024xf32>
    %5 = arith.mulf %1, %4 : vector<16x1024xf32>
    %cst = arith.constant dense<0.000000e+00> : vector<16xf32>
    %6 = vector.multi_reduction <add>, %5, %cst [1] : vector<16x1024xf32> to vector<16xf32>
    %7 = vector.shape_cast %6 : vector<16xf32> to vector<16x1xf32>
    %cst_3 = arith.constant 0.000000e+00 : f32
    %8 = vector.broadcast %cst_3 : f32 to vector<16x1xf32>
    %9 = arith.subf %8, %7 : vector<16x1xf32>
    %10 = math.exp %9 : vector<16x1xf32>
    %cst_4 = arith.constant 1.000000e+00 : f32
    %11 = vector.broadcast %cst_4 : f32 to vector<16x1xf32>
    %12 = arith.addf %11, %10 : vector<16x1xf32>
    %13 = tpu.reciprocal %12 {approx = true} : vector<16x1xf32> -> vector<16x1xf32>
    %c0_5 = arith.constant 0 : index
    %c0_6 = arith.constant 0 : index
    %14 = vector.load %arg3[%c0_5, %c0_6] : memref<16x1xf32, #tpu.memory_space<vmem>>, vector<16x1xf32>
    tpu.vector_store %arg3[%c0_5, %c0_6], %13 {strides = array<i32>} : memref<16x1xf32, #tpu.memory_space<vmem>>, vector<16x1xf32>,
    return
  }
  func.func @transform_0(%arg0: i32) -> (i32, i32) {
    %c0_i32 = arith.constant 0 : i32
    %c0_i32_0 = arith.constant 0 : i32
    return %arg0, %c0_i32 : i32, i32
  }
  func.func @transform_1(%arg0: i32) -> (i32, i32) {
    %c0_i32 = arith.constant 0 : i32
    %c0_i32_0 = arith.constant 0 : i32
    %c0_i32_1 = arith.constant 0 : i32
    return %c0_i32, %c0_i32_0 : i32, i32
  }
  func.func @transform_2(%arg0: i32) -> (i32, i32) {
    %c0_i32 = arith.constant 0 : i32
    %c0_i32_0 = arith.constant 0 : i32
    return %arg0, %c0_i32 : i32, i32
  }
}

</mosaic_0001>

<bundles_post_ra>
// kernel: discriminator_forward.4
= control target key start
LH: loop header
LB: loop body
LE: loop exit
PB: predicated region body
PF: predicated region fallthrough
CT: control target
= control target key end

     0   :  { %s2343_s12 = smov 0   ;;  %s2345_s13 = smov 0   ;;  %s3081_s0 = inlined_call_operand.vmem [shape: bf16[512,128], index: 0, kind: input, shape index: {}]   ;;  %s3082_s1 = inlined_call_operand.vmem [shape: bf16[128,128], index: 1, kind: input, shape index: {}]   ;;  %s3083_s2 = inlined_call_operand.vmem [shape: f32[2,128], index: 2, kind: input, shape index: {}]   ;;  %s3084_s3 = inlined_call_operand.vmem [shape: bf16[512,16], index: 3, kind: output, shape index: {}]  }
   0x1   :  { %s2347_s14 = smov 0  }
   0x2 LB: > { %s25_s15 = sadd.s32 1, %s2316_s13  ;;  %p1918_p0 = scmp.ge.s32.totalorder %s2320_s14, 1  ;;  %s2320_s14 = sphi %s2347_s14, %s13_s14   ;;  %s2316_s13 = sphi %s2345_s13, %s3086_s13   ;;  %s2312_s12 = sphi %s2343_s12, %s3085_s12  }
   0x3   : > { %p27_p1 = scmp.ge.s32.totalorder %s25_s15, 2  ;;  %p160_p2 = scmp.lt.s32.totalorder %s2320_s14, 3 }
   0x5   : > { %s3088_s15 = smov (%p27_p1, %s25_s15), 0  ;;  %p161_p3 = pnand %p1918_p0, %p160_p2 }
   0x6   : > { %p1919_p4 = scmp.ne.s32.totalorder (!%p161_p3), %s2312_s12, 0 }
   0x7   : > { %164 = sbr.rel (%p161_p3) target bundleno = 543 (0x21f), region = 32 }
   0xc   : > { %210 = sbr.rel (%p1919_p4) target bundleno = 393 (0x189), region = 36 }
  0x11   : > { %v2256_v0 = vld [vmem:[%s3082_s1 + $0x38] sm:$0xff]   ;;  %v2257_v1 = vld [vmem:[%s3082_s1 + $0x30] sm:$0xff]   ;;  %v2258_v2 = vld [vmem:[%s3082_s1 + $0x28] sm:$0xff]   ;;  %v2322_v42 = vmov 0.0   ;;  %vm1093_vm0 = vcmask 1040384  }
  0x12   : > { %2135 = vmatprep.subr.bf16.mxu0 %v2256_v0  ;;  %2215 = vmatprep.subr.bf16.mxu1 %v2256_v0  ;;  %v2259_v3 = vld [vmem:[%s3082_s1 + $0x20] sm:$0xff]   ;;  %v2260_v5 = vld [vmem:[%s3082_s1 + $0x18] sm:$0xff]   ;;  %v2261_v6 = vld [vmem:[%s3082_s1 + $0x10] sm:$0xff]   ;;  %215 = vst [vmem:[#allocation3] sm:$0x3] %v2322_v42 }
  0x13   : > { %2136 = vmatpush3.bf16.msra.mxu0 %v2256_v0  ;;  %2223 = vmatpush3.bf16.msra.mxu1 %v2256_v0  ;;  %v2264_v4 = vld [vmem:[%s3081_s0] sm:$0xff]   ;;  %v2262_v7 = vld [vmem:[%s3082_s1 + $0x8] sm:$0xff]   ;;  %v2266_v11 = vld [vmem:[%s3081_s0 + $0x10] sm:$0xff]  }
  0x14   : > { %2137 = vmatprep.subr.bf16.mxu0 %v2257_v1  ;;  %2216 = vmatprep.subr.bf16.mxu1 %v2257_v1  ;;  %v2263_v8 = vld [vmem:[%s3082_s1] sm:$0xff]   ;;  %v2265_v10 = vld [vmem:[%s3081_s0 + $0x8] sm:$0xff]   ;;  %v2282_v13 = vld [vmem:[%s3081_s0 + $0x90] sm:$0xff]  }
  0x15   : > { %2151 = vmatprep.mubr.bf16.mxu0 %v2264_v4  ;;  %v2280_v9 = vld [vmem:[%s3081_s0 + $0x80] sm:$0xff]   ;;  %v2281_v12 = vld [vmem:[%s3081_s0 + $0x88] sm:$0xff]   ;;  %v2267_v14 = vld [vmem:[%s3081_s0 + $0x18] sm:$0xff]  }
  0x16   : > { %2183 = vmatprep.mubr.bf16.mxu1 %v2280_v9  ;;  %v2268_v15 = vld [vmem:[%s3081_s0 + $0x20] sm:$0xff]   ;;  %v2283_v16 = vld [vmem:[%s3081_s0 + $0x98] sm:$0xff]   ;;  %v2269_v18 = vld [vmem:[%s3081_s0 + $0x28] sm:$0xff]  }
  0x17   : > { %2138 = vmatpush3.bf16.msra.mxu0 %v2257_v1  ;;  %2224 = vmatpush3.bf16.msra.mxu1 %v2257_v1  ;;  %v2284_v17 = vld [vmem:[%s3081_s0 + $0xa0] sm:$0xff]   ;;  %v2285_v19 = vld [vmem:[%s3081_s0 + $0xa8] sm:$0xff]   ;;  %v2270_v20 = vld [vmem:[%s3081_s0 + $0x30] sm:$0xff]  }
  0x18   : > { %2139 = vmatprep.subr.bf16.mxu0 %v2258_v2  ;;  %2217 = vmatprep.subr.bf16.mxu1 %v2258_v2  ;;  %v2286_v21 = vld [vmem:[%s3081_s0 + $0xb0] sm:$0xff]   ;;  %v2271_v22 = vld [vmem:[%s3081_s0 + $0x38] sm:$0xff]   ;;  %v2272_v24 = vld [vmem:[%s3081_s0 + $0x40] sm:$0xff]  }
  0x19   : > { %v2287_v23 = vld [vmem:[%s3081_s0 + $0xb8] sm:$0xff]   ;;  %v2288_v25 = vld [vmem:[%s3081_s0 + $0xc0] sm:$0xff]   ;;  %v2273_v26 = vld [vmem:[%s3081_s0 + $0x48] sm:$0xff]  }
  0x1a   : > { %v2289_v27 = vld [vmem:[%s3081_s0 + $0xc8] sm:$0xff]   ;;  %v2274_v28 = vld [vmem:[%s3081_s0 + $0x50] sm:$0xff]   ;;  %v2275_v30 = vld [vmem:[%s3081_s0 + $0x58] sm:$0xff]  }
  0x1b   : > { %2140 = vmatpush3.bf16.msra.mxu0 %v2258_v2  ;;  %2225 = vmatpush3.bf16.msra.mxu1 %v2258_v2  ;;  %v2290_v29 = vld [vmem:[%s3081_s0 + $0xd0] sm:$0xff]   ;;  %v2291_v31 = vld [vmem:[%s3081_s0 + $0xd8] sm:$0xff]   ;;  %v2276_v32 = vld [vmem:[%s3081_s0 + $0x60] sm:$0xff]  }
  0x1c   : > { %2141 = vmatprep.subr.bf16.mxu0 %v2259_v3  ;;  %2218 = vmatprep.subr.bf16.mxu1 %v2259_v3  ;;  %v2292_v33 = vld [vmem:[%s3081_s0 + $0xe0] sm:$0xff]   ;;  %v2277_v34 = vld [vmem:[%s3081_s0 + $0x68] sm:$0xff]   ;;  %v2278_v36 = vld [vmem:[%s3081_s0 + $0x70] sm:$0xff]  }
  0x1d   : > { %v2293_v35 = vld [vmem:[%s3081_s0 + $0xe8] sm:$0xff]   ;;  %v2294_v37 = vld [vmem:[%s3081_s0 + $0xf0] sm:$0xff]   ;;  %v2279_v38 = vld [vmem:[%s3081_s0 + $0x78] sm:$0xff]  }
  0x1e   : > { %v2295_v39 = vld [vmem:[%s3081_s0 + $0xf8] sm:$0xff]  }
  0x1f   : > { %2142 = vmatpush3.bf16.msra.mxu0 %v2259_v3  ;;  %2226 = vmatpush3.bf16.msra.mxu1 %v2259_v3 }
  0x20   : > { %2143 = vmatprep.subr.bf16.mxu0 %v2260_v5  ;;  %2219 = vmatprep.subr.bf16.mxu1 %v2260_v5 }
  0x23   : > { %2144 = vmatpush3.bf16.msra.mxu0 %v2260_v5  ;;  %2227 = vmatpush3.bf16.msra.mxu1 %v2260_v5 }
  0x24   : > { %2145 = vmatprep.subr.bf16.mxu0 %v2261_v6  ;;  %2220 = vmatprep.subr.bf16.mxu1 %v2261_v6 }
  0x27   : > { %2146 = vmatpush3.bf16.msra.mxu0 %v2261_v6  ;;  %2228 = vmatpush3.bf16.msra.mxu1 %v2261_v6 }
  0x28   : > { %2147 = vmatprep.subr.bf16.mxu0 %v2262_v7  ;;  %2221 = vmatprep.subr.bf16.mxu1 %v2262_v7 }
  0x2b   : > { %2148 = vmatpush3.bf16.msra.mxu0 %v2262_v7  ;;  %2229 = vmatpush3.bf16.msra.mxu1 %v2262_v7 }
  0x2c   : > { %2149 = vmatprep.subr.bf16.mxu0 %v2263_v8  ;;  %2222 = vmatprep.subr.bf16.mxu1 %v2263_v8 }
  0x2f   : > { %2150 = vmatpush3.bf16.msra.mxu0 %v2263_v8  ;;  %2230 = vmatpush3.bf16.msra.mxu1 %v2263_v8 }
  0x32   : > { %2152 = vmatmul.mubr.bf16.vlgmr.msra.gmra.mxu0 %v2265_v10  ;;  %2184 = vmatmul.mubr.bf16.vlgmr.msra.gmra.mxu1 %v2281_v12 }
  0x33   : > { %2155 = vmatprep.mubr.bf16.mxu0 %v2266_v11  ;;  %2187 = vmatprep.mubr.bf16.mxu1 %v2282_v13 }
  0x3a   : > { %2156 = vmatmul.mubr.bf16.gmra.mxu0 %v2267_v14  ;;  %2188 = vmatmul.mubr.bf16.gmra.mxu1 %v2283_v16 }
  0x3b   : > { %2159 = vmatprep.mubr.bf16.mxu0 %v2268_v15  ;;  %2191 = vmatprep.mubr.bf16.mxu1 %v2284_v17 }
  0x42   : > { %2160 = vmatmul.mubr.bf16.gmra.mxu0 %v2269_v18  ;;  %2192 = vmatmul.mubr.bf16.gmra.mxu1 %v2285_v19 }
  0x43   : > { %2163 = vmatprep.mubr.bf16.mxu0 %v2270_v20  ;;  %2195 = vmatprep.mubr.bf16.mxu1 %v2286_v21 }
  0x4a   : > { %2164 = vmatmul.mubr.bf16.gmra.mxu0 %v2271_v22  ;;  %2196 = vmatmul.mubr.bf16.gmra.mxu1 %v2287_v23 }
  0x4b   : > { %2167 = vmatprep.mubr.bf16.mxu0 %v2272_v24  ;;  %2199 = vmatprep.mubr.bf16.mxu1 %v2288_v25 }
  0x52   : > { %2168 = vmatmul.mubr.bf16.gmra.mxu0 %v2273_v26  ;;  %2200 = vmatmul.mubr.bf16.gmra.mxu1 %v2289_v27 }
  0x53   : > { %2171 = vmatprep.mubr.bf16.mxu0 %v2274_v28  ;;  %2203 = vmatprep.mubr.bf16.mxu1 %v2290_v29 }
  0x5a   : > { %2172 = vmatmul.mubr.bf16.gmra.mxu0 %v2275_v30  ;;  %2204 = vmatmul.mubr.bf16.gmra.mxu1 %v2291_v31 }
  0x5b   : > { %2175 = vmatprep.mubr.bf16.mxu0 %v2276_v32  ;;  %2207 = vmatprep.mubr.bf16.mxu1 %v2292_v33 }
  0x62   : > { %2176 = vmatmul.mubr.bf16.gmra.mxu0 %v2277_v34  ;;  %2208 = vmatmul.mubr.bf16.gmra.mxu1 %v2293_v35 }
  0x63   : > { %2179 = vmatprep.mubr.bf16.mxu0 %v2278_v36  ;;  %2211 = vmatprep.mubr.bf16.mxu1 %v2294_v37 }
  0x6a   : > { %2180 = vmatmul.mubr.bf16.gmra.mxu0 %v2279_v38  ;;  %2212 = vmatmul.mubr.bf16.gmra.mxu1 %v2295_v39 }
  0xf2   : > { %v2153_v40 = vpop.f32.mrf.mxu0  ;;  %v2484_v41 = vpop.f32.mrf.mxu1 }
  0xf3   : > { %828 = vst [vmem:[#allocation2 + $0xd8] sm:$0xff] %v2153_v40  ;;  %860 = vst [vmem:[#allocation2 + $0x100] sm:$0xff] %v2484_v41  ;;  %v962_v54 = vmul.f32 %v2153_v40, %v2153_v40 }
  0xf4   : > { %v570_v43 = vpop.f32.mrf.mxu0  ;;  %v2487_v44 = vpop.f32.mrf.mxu1 }
  0xf5   : > { %826 = vst [vmem:[#allocation2 + $0xb0] sm:$0xff] %v570_v43  ;;  %858 = vst [vmem:[#allocation2 + $0x148] sm:$0xff] %v2487_v44  ;;  %v960_v49 = vmul.f32 %v570_v43, %v570_v43 }
  0xf6   : > { %v2154_v45 = vpop.f32.mrf.mxu0  ;;  %v2490_v46 = vpop.f32.mrf.mxu1 }
  0xf7   : > { %829 = vst [vmem:[#allocation2 + $0x18] sm:$0xff] %v2154_v45  ;;  %861 = vst [vmem:[#allocation2 + $0xc8] sm:$0xff] %v2490_v46  ;;  %v963_v59 = vmul.f32 %v2154_v45, %v2154_v45 }
  0xf8   : > { %v573_v47 = vpop.f32.mrf.mxu0  ;;  %v2493_v48 = vpop.f32.mrf.mxu1 }
  0xf9   : > { %827 = vst [vmem:[#allocation2 + $0x1b0] sm:$0xff] %v573_v47  ;;  %v891_v50 = vadd.f32 %v573_v47, %v570_v43  ;;  %v961_v51 = vmul.f32 %v573_v47, %v573_v47  ;;  %859 = vst [vmem:[#allocation2 + $0x1d0] sm:$0xff] %v2493_v48 }
  0xfa   : > { %v2157_v52 = vpop.f32.mrf.mxu0  ;;  %v2496_v53 = vpop.f32.mrf.mxu1 }
  0xfb   : > { %v892_v55 = vadd.f32 %v2153_v40, %v891_v50  ;;  %v1024_v56 = vadd.f32 %v961_v51, %v960_v49  ;;  %832 = vst [vmem:[#allocation2 + $0x130] sm:$0xff] %v2157_v52  ;;  %864 = vst [vmem:[#allocation2 + $0x20] sm:$0xff] %v2496_v53  ;;  %v966_v10 = vmul.f32 %v2157_v52, %v2157_v52 }
  0xfc   : > { %v586_v57 = vpop.f32.mrf.mxu0  ;;  %v2499_v58 = vpop.f32.mrf.mxu1 }
  0xfd   : > { %v1025_v60 = vadd.f32 %v1024_v56, %v962_v54  ;;  %830 = vst [vmem:[#allocation2 + $0x50] sm:$0xff] %v586_v57  ;;  %v893_v61 = vadd.f32 %v2154_v45, %v892_v55  ;;  %862 = vst [vmem:[#allocation2 + $0x40] sm:$0xff] %v2499_v58  ;;  %v964_v1 = vmul.f32 %v586_v57, %v586_v57 }
  0xfe   : > { %v2158_v62 = vpop.f32.mrf.mxu0  ;;  %v2502_v63 = vpop.f32.mrf.mxu1 }
  0xff   : > { %v894_v0 = vadd.f32 %v893_v61, %v586_v57  ;;  %v1026_v2 = vadd.f32 %v1025_v60, %v963_v59  ;;  %833 = vst [vmem:[#allocation2 + $0x48] sm:$0xff] %v2158_v62  ;;  %865 = vst [vmem:[#allocation2 + $0x128] sm:$0xff] %v2502_v63  ;;  %v967_v15 = vmul.f32 %v2158_v62, %v2158_v62 }
 0x100   : > { %v589_v3 = vpop.f32.mrf.mxu0  ;;  %v2505_v4 = vpop.f32.mrf.mxu1 }
 0x101   : > { %v1027_v5 = vadd.f32 %v1026_v2, %v964_v1  ;;  %831 = vst [vmem:[#allocation2 + $0x168] sm:$0xff] %v589_v3  ;;  %v895_v6 = vadd.f32 %v894_v0, %v589_v3  ;;  %v965_v7 = vmul.f32 %v589_v3, %v589_v3  ;;  %863 = vst [vmem:[#allocation2 + $0x1f8] sm:$0xff] %v2505_v4 }
 0x102   : > { %v2161_v8 = vpop.f32.mrf.mxu0  ;;  %v2508_v9 = vpop.f32.mrf.mxu1 }
 0x103   : > { %v896_v11 = vadd.f32 %v2157_v52, %v895_v6  ;;  %v1028_v12 = vadd.f32 %v1027_v5, %v965_v7  ;;  %836 = vst [vmem:[#allocation2 + $0x118] sm:$0xff] %v2161_v8  ;;  %868 = vst [vmem:[#allocation2 + $0xe8] sm:$0xff] %v2508_v9  ;;  %v970_v30 = vmul.f32 %v2161_v8, %v2161_v8 }
 0x104   : > { %v602_v13 = vpop.f32.mrf.mxu0  ;;  %v2511_v14 = vpop.f32.mrf.mxu1 }
 0x105   : > { %v1029_v16 = vadd.f32 %v1028_v12, %v966_v10  ;;  %834 = vst [vmem:[#allocation2 + $0x180] sm:$0xff] %v602_v13  ;;  %v897_v17 = vadd.f32 %v2158_v62, %v896_v11  ;;  %866 = vst [vmem:[#allocation2 + $0x1a0] sm:$0xff] %v2511_v14  ;;  %v968_v21 = vmul.f32 %v602_v13, %v602_v13 }
 0x106   : > { %v2162_v18 = vpop.f32.mrf.mxu0  ;;  %v2514_v19 = vpop.f32.mrf.mxu1 }
 0x107   : > { %v898_v20 = vadd.f32 %v897_v17, %v602_v13  ;;  %v1030_v22 = vadd.f32 %v1029_v16, %v967_v15  ;;  %837 = vst [vmem:[#allocation2 + $0x98] sm:$0xff] %v2162_v18  ;;  %869 = vst [vmem:[#allocation2 + $0x78] sm:$0xff] %v2514_v19  ;;  %v971_v35 = vmul.f32 %v2162_v18, %v2162_v18 }
 0x108   : > { %v605_v23 = vpop.f32.mrf.mxu0  ;;  %v2517_v24 = vpop.f32.mrf.mxu1 }
 0x109   : > { %v1031_v25 = vadd.f32 %v1030_v22, %v968_v21  ;;  %835 = vst [vmem:[#allocation2 + $0x110] sm:$0xff] %v605_v23  ;;  %v899_v26 = vadd.f32 %v898_v20, %v605_v23  ;;  %v969_v27 = vmul.f32 %v605_v23, %v605_v23  ;;  %867 = vst [vmem:[#allocation2 + $0x1f0] sm:$0xff] %v2517_v24 }
 0x10a   : > { %v2165_v28 = vpop.f32.mrf.mxu0  ;;  %v2520_v29 = vpop.f32.mrf.mxu1 }
 0x10b   : > { %v900_v31 = vadd.f32 %v2161_v8, %v899_v26  ;;  %v1032_v32 = vadd.f32 %v1031_v25, %v969_v27  ;;  %840 = vst [vmem:[#allocation2 + $0x108] sm:$0xff] %v2165_v28  ;;  %872 = vst [vmem:[#allocation2 + $0x1d8] sm:$0xff] %v2520_v29  ;;  %v974_v55 = vmul.f32 %v2165_v28, %v2165_v28 }
 0x10c   : > { %v618_v33 = vpop.f32.mrf.mxu0  ;;  %v2523_v34 = vpop.f32.mrf.mxu1 }
 0x10d   : > { %v1033_v36 = vadd.f32 %v1032_v32, %v970_v30  ;;  %838 = vst [vmem:[#allocation2 + $0x120] sm:$0xff] %v618_v33  ;;  %v901_v37 = vadd.f32 %v2162_v18, %v900_v31  ;;  %870 = vst [vmem:[#allocation2 + $0x70] sm:$0xff] %v2523_v34  ;;  %v972_v42 = vmul.f32 %v618_v33, %v618_v33 }
 0x10e   : > { %v2166_v38 = vpop.f32.mrf.mxu0  ;;  %v2526_v39 = vpop.f32.mrf.mxu1 }
 0x10f   : > { %v902_v40 = vadd.f32 %v901_v37, %v618_v33  ;;  %v1034_v43 = vadd.f32 %v1033_v36, %v971_v35  ;;  %841 = vst [vmem:[#allocation2 + $0x60] sm:$0xff] %v2166_v38  ;;  %873 = vst [vmem:[#allocation2 + $0xd0] sm:$0xff] %v2526_v39  ;;  %v975_v61 = vmul.f32 %v2166_v38, %v2166_v38 }
 0x110   : > { %v621_v45 = vpop.f32.mrf.mxu0  ;;  %v2529_v47 = vpop.f32.mrf.mxu1 }
 0x111   : > { %v1035_v49 = vadd.f32 %v1034_v43, %v972_v42  ;;  %839 = vst [vmem:[#allocation2 + $0x150] sm:$0xff] %v621_v45  ;;  %v903_v50 = vadd.f32 %v902_v40, %v621_v45  ;;  %v973_v51 = vmul.f32 %v621_v45, %v621_v45  ;;  %871 = vst [vmem:[#allocation2 + $0x90] sm:$0xff] %v2529_v47 }
 0x112   : > { %v2169_v52 = vpop.f32.mrf.mxu0  ;;  %v2532_v54 = vpop.f32.mrf.mxu1 }
 0x113   : > { %v904_v56 = vadd.f32 %v2165_v28, %v903_v50  ;;  %v1036_v57 = vadd.f32 %v1035_v49, %v973_v51  ;;  %844 = vst [vmem:[#allocation2 + $0x138] sm:$0xff] %v2169_v52  ;;  %876 = vst [vmem:[#allocation2 + $0xa8] sm:$0xff] %v2532_v54  ;;  %v978_v16 = vmul.f32 %v2169_v52, %v2169_v52 }
 0x114   : > { %v634_v59 = vpop.f32.mrf.mxu0  ;;  %v2535_v60 = vpop.f32.mrf.mxu1 }
 0x115   : > { %v1037_v62 = vadd.f32 %v1036_v57, %v974_v55  ;;  %842 = vst [vmem:[#allocation2 + $0xe0] sm:$0xff] %v634_v59  ;;  %v905_v0 = vadd.f32 %v2166_v38, %v904_v56  ;;  %874 = vst [vmem:[#allocation2 + $0xb8] sm:$0xff] %v2535_v60  ;;  %v976_v5 = vmul.f32 %v634_v59, %v634_v59 }
 0x116   : > { %v2170_v1 = vpop.f32.mrf.mxu0  ;;  %v2538_v2 = vpop.f32.mrf.mxu1 }
 0x117   : > { %v906_v3 = vadd.f32 %v905_v0, %v634_v59  ;;  %v1038_v6 = vadd.f32 %v1037_v62, %v975_v61  ;;  %845 = vst [vmem:[#allocation2 + $0x140] sm:$0xff] %v2170_v1  ;;  %877 = vst [vmem:[#allocation2 + $0x1c8] sm:$0xff] %v2538_v2  ;;  %v979_v22 = vmul.f32 %v2170_v1, %v2170_v1 }
 0x118   : > { %v637_v7 = vpop.f32.mrf.mxu0  ;;  %v2541_v8 = vpop.f32.mrf.mxu1 }
 0x119   : > { %v1039_v10 = vadd.f32 %v1038_v6, %v976_v5  ;;  %843 = vst [vmem:[#allocation2 + $0x188] sm:$0xff] %v637_v7  ;;  %v907_v11 = vadd.f32 %v906_v3, %v637_v7  ;;  %v977_v12 = vmul.f32 %v637_v7, %v637_v7  ;;  %875 = vst [vmem:[#allocation2 + $0x88] sm:$0xff] %v2541_v8 }
 0x11a   : > { %v2173_v13 = vpop.f32.mrf.mxu0  ;;  %v2544_v15 = vpop.f32.mrf.mxu1 }
 0x11b   : > { %v908_v17 = vadd.f32 %v2169_v52, %v907_v11  ;;  %v1040_v18 = vadd.f32 %v1039_v10, %v977_v12  ;;  %848 = vst [vmem:[#allocation2 + $0x1b8] sm:$0xff] %v2173_v13  ;;  %880 = vst [vmem:[#allocation2 + $0x68] sm:$0xff] %v2544_v15  ;;  %v982_v42 = vmul.f32 %v2173_v13, %v2173_v13 }
 0x11c   : > { %v650_v20 = vpop.f32.mrf.mxu0  ;;  %v2547_v21 = vpop.f32.mrf.mxu1 }
 0x11d   : > { %v1041_v23 = vadd.f32 %v1040_v18, %v978_v16  ;;  %846 = vst [vmem:[#allocation2 + $0x80] sm:$0xff] %v650_v20  ;;  %v909_v25 = vadd.f32 %v2170_v1, %v908_v17  ;;  %878 = vst [vmem:[#allocation2 + $0x170] sm:$0xff] %v2547_v21  ;;  %v980_v30 = vmul.f32 %v650_v20, %v650_v20 }
 0x11e   : > { %v2174_v26 = vpop.f32.mrf.mxu0  ;;  %v2550_v27 = vpop.f32.mrf.mxu1 }
 0x11f   : > { %v910_v28 = vadd.f32 %v909_v25, %v650_v20  ;;  %v1042_v31 = vadd.f32 %v1041_v23, %v979_v22  ;;  %849 = vst [vmem:[#allocation2 + $0x28] sm:$0xff] %v2174_v26  ;;  %881 = vst [vmem:[#allocation2 + $0x190] sm:$0xff] %v2550_v27  ;;  %v983_v51 = vmul.f32 %v2174_v26, %v2174_v26 }
 0x120   : > { %v653_v32 = vpop.f32.mrf.mxu0  ;;  %v2553_v33 = vpop.f32.mrf.mxu1 }
 0x121   : > { %v1043_v35 = vadd.f32 %v1042_v31, %v980_v30  ;;  %847 = vst [vmem:[#allocation2 + $0x1a8] sm:$0xff] %v653_v32  ;;  %v911_v36 = vadd.f32 %v910_v28, %v653_v32  ;;  %v981_v37 = vmul.f32 %v653_v32, %v653_v32  ;;  %879 = vst [vmem:[#allocation2 + $0x178] sm:$0xff] %v2553_v33 }
 0x122   : > { %v2177_v38 = vpop.f32.mrf.mxu0  ;;  %v2556_v40 = vpop.f32.mrf.mxu1 }
 0x123   : > { %v912_v43 = vadd.f32 %v2173_v13, %v911_v36  ;;  %v1044_v45 = vadd.f32 %v1043_v35, %v981_v37  ;;  %852 = vst [vmem:[#allocation2 + $0x160] sm:$0xff] %v2177_v38  ;;  %884 = vst [vmem:[#allocation2 + $0xc0] sm:$0xff] %v2556_v40  ;;  %v986_v11 = vmul.f32 %v2177_v38, %v2177_v38 }
 0x124   : > { %v666_v49 = vpop.f32.mrf.mxu0  ;;  %v2559_v50 = vpop.f32.mrf.mxu1 }
 0x125   : > { %v1045_v52 = vadd.f32 %v1044_v45, %v982_v42  ;;  %850 = vst [vmem:[#allocation2 + $0x1e8] sm:$0xff] %v666_v49  ;;  %v913_v55 = vadd.f32 %v2174_v26, %v912_v43  ;;  %882 = vst [vmem:[#allocation2 + $0x198] sm:$0xff] %v2559_v50  ;;  %v984_v61 = vmul.f32 %v666_v49, %v666_v49 }
 0x126   : > { %v2178_v56 = vpop.f32.mrf.mxu0  ;;  %v2562_v57 = vpop.f32.mrf.mxu1 }
 0x127   : > { %v914_v59 = vadd.f32 %v913_v55, %v666_v49  ;;  %v1046_v62 = vadd.f32 %v1045_v52, %v983_v51  ;;  %853 = vst [vmem:[#allocation2 + $0x30] sm:$0xff] %v2178_v56  ;;  %885 = vst [vmem:[#allocation2 + $0x1c0] sm:$0xff] %v2562_v57  ;;  %v987_v18 = vmul.f32 %v2178_v56, %v2178_v56 }
 0x128   : > { %v669_v0 = vpop.f32.mrf.mxu0  ;;  %v2565_v1 = vpop.f32.mrf.mxu1  ;;  %v992_v52 = vmul.f32 %v2487_v44, %v2487_v44 }
 0x129   : > { %v1047_v3 = vadd.f32 %v1046_v62, %v984_v61  ;;  %851 = vst [vmem:[#allocation2 + $0xf8] sm:$0xff] %v669_v0  ;;  %v915_v5 = vadd.f32 %v914_v59, %v669_v0  ;;  %v985_v6 = vmul.f32 %v669_v0, %v669_v0  ;;  %883 = vst [vmem:[#allocation2 + $0x38] sm:$0xff] %v2565_v1 }
 0x12a   : > { %v2181_v7 = vpop.f32.mrf.mxu0  ;;  %v2568_v10 = vpop.f32.mrf.mxu1  ;;  %v993_v61 = vmul.f32 %v2493_v48, %v2493_v48  ;;  %v994_v0 = vmul.f32 %v2484_v41, %v2484_v41 }
 0x12b   : > { %v916_v12 = vadd.f32 %v2177_v38, %v915_v5  ;;  %v1048_v13 = vadd.f32 %v1047_v3, %v985_v6  ;;  %856 = vst [vmem:[#allocation2 + $0xf0] sm:$0xff] %v2181_v7  ;;  %888 = vst [vmem:[#allocation2 + $0x58] sm:$0xff] %v2568_v10  ;;  %v990_v38 = vmul.f32 %v2181_v7, %v2181_v7 }
 0x12c   : > { %v682_v16 = vpop.f32.mrf.mxu0  ;;  %v2571_v17 = vpop.f32.mrf.mxu1  ;;  %v995_v6 = vmul.f32 %v2490_v46, %v2490_v46 }
 0x12d   : > { %v1049_v20 = vadd.f32 %v1048_v13, %v986_v11  ;;  %854 = vst [vmem:[#allocation2 + $0x1e0] sm:$0xff] %v682_v16  ;;  %v917_v22 = vadd.f32 %v2178_v56, %v916_v12  ;;  %886 = vst [vmem:[#allocation2 + $0x158] sm:$0xff] %v2571_v17  ;;  %v988_v28 = vmul.f32 %v682_v16, %v682_v16 }
 0x12e   : > { %v2182_v23 = vpop.f32.mrf.mxu0  ;;  %v2574_v25 = vpop.f32.mrf.mxu1  ;;  %v996_v12 = vmul.f32 %v2499_v58, %v2499_v58 }
 0x12f   : > { %v918_v26 = vadd.f32 %v917_v22, %v682_v16  ;;  %v1050_v30 = vadd.f32 %v1049_v20, %v987_v18  ;;  %857 = vst [vmem:[#allocation2 + $0x8] sm:$0xff] %v2182_v23  ;;  %889 = vst [vmem:[#allocation2 + $0xa0] sm:$0xff] %v2574_v25  ;;  %v991_v45 = vmul.f32 %v2182_v23, %v2182_v23 }
 0x130   : > { %v685_v31 = vpop.f32.mrf.mxu0  ;;  %v2577_v32 = vpop.f32.mrf.mxu1  ;;  %v997_v18 = vmul.f32 %v2505_v4, %v2505_v4 }
 0x131   : > { %v1051_v35 = vadd.f32 %v1050_v30, %v988_v28  ;;  %855 = vst [vmem:[#allocation2] sm:$0xff] %v685_v31  ;;  %v919_v36 = vadd.f32 %v918_v26, %v685_v31  ;;  %v989_v37 = vmul.f32 %v685_v31, %v685_v31  ;;  %887 = vst [vmem:[#allocation2 + $0x10] sm:$0xff] %v2577_v32 }
 0x132   : > { %v1000_v28 = vmul.f32 %v2511_v14, %v2511_v14 }
 0x133   : > { %v920_v42 = vadd.f32 %v2181_v7, %v919_v36  ;;  %v1052_v43 = vadd.f32 %v1051_v35, %v989_v37  ;;  %v1001_v35 = vmul.f32 %v2517_v24, %v2517_v24 }
 0x135   : > { %v921_v49 = vadd.f32 %v2182_v23, %v920_v42  ;;  %v1053_v51 = vadd.f32 %v1052_v43, %v990_v38  ;;  %v1004_v43 = vmul.f32 %v2523_v34, %v2523_v34 }
 0x137   : > { %v1054_v55 = vadd.f32 %v1053_v51, %v991_v45  ;;  %v922_v56 = vadd.f32 %v921_v49, %v2487_v44  ;;  %v1005_v51 = vmul.f32 %v2529_v47, %v2529_v47 }
 0x139   : > { %v923_v59 = vadd.f32 %v922_v56, %v2493_v48  ;;  %v1055_v62 = vadd.f32 %v1054_v55, %v992_v52 }
 0x13b   : > { %v924_v3 = vadd.f32 %v2484_v41, %v923_v59  ;;  %v1056_v5 = vadd.f32 %v1055_v62, %v993_v61  ;;  %v998_v41 = vmul.f32 %v2496_v53, %v2496_v53  ;;  %v1008_v61 = vmul.f32 %v2535_v60, %v2535_v60 }
 0x13d   : > { %v1057_v7 = vadd.f32 %v1056_v5, %v994_v0  ;;  %v925_v11 = vadd.f32 %v2490_v46, %v924_v3  ;;  %v999_v46 = vmul.f32 %v2502_v63, %v2502_v63  ;;  %v1009_v3 = vmul.f32 %v2541_v8, %v2541_v8 }
 0x13f   : > { %v926_v44 = vadd.f32 %v925_v11, %v2499_v58  ;;  %v1058_v13 = vadd.f32 %v1057_v7, %v995_v6 }
 0x141   : > { %v1059_v48 = vadd.f32 %v1058_v13, %v996_v12  ;;  %v927_v16 = vadd.f32 %v926_v44, %v2505_v4  ;;  %v1012_v44 = vmul.f32 %v2547_v21, %v2547_v21 }
 0x143   : > { %v928_v20 = vadd.f32 %v2496_v53, %v927_v16  ;;  %v1060_v22 = vadd.f32 %v1059_v48, %v997_v18  ;;  %v1002_v53 = vmul.f32 %v2508_v9, %v2508_v9  ;;  %v1013_v48 = vmul.f32 %v2553_v33, %v2553_v33 }
 0x145   : > { %v1061_v23 = vadd.f32 %v1060_v22, %v998_v41  ;;  %v929_v26 = vadd.f32 %v2502_v63, %v928_v20  ;;  %v1003_v63 = vmul.f32 %v2514_v19, %v2514_v19  ;;  %v1016_v22 = vmul.f32 %v2559_v50, %v2559_v50 }
 0x147   : > { %v930_v58 = vadd.f32 %v929_v26, %v2511_v14  ;;  %v1062_v30 = vadd.f32 %v1061_v23, %v999_v46  ;;  %v1017_v26 = vmul.f32 %v2565_v1, %v2565_v1 }
 0x149   : > { %v1063_v31 = vadd.f32 %v1062_v30, %v1000_v28  ;;  %v931_v4 = vadd.f32 %v930_v58, %v2517_v24 }
 0x14b   : > { %v932_v36 = vadd.f32 %v2508_v9, %v931_v4  ;;  %v1064_v37 = vadd.f32 %v1063_v31, %v1001_v35  ;;  %v1006_v9 = vmul.f32 %v2520_v29, %v2520_v29  ;;  %v1020_v4 = vmul.f32 %v2571_v17, %v2571_v17 }
 0x14d   : > { %v1065_v38 = vadd.f32 %v1064_v37, %v1002_v53  ;;  %v933_v42 = vadd.f32 %v2514_v19, %v932_v36  ;;  %v1007_v19 = vmul.f32 %v2526_v39, %v2526_v39  ;;  %v1021_v36 = vmul.f32 %v2577_v32, %v2577_v32 }
 0x14f   : > { %v934_v14 = vadd.f32 %v933_v42, %v2523_v34  ;;  %v1066_v45 = vadd.f32 %v1065_v38, %v1003_v63 }
 0x151   : > { %v1067_v49 = vadd.f32 %v1066_v45, %v1004_v43  ;;  %v935_v24 = vadd.f32 %v934_v14, %v2529_v47 }
 0x153   : > { %v936_v52 = vadd.f32 %v2520_v29, %v935_v24  ;;  %v1068_v55 = vadd.f32 %v1067_v49, %v1005_v51  ;;  %v1010_v29 = vmul.f32 %v2532_v54, %v2532_v54 }
 0x155   : > { %v1069_v56 = vadd.f32 %v1068_v55, %v1006_v9  ;;  %v937_v59 = vadd.f32 %v2526_v39, %v936_v52  ;;  %v1011_v39 = vmul.f32 %v2538_v2, %v2538_v2 }
 0x157   : > { %v938_v34 = vadd.f32 %v937_v59, %v2535_v60  ;;  %v1070_v62 = vadd.f32 %v1069_v56, %v1007_v19 }
 0x159   : > { %v1071_v0 = vadd.f32 %v1070_v62, %v1008_v61  ;;  %v939_v47 = vadd.f32 %v938_v34, %v2541_v8 }
 0x15b   : > { %v940_v5 = vadd.f32 %v2532_v54, %v939_v47  ;;  %v1072_v6 = vadd.f32 %v1071_v0, %v1009_v3  ;;  %v1014_v54 = vmul.f32 %v2544_v15, %v2544_v15 }
 0x15d   : > { %v1073_v7 = vadd.f32 %v1072_v6, %v1010_v29  ;;  %v941_v11 = vadd.f32 %v2538_v2, %v940_v5  ;;  %v1015_v2 = vmul.f32 %v2550_v27, %v2550_v27 }
 0x15f   : > { %v942_v60 = vadd.f32 %v941_v11, %v2547_v21  ;;  %v1074_v12 = vadd.f32 %v1073_v7, %v1011_v39 }
 0x161   : > { %v1075_v13 = vadd.f32 %v1074_v12, %v1012_v44  ;;  %v943_v8 = vadd.f32 %v942_v60, %v2553_v33 }
 0x163   : > { %v944_v16 = vadd.f32 %v2544_v15, %v943_v8  ;;  %v1076_v18 = vadd.f32 %v1075_v13, %v1013_v48  ;;  %v1018_v15 = vmul.f32 %v2556_v40, %v2556_v40 }
 0x165   : > { %v1077_v41 = vadd.f32 %v1076_v18, %v1014_v54  ;;  %v945_v20 = vadd.f32 %v2550_v27, %v944_v16  ;;  %v1019_v27 = vmul.f32 %v2562_v57, %v2562_v57 }
 0x167   : > { %v946_v21 = vadd.f32 %v945_v20, %v2559_v50  ;;  %v1078_v46 = vadd.f32 %v1077_v41, %v1015_v2 }
 0x169   : > { %v1079_v23 = vadd.f32 %v1078_v46, %v1016_v22  ;;  %v947_v33 = vadd.f32 %v946_v21, %v2565_v1 }
 0x16b   : > { %v948_v58 = vadd.f32 %v2556_v40, %v947_v33  ;;  %v1080_v28 = vadd.f32 %v1079_v23, %v1017_v26  ;;  %v1022_v40 = vmul.f32 %v2568_v10, %v2568_v10 }
 0x16d   : > { %v1081_v30 = vadd.f32 %v1080_v28, %v1018_v15  ;;  %v949_v31 = vadd.f32 %v2562_v57, %v948_v58  ;;  %v1023_v57 = vmul.f32 %v2574_v25, %v2574_v25 }
 0x16f   : > { %v950_v50 = vadd.f32 %v949_v31, %v2571_v17  ;;  %v1082_v35 = vadd.f32 %v1081_v30, %v1019_v27 }
 0x171   : > { %v1083_v53 = vadd.f32 %v1082_v35, %v1020_v4  ;;  %v951_v1 = vadd.f32 %v950_v50, %v2577_v32 }
 0x173   : > { %v952_v37 = vadd.f32 %v2568_v10, %v951_v1  ;;  %v1084_v63 = vadd.f32 %v1083_v53, %v1021_v36  ;;  %v890_v10 = vld [vmem:[#allocation3] sm:$0x3] }
 0x175   : > { %v953_v38 = vadd.f32 %v2574_v25, %v952_v37  ;;  %v1085_v42 = vadd.f32 %v1084_v63, %v1022_v40 }
 0x177   : > { %v954_v17 = vrot.slane %v953_v38, 4  ;;  %v1086_v14 = vadd.f32 %v1085_v42, %v1023_v57 }
 0x179   : > { %v955_v43 = vadd.f32 %v954_v17, %v953_v38  ;;  %v1087_v45 = vrot.slane %v1086_v14, 4 }
 0x17b   : > { %v956_v49 = vrot.slane %v955_v43, 2  ;;  %v1088_v24 = vadd.f32 %v1087_v45, %v1086_v14 }
 0x17d   : > { %v957_v51 = vadd.f32 %v956_v49, %v955_v43  ;;  %v1089_v32 = vrot.slane %v1088_v24, 2 }
 0x17f   : > { %v958_v9 = vrot.slane %v957_v51, 1  ;;  %v1090_v52 = vadd.f32 %v1089_v32, %v1088_v24 }
 0x181   : > { %v1091_v55 = vrot.slane %v1090_v52, 1  ;;  %v959_v19 = vadd.f32 %v958_v9, %v957_v51 }
 0x183   : > { %v1092_v56 = vadd.f32 %v1091_v55, %v1090_v52 }
 0x185   : > { %v1094_v59 = vsel %vm1093_vm0, %v959_v19, %v1092_v56 }
 0x186   : > { %v1095_v34 = vadd.f32 %v1094_v59, %v890_v10 }
 0x188   : > { %1096 = vst [vmem:[#allocation3] sm:$0x3] %v1095_v34 }
 0x189 PF: > { %p1960_p5 = scmp.ne.s32.totalorder %s2312_s12, 1 }
 0x18b   : > { %1100 = sbr.rel (%p1960_p5) target bundleno = 543 (0x21f), region = 44 }
 0x190   : > { %v1105_v25 = vld [vmem:[#allocation3] sm:$0x1]  ;;  %v1107_v61 = vld [vmem:[#allocation3 + $0x1] sm:$0x1]  ;;  %vm1122_vm1 = vcmask 1040384   ;;  %v1126_v8 = vld [vmem:[#allocation2 + $0xb0] sm:$0xff] }
 0x191   : > { %v1106_v62 = vmul.f32 0.001953125, %v1105_v25  ;;  %v1108_v0 = vmul.f32 0.001953125, %v1107_v61  ;;  %v1112_v6 = vld [vmem:[%s3083_s2] sm:$0x1]  ;;  %v1116_v11 = vld [vmem:[%s3083_s2 + $0x1] sm:$0x1] }
 0x192   : > { %v1127_v48 = vld [vmem:[#allocation2 + $0x1b0] sm:$0xff]  ;;  %v1128_v54 = vld [vmem:[#allocation2 + $0xd8] sm:$0xff]  ;;  %v1131_v2 = vld [vmem:[#allocation2 + $0x168] sm:$0xff]  ;;  %vm1776_vm2 = vcmask 125952  }
 0x193   : > { %v1109_v47 = vmul.f32 %v1106_v62, %v1106_v62  ;;  %v1129_v16 = vld [vmem:[#allocation2 + $0x18] sm:$0xff]  ;;  %v1130_v18 = vld [vmem:[#allocation2 + $0x50] sm:$0xff]  ;;  %v1133_v20 = vld [vmem:[#allocation2 + $0x48] sm:$0xff] }
 0x194   : > { %v1132_v41 = vld [vmem:[#allocation2 + $0x130] sm:$0xff]  ;;  %v1134_v24 = vld [vmem:[#allocation2 + $0x180] sm:$0xff]  ;;  %v1136_v55 = vld [vmem:[#allocation2 + $0x118] sm:$0xff] }
 0x195   : > { %v1110_v3 = vsub.f32 %v1108_v0, %v1109_v47  ;;  %v1135_v51 = vld [vmem:[#allocation2 + $0x110] sm:$0xff]  ;;  %v1137_v10 = vld [vmem:[#allocation2 + $0x98] sm:$0xff] }
 0x197   : > { %v1111_v29 = vmax.f32 %v1110_v3, 0.0 }
 0x199   : > { %v1113_v5 = vadd.f32 1e-05, %v1111_v29  ;;  %v1138_v29 = vld [vmem:[#allocation2 + $0x120] sm:$0xff] }
 0x19b   : > { %2296 = vrsqrt.f32 %v1113_v5  ;;  %v1139_v5 = vld [vmem:[#allocation2 + $0x150] sm:$0xff] }
 0x1a8   : > { %v2297_v39 = vpop.eup %2296 }
 0x1a9   : > { %v1115_v7 = vmul.f32 %v2297_v39, %v1112_v6 }
 0x1ab   : > { %v1117_v60 = vmul.f32 %v1115_v7, %v1106_v62 }
 0x1ad   : > { %v1118_v44 = vsub.f32 %v1116_v11, %v1117_v60 }
 0x1af   : > { %v1120_v12 = vrot.slane %v1118_v44, 7 }
 0x1b1   : > { %v1123_v13 = vsel %vm1122_vm1, %v1115_v7, %v1120_v12 }
 0x1b2   : > { %1124 = vst [vmem:[#allocation4] sm:$0x3] %v1123_v13 }
 0x1b9   : > { %v2683_v21 = vld [vmem:[#allocation4] ss:$0 sm:$0xff]  ;;  %v2689_v26 = vld [vmem:[#allocation4 + $0x1] ss:$0 sm:$0xff] }
 0x1ba   : > { %v1195_v22 = vmul.f32 %v2683_v21, %v1126_v8  ;;  %v1196_v46 = vmul.f32 %v2683_v21, %v1127_v48  ;;  %v1197_v23 = vmul.f32 %v2683_v21, %v1128_v54  ;;  %v1198_v33 = vmul.f32 %v2683_v21, %v1129_v16 }
 0x1bb   : > { %v1199_v15 = vmul.f32 %v2683_v21, %v1130_v18  ;;  %v1200_v58 = vmul.f32 %v2683_v21, %v1131_v2  ;;  %v1201_v28 = vmul.f32 %v2683_v21, %v1132_v41  ;;  %v1202_v27 = vmul.f32 %v2683_v21, %v1133_v20 }
 0x1bc   : > { %v1264_v30 = vadd.f32 %v2689_v26, %v1195_v22  ;;  %v1265_v31 = vadd.f32 %v2689_v26, %v1196_v46  ;;  %v1266_v50 = vadd.f32 %v2689_v26, %v1197_v23  ;;  %v1267_v4 = vadd.f32 %v2689_v26, %v1198_v33  ;;  %v1140_v22 = vld [vmem:[#allocation2 + $0x108] sm:$0xff] }
 0x1bd   : > { %v1268_v35 = vadd.f32 %v2689_v26, %v1199_v15  ;;  %v1269_v53 = vadd.f32 %v2689_v26, %v1200_v58  ;;  %v1270_v1 = vadd.f32 %v2689_v26, %v1201_v28  ;;  %v1271_v36 = vadd.f32 %v2689_v26, %v1202_v27  ;;  %v1141_v58 = vld [vmem:[#allocation2 + $0x60] sm:$0xff]  ;;  %v1143_v27 = vld [vmem:[#allocation2 + $0x188] sm:$0xff] }
 0x1be   : > { %vm1328_vm3 = vcmp.ge.f32.partialorder %v1264_v30, 0.0  ;;  %v1392_v40 = vmul.f32 0.2, %v1264_v30  ;;  %vm1329_vm4 = vcmp.ge.f32.partialorder %v1265_v31, 0.0  ;;  %v1393_v37 = vmul.f32 0.2, %v1265_v31 }
 0x1bf   : > { %vm1330_vm5 = vcmp.ge.f32.partialorder %v1266_v50, 0.0  ;;  %v1394_v63 = vmul.f32 0.2, %v1266_v50  ;;  %vm1331_vm6 = vcmp.ge.f32.partialorder %v1267_v4, 0.0  ;;  %v1395_v57 = vmul.f32 0.2, %v1267_v4 }
 0x1c0   : > { %v1456_v38 = vsel %vm1328_vm3, %v1264_v30, %v1392_v40  ;;  %v1457_v42 = vsel %vm1329_vm4, %v1265_v31, %v1393_v37  ;;  %vm1332_vm7 = vcmp.ge.f32.partialorder %v1268_v35, 0.0  ;;  %v1396_v17 = vmul.f32 0.2, %v1268_v35  ;;  %v1142_v28 = vld [vmem:[#allocation2 + $0xe0] sm:$0xff] }
 0x1c1   : > { %v2031_v14 = vpack.c.bf16 %v1456_v38, %v1456_v38  ;;  %v2032_v43 = vpack.c.bf16 %v1457_v42, %v1457_v42  ;;  %v1458_v45 = vsel %vm1330_vm5, %v1266_v50, %v1394_v63  ;;  %v1459_v49 = vsel %vm1331_vm6, %v1267_v4, %v1395_v57  ;;  %v1144_v4 = vld [vmem:[#allocation2 + $0x138] sm:$0xff] }
 0x1c2   : > { %v2033_v32 = vpack.c.bf16 %v1458_v45, %v1458_v45  ;;  %v2034_v9 = vpack.c.bf16 %v1459_v49, %v1459_v49  ;;  %v1460_v52 = vsel %vm1332_vm7, %v1268_v35, %v1396_v17  ;;  %vm1333_vm8 = vcmp.ge.f32.partialorder %v1269_v53, 0.0  ;;  %v1145_v35 = vld [vmem:[#allocation2 + $0x140] sm:$0xff] }
 0x1c3   : > { %1777 = vst.msk [vmem:[%s3084_s3] sm:$0xf] %vm1776_vm2, %v2031_v14  ;;  %1778 = vst.msk [vmem:[%s3084_s3 + $0x4] sm:$0xf] %vm1776_vm2, %v2032_v43  ;;  %v2035_v19 = vpack.c.bf16 %v1460_v52, %v1460_v52  ;;  %v1397_v56 = vmul.f32 0.2, %v1269_v53  ;;  %v1203_v25 = vmul.f32 %v2683_v21, %v1134_v24  ;;  %v1204_v61 = vmul.f32 %v2683_v21, %v1135_v51 }
 0x1c4   : > { %vm1334_vm9 = vcmp.ge.f32.partialorder %v1270_v1, 0.0  ;;  %v1398_v59 = vmul.f32 0.2, %v1270_v1  ;;  %1779 = vst.msk [vmem:[%s3084_s3 + $0x8] sm:$0xf] %vm1776_vm2, %v2033_v32  ;;  %vm1335_vm10 = vcmp.ge.f32.partialorder %v1271_v36, 0.0  ;;  %v1205_v47 = vmul.f32 %v2683_v21, %v1136_v55 }
 0x1c5   : > { %1780 = vst.msk [vmem:[%s3084_s3 + $0xc] sm:$0xf] %vm1776_vm2, %v2034_v9  ;;  %v1399_v34 = vmul.f32 0.2, %v1271_v36  ;;  %1781 = vst.msk [vmem:[%s3084_s3 + $0x10] sm:$0xf] %vm1776_vm2, %v2035_v19  ;;  %v1461_v62 = vsel %vm1333_vm8, %v1269_v53, %v1397_v56  ;;  %v1206_v3 = vmul.f32 %v2683_v21, %v1137_v10  ;;  %v1272_v11 = vadd.f32 %v2689_v26, %v1203_v25 }
 0x1c6   : > { %v1462_v0 = vsel %vm1334_vm9, %v1270_v1, %v1398_v59  ;;  %v2036_v6 = vpack.c.bf16 %v1461_v62, %v1461_v62  ;;  %v1273_v44 = vadd.f32 %v2689_v26, %v1204_v61  ;;  %v1274_v12 = vadd.f32 %v2689_v26, %v1205_v47  ;;  %v1146_v61 = vld [vmem:[#allocation2 + $0x80] sm:$0xff]  ;;  %v1147_v62 = vld [vmem:[#allocation2 + $0x1a8] sm:$0xff] }
 0x1c7   : > { %v2037_v39 = vpack.c.bf16 %v1462_v0, %v1462_v0  ;;  %v1463_v7 = vsel %vm1335_vm10, %v1271_v36, %v1399_v34  ;;  %v1275_v13 = vadd.f32 %v2689_v26, %v1206_v3  ;;  %vm1336_vm11 = vcmp.ge.f32.partialorder %v1272_v11, 0.0  ;;  %v1148_v0 = vld [vmem:[#allocation2 + $0x1b8] sm:$0xff] }
 0x1c8   : > { %v2038_v60 = vpack.c.bf16 %v1463_v7, %v1463_v7  ;;  %1782 = vst.msk [vmem:[%s3084_s3 + $0x14] sm:$0xf] %vm1776_vm2, %v2036_v6  ;;  %v1400_v8 = vmul.f32 0.2, %v1272_v11  ;;  %v1207_v48 = vmul.f32 %v2683_v21, %v1138_v29  ;;  %v1208_v54 = vmul.f32 %v2683_v21, %v1139_v5  ;;  %v1149_v6 = vld [vmem:[#allocation2 + $0x28] sm:$0xff]  ;;  %v1151_v7 = vld [vmem:[#allocation2 + $0xf8] sm:$0xff] }
 0x1c9   : > { %1783 = vst.msk [vmem:[%s3084_s3 + $0x18] sm:$0xf] %vm1776_vm2, %v2037_v39  ;;  %vm1337_vm12 = vcmp.ge.f32.partialorder %v1273_v44, 0.0  ;;  %v1401_v16 = vmul.f32 0.2, %v1273_v44  ;;  %vm1338_vm13 = vcmp.ge.f32.partialorder %v1274_v12, 0.0  ;;  %v1209_v40 = vmul.f32 %v2683_v21, %v1140_v22 }
 0x1ca   : > { %1784 = vst.msk [vmem:[%s3084_s3 + $0x1c] sm:$0xf] %vm1776_vm2, %v2038_v60  ;;  %v1402_v18 = vmul.f32 0.2, %v1274_v12  ;;  %v1464_v2 = vsel %vm1336_vm11, %v1272_v11, %v1400_v8  ;;  %vm1339_vm14 = vcmp.ge.f32.partialorder %v1275_v13, 0.0  ;;  %v1276_v20 = vadd.f32 %v2689_v26, %v1207_v48  ;;  %v1150_v39 = vld [vmem:[#allocation2 + $0x1e8] sm:$0xff] }
 0x1cb   : > { %v1403_v41 = vmul.f32 0.2, %v1275_v13  ;;  %v2039_v46 = vpack.c.bf16 %v1464_v2, %v1464_v2  ;;  %v1465_v23 = vsel %vm1337_vm12, %v1273_v44, %v1401_v16  ;;  %v1277_v15 = vadd.f32 %v2689_v26, %v1208_v54 }
 0x1cc   : > { %v1466_v33 = vsel %vm1338_vm13, %v1274_v12, %v1402_v18  ;;  %v2040_v30 = vpack.c.bf16 %v1465_v23, %v1465_v23  ;;  %vm1340_vm15 = vcmp.ge.f32.partialorder %v1276_v20, 0.0  ;;  %v1404_v1 = vmul.f32 0.2, %v1276_v20  ;;  %v1152_v12 = vld [vmem:[#allocation2 + $0x160] sm:$0xff] }
 0x1cd   : > { %v2041_v31 = vpack.c.bf16 %v1466_v33, %v1466_v33  ;;  %v1467_v50 = vsel %vm1339_vm14, %v1275_v13, %v1403_v41  ;;  %1785 = vst.msk [vmem:[%s3084_s3 + $0x20] sm:$0xf] %vm1776_vm2, %v2039_v46  ;;  %vm1341_vm0 = vcmp.ge.f32.partialorder %v1277_v15, 0.0  ;;  %v1405_v36 = vmul.f32 0.2, %v1277_v15 }
 0x1ce   : > { %v2042_v53 = vpack.c.bf16 %v1467_v50, %v1467_v50  ;;  %1786 = vst.msk [vmem:[%s3084_s3 + $0x24] sm:$0xf] %vm1776_vm2, %v2040_v30  ;;  %v1210_v37 = vmul.f32 %v2683_v21, %v1141_v58  ;;  %v1211_v63 = vmul.f32 %v2683_v21, %v1142_v28  ;;  %v1212_v57 = vmul.f32 %v2683_v21, %v1143_v27 }
 0x1cf   : > { %1787 = vst.msk [vmem:[%s3084_s3 + $0x28] sm:$0xf] %vm1776_vm2, %v2041_v31  ;;  %v1468_v38 = vsel %vm1340_vm15, %v1276_v20, %v1404_v1  ;;  %v1469_v42 = vsel %vm1341_vm0, %v1277_v15, %v1405_v36  ;;  %v1213_v17 = vmul.f32 %v2683_v21, %v1144_v4  ;;  %v1214_v14 = vmul.f32 %v2683_v21, %v1145_v35  ;;  %v1153_v1 = vld [vmem:[#allocation2 + $0x30] sm:$0xff]  ;;  %v1154_v36 = vld [vmem:[#allocation2 + $0x1e0] sm:$0xff] }
 0x1d0   : > { %1788 = vst.msk [vmem:[%s3084_s3 + $0x2c] sm:$0xf] %vm1776_vm2, %v2042_v53  ;;  %v2043_v43 = vpack.c.bf16 %v1468_v38, %v1468_v38  ;;  %v2044_v45 = vpack.c.bf16 %v1469_v42, %v1469_v42  ;;  %v1278_v49 = vadd.f32 %v2689_v26, %v1209_v40  ;;  %v1279_v24 = vadd.f32 %v2689_v26, %v1210_v37  ;;  %v1155_v38 = vld [vmem:[#allocation2] sm:$0xff]  ;;  %v1156_v42 = vld [vmem:[#allocation2 + $0xf0] sm:$0xff] }
 0x1d1   : > { %v1280_v51 = vadd.f32 %v2689_v26, %v1211_v63  ;;  %v1281_v32 = vadd.f32 %v2689_v26, %v1212_v57  ;;  %v1282_v9 = vadd.f32 %v2689_v26, %v1213_v17  ;;  %v1283_v52 = vadd.f32 %v2689_v26, %v1214_v14 }
 0x1d2   : > { %1789 = vst.msk [vmem:[%s3084_s3 + $0x30] sm:$0xf] %vm1776_vm2, %v2043_v43  ;;  %1790 = vst.msk [vmem:[%s3084_s3 + $0x34] sm:$0xf] %vm1776_vm2, %v2044_v45  ;;  %vm1342_vm1 = vcmp.ge.f32.partialorder %v1278_v49, 0.0  ;;  %vm1343_vm3 = vcmp.ge.f32.partialorder %v1279_v24, 0.0  ;;  %v1215_v48 = vmul.f32 %v2683_v21, %v1146_v61  ;;  %v1216_v54 = vmul.f32 %v2683_v21, %v1147_v62 }
 0x1d3   : > { %v1406_v55 = vmul.f32 0.2, %v1278_v49  ;;  %v1407_v10 = vmul.f32 0.2, %v1279_v24  ;;  %vm1344_vm4 = vcmp.ge.f32.partialorder %v1280_v51, 0.0  ;;  %vm1345_vm5 = vcmp.ge.f32.partialorder %v1281_v32, 0.0 }
 0x1d4   : > { %v1408_v19 = vmul.f32 0.2, %v1280_v51  ;;  %v1409_v56 = vmul.f32 0.2, %v1281_v32  ;;  %vm1346_vm6 = vcmp.ge.f32.partialorder %v1282_v9, 0.0  ;;  %vm1347_vm7 = vcmp.ge.f32.partialorder %v1283_v52, 0.0 }
 0x1d5   : > { %v1470_v59 = vsel %vm1342_vm1, %v1278_v49, %v1406_v55  ;;  %v1471_v34 = vsel %vm1343_vm3, %v1279_v24, %v1407_v10  ;;  %v1410_v25 = vmul.f32 0.2, %v1282_v9  ;;  %v1411_v8 = vmul.f32 0.2, %v1283_v52 }
 0x1d6   : > { %v2045_v47 = vpack.c.bf16 %v1470_v59, %v1470_v59  ;;  %v2046_v3 = vpack.c.bf16 %v1471_v34, %v1471_v34  ;;  %v1472_v29 = vsel %vm1344_vm4, %v1280_v51, %v1408_v19  ;;  %v1473_v5 = vsel %vm1345_vm5, %v1281_v32, %v1409_v56 }
 0x1d7   : > { %v2047_v11 = vpack.c.bf16 %v1472_v29, %v1472_v29  ;;  %v2048_v60 = vpack.c.bf16 %v1473_v5, %v1473_v5  ;;  %v1474_v44 = vsel %vm1346_vm6, %v1282_v9, %v1410_v25  ;;  %v1217_v16 = vmul.f32 %v2683_v21, %v1148_v0  ;;  %v1157_v9 = vld [vmem:[#allocation2 + $0x8] sm:$0xff] }
 0x1d8   : > { %1791 = vst.msk [vmem:[%s3084_s3 + $0x38] sm:$0xf] %vm1776_vm2, %v2045_v47  ;;  %1792 = vst.msk [vmem:[%s3084_s3 + $0x3c] sm:$0xf] %vm1776_vm2, %v2046_v3  ;;  %v2049_v13 = vpack.c.bf16 %v1474_v44, %v1474_v44  ;;  %v1218_v18 = vmul.f32 %v2683_v21, %v1149_v6  ;;  %v1219_v2 = vmul.f32 %v2683_v21, %v1150_v39  ;;  %v1158_v29 = vld [vmem:[#allocation2 + $0x148] sm:$0xff]  ;;  %v1159_v39 = vld [vmem:[#allocation2 + $0x1d0] sm:$0xff] }
 0x1d9   : > { %1793 = vst.msk [vmem:[%s3084_s3 + $0x40] sm:$0xf] %vm1776_vm2, %v2047_v11  ;;  %1794 = vst.msk [vmem:[%s3084_s3 + $0x44] sm:$0xf] %vm1776_vm2, %v2048_v60  ;;  %v1220_v41 = vmul.f32 %v2683_v21, %v1151_v7  ;;  %v1475_v20 = vsel %vm1347_vm7, %v1283_v52, %v1411_v8  ;;  %v1284_v22 = vadd.f32 %v2689_v26, %v1215_v48  ;;  %v1160_v48 = vld [vmem:[#allocation2 + $0x100] sm:$0xff] }
 0x1da   : > { %1795 = vst.msk [vmem:[%s3084_s3 + $0x48] sm:$0xf] %vm1776_vm2, %v2049_v13  ;;  %v1285_v46 = vadd.f32 %v2689_v26, %v1216_v54  ;;  %v1221_v23 = vmul.f32 %v2683_v21, %v1152_v12  ;;  %v2050_v33 = vpack.c.bf16 %v1475_v20, %v1475_v20  ;;  %v1286_v15 = vadd.f32 %v2689_v26, %v1217_v16  ;;  %v1161_v54 = vld [vmem:[#allocation2 + $0xc8] sm:$0xff]  ;;  %v1162_v20 = vld [vmem:[#allocation2 + $0x40] sm:$0xff] }
 0x1db   : > { %v1287_v58 = vadd.f32 %v2689_v26, %v1218_v18  ;;  %v1288_v28 = vadd.f32 %v2689_v26, %v1219_v2  ;;  %vm1348_vm8 = vcmp.ge.f32.partialorder %v1284_v22, 0.0  ;;  %v1412_v27 = vmul.f32 0.2, %v1284_v22 }
 0x1dc   : > { %vm1349_vm9 = vcmp.ge.f32.partialorder %v1285_v46, 0.0  ;;  %v1413_v30 = vmul.f32 0.2, %v1285_v46  ;;  %1796 = vst.msk [vmem:[%s3084_s3 + $0x4c] sm:$0xf] %vm1776_vm2, %v2050_v33  ;;  %vm1350_vm10 = vcmp.ge.f32.partialorder %v1286_v15, 0.0  ;;  %v1289_v45 = vadd.f32 %v2689_v26, %v1220_v41 }
 0x1dd   : > { %v1414_v31 = vmul.f32 0.2, %v1286_v15  ;;  %vm1351_vm11 = vcmp.ge.f32.partialorder %v1287_v58, 0.0  ;;  %v1415_v50 = vmul.f32 0.2, %v1287_v58  ;;  %v1476_v4 = vsel %vm1348_vm8, %v1284_v22, %v1412_v27  ;;  %v1163_v22 = vld [vmem:[#allocation2 + $0x1f8] sm:$0xff] }
 0x1de   : > { %v1477_v35 = vsel %vm1349_vm9, %v1285_v46, %v1413_v30  ;;  %vm1352_vm12 = vcmp.ge.f32.partialorder %v1288_v28, 0.0  ;;  %v1416_v53 = vmul.f32 0.2, %v1288_v28  ;;  %v2051_v40 = vpack.c.bf16 %v1476_v4, %v1476_v4  ;;  %v1164_v46 = vld [vmem:[#allocation2 + $0x20] sm:$0xff] }
 0x1df   : > { %v2052_v37 = vpack.c.bf16 %v1477_v35, %v1477_v35  ;;  %v1478_v63 = vsel %vm1350_vm10, %v1286_v15, %v1414_v31  ;;  %v1479_v57 = vsel %vm1351_vm11, %v1287_v58, %v1415_v50  ;;  %v1290_v24 = vadd.f32 %v2689_v26, %v1221_v23 }
 0x1e0   : > { %v2053_v17 = vpack.c.bf16 %v1478_v63, %v1478_v63  ;;  %v2054_v14 = vpack.c.bf16 %v1479_v57, %v1479_v57  ;;  %v1480_v43 = vsel %vm1352_vm12, %v1288_v28, %v1416_v53  ;;  %1797 = vst.msk [vmem:[%s3084_s3 + $0x50] sm:$0xf] %vm1776_vm2, %v2051_v40  ;;  %v1222_v51 = vmul.f32 %v2683_v21, %v1153_v1  ;;  %v1165_v53 = vld [vmem:[#allocation2 + $0x128] sm:$0xff] }
 0x1e1   : > { %1798 = vst.msk [vmem:[%s3084_s3 + $0x54] sm:$0xf] %vm1776_vm2, %v2052_v37  ;;  %v2055_v49 = vpack.c.bf16 %v1480_v43, %v1480_v43  ;;  %v1223_v32 = vmul.f32 %v2683_v21, %v1154_v36  ;;  %vm1353_vm13 = vcmp.ge.f32.partialorder %v1289_v45, 0.0  ;;  %v1417_v52 = vmul.f32 0.2, %v1289_v45 }
 0x1e2   : > { %1799 = vst.msk [vmem:[%s3084_s3 + $0x58] sm:$0xf] %vm1776_vm2, %v2053_v17  ;;  %1800 = vst.msk [vmem:[%s3084_s3 + $0x5c] sm:$0xf] %vm1776_vm2, %v2054_v14  ;;  %v1224_v55 = vmul.f32 %v2683_v21, %v1155_v38  ;;  %v1225_v10 = vmul.f32 %v2683_v21, %v1156_v42  ;;  %vm1354_vm14 = vcmp.ge.f32.partialorder %v1290_v24, 0.0  ;;  %v1291_v56 = vadd.f32 %v2689_v26, %v1222_v51 }
 0x1e3   : > { %1801 = vst.msk [vmem:[%s3084_s3 + $0x60] sm:$0xf] %vm1776_vm2, %v2055_v49  ;;  %v1418_v19 = vmul.f32 0.2, %v1290_v24  ;;  %v1292_v59 = vadd.f32 %v2689_v26, %v1223_v32  ;;  %v1481_v34 = vsel %vm1353_vm13, %v1289_v45, %v1417_v52  ;;  %v1226_v62 = vmul.f32 %v2683_v21, %v1157_v9 }
 0x1e4   : > { %v1293_v25 = vadd.f32 %v2689_v26, %v1224_v55  ;;  %v1294_v61 = vadd.f32 %v2689_v26, %v1225_v10  ;;  %v2056_v0 = vpack.c.bf16 %v1481_v34, %v1481_v34  ;;  %vm1355_vm15 = vcmp.ge.f32.partialorder %v1291_v56, 0.0  ;;  %v1166_v55 = vld [vmem:[#allocation2 + $0x1a0] sm:$0xff] }
 0x1e5   : > { %v1482_v47 = vsel %vm1354_vm14, %v1290_v24, %v1418_v19  ;;  %v1419_v3 = vmul.f32 0.2, %v1291_v56  ;;  %vm1356_vm0 = vcmp.ge.f32.partialorder %v1292_v59, 0.0  ;;  %v1420_v6 = vmul.f32 0.2, %v1292_v59 }
 0x1e6   : > { %v2057_v5 = vpack.c.bf16 %v1482_v47, %v1482_v47  ;;  %vm1357_vm1 = vcmp.ge.f32.partialorder %v1293_v25, 0.0  ;;  %1802 = vst.msk [vmem:[%s3084_s3 + $0x64] sm:$0xf] %vm1776_vm2, %v2056_v0  ;;  %v1421_v11 = vmul.f32 0.2, %v1293_v25  ;;  %vm1358_vm3 = vcmp.ge.f32.partialorder %v1294_v61, 0.0 }
 0x1e7   : > { %v1483_v7 = vsel %vm1355_vm15, %v1291_v56, %v1419_v3  ;;  %v1422_v60 = vmul.f32 0.2, %v1294_v61  ;;  %v1484_v12 = vsel %vm1356_vm0, %v1292_v59, %v1420_v6  ;;  %v1295_v13 = vadd.f32 %v2689_v26, %v1226_v62  ;;  %v1167_v59 = vld [vmem:[#allocation2 + $0x1f0] sm:$0xff]  ;;  %v1168_v0 = vld [vmem:[#allocation2 + $0xe8] sm:$0xff]  ;;  %v1169_v47 = vld [vmem:[#allocation2 + $0x78] sm:$0xff] }
 0x1e8   : > { %1803 = vst.msk [vmem:[%s3084_s3 + $0x68] sm:$0xf] %vm1776_vm2, %v2057_v5  ;;  %v2058_v44 = vpack.c.bf16 %v1483_v7, %v1483_v7  ;;  %v1227_v8 = vmul.f32 %v2683_v21, %v1158_v29  ;;  %v2059_v16 = vpack.c.bf16 %v1484_v12, %v1484_v12  ;;  %v1485_v18 = vsel %vm1357_vm1, %v1293_v25, %v1421_v11  ;;  %v1170_v3 = vld [vmem:[#allocation2 + $0x70] sm:$0xff]  ;;  %v1172_v11 = vld [vmem:[#allocation2 + $0x1d8] sm:$0xff] }
 0x1e9   : > { %v1486_v2 = vsel %vm1358_vm3, %v1294_v61, %v1422_v60  ;;  %v1228_v41 = vmul.f32 %v2683_v21, %v1159_v39  ;;  %v2060_v23 = vpack.c.bf16 %v1485_v18, %v1485_v18  ;;  %vm1359_vm4 = vcmp.ge.f32.partialorder %v1295_v13, 0.0  ;;  %v1171_v7 = vld [vmem:[#allocation2 + $0x90] sm:$0xff] }
 0x1ea   : > { %1804 = vst.msk [vmem:[%s3084_s3 + $0x6c] sm:$0xf] %vm1776_vm2, %v2058_v44  ;;  %v2061_v33 = vpack.c.bf16 %v1486_v2, %v1486_v2  ;;  %v1423_v15 = vmul.f32 0.2, %v1295_v13  ;;  %1805 = vst.msk [vmem:[%s3084_s3 + $0x70] sm:$0xf] %vm1776_vm2, %v2059_v16  ;;  %v1296_v58 = vadd.f32 %v2689_v26, %v1227_v8  ;;  %v1229_v27 = vmul.f32 %v2683_v21, %v1160_v48 }
 0x1eb   : > { %v1297_v28 = vadd.f32 %v2689_v26, %v1228_v41  ;;  %v1230_v30 = vmul.f32 %v2683_v21, %v1161_v54  ;;  %1806 = vst.msk [vmem:[%s3084_s3 + $0x74] sm:$0xf] %vm1776_vm2, %v2060_v23  ;;  %v1231_v50 = vmul.f32 %v2683_v21, %v1162_v20  ;;  %v1232_v4 = vmul.f32 %v2683_v21, %v1163_v22 }
 0x1ec   : > { %1807 = vst.msk [vmem:[%s3084_s3 + $0x78] sm:$0xf] %vm1776_vm2, %v2061_v33  ;;  %v1487_v31 = vsel %vm1359_vm4, %v1295_v13, %v1423_v15  ;;  %v1233_v35 = vmul.f32 %v2683_v21, %v1164_v46  ;;  %vm1360_vm5 = vcmp.ge.f32.partialorder %v1296_v58, 0.0  ;;  %v1424_v36 = vmul.f32 0.2, %v1296_v58 }
 0x1ed   : > { %v2062_v1 = vpack.c.bf16 %v1487_v31, %v1487_v31  ;;  %vm1361_vm6 = vcmp.ge.f32.partialorder %v1297_v28, 0.0  ;;  %v1425_v40 = vmul.f32 0.2, %v1297_v28  ;;  %v1298_v37 = vadd.f32 %v2689_v26, %v1229_v27 }
 0x1ee   : > { %v1299_v63 = vadd.f32 %v2689_v26, %v1230_v30  ;;  %v1300_v57 = vadd.f32 %v2689_v26, %v1231_v50  ;;  %v1488_v38 = vsel %vm1360_vm5, %v1296_v58, %v1424_v36  ;;  %v1301_v42 = vadd.f32 %v2689_v26, %v1232_v4  ;;  %v1173_v4 = vld [vmem:[#allocation2 + $0xd0] sm:$0xff]  ;;  %v1174_v36 = vld [vmem:[#allocation2 + $0xb8] sm:$0xff] }
 0x1ef   : > { %1808 = vst.msk [vmem:[%s3084_s3 + $0x7c] sm:$0xf] %vm1776_vm2, %v2062_v1  ;;  %v1302_v17 = vadd.f32 %v2689_v26, %v1233_v35  ;;  %v1234_v14 = vmul.f32 %v2683_v21, %v1165_v53  ;;  %v2063_v43 = vpack.c.bf16 %v1488_v38, %v1488_v38  ;;  %v1489_v45 = vsel %vm1361_vm6, %v1297_v28, %v1425_v40  ;;  %v1175_v40 = vld [vmem:[#allocation2 + $0x88] sm:$0xff] }
 0x1f0   : > { %vm1362_vm7 = vcmp.ge.f32.partialorder %v1298_v37, 0.0  ;;  %v1426_v49 = vmul.f32 0.2, %v1298_v37  ;;  %v2064_v24 = vpack.c.bf16 %v1489_v45, %v1489_v45  ;;  %vm1363_vm8 = vcmp.ge.f32.partialorder %v1299_v63, 0.0  ;;  %v1177_v45 = vld [vmem:[#allocation2 + $0x1c8] sm:$0xff] }
 0x1f1   : > { %v1427_v51 = vmul.f32 0.2, %v1299_v63  ;;  %vm1364_vm9 = vcmp.ge.f32.partialorder %v1300_v57, 0.0  ;;  %1809 = vst.msk [vmem:[%s3084_s3 + $0x80] sm:$0xf] %vm1776_vm2, %v2063_v43  ;;  %vm1365_vm10 = vcmp.ge.f32.partialorder %v1301_v42, 0.0  ;;  %v1303_v62 = vadd.f32 %v2689_v26, %v1234_v14 }
 0x1f2   : > { %v1490_v32 = vsel %vm1362_vm7, %v1298_v37, %v1426_v49  ;;  %v1428_v9 = vmul.f32 0.2, %v1300_v57  ;;  %v1429_v52 = vmul.f32 0.2, %v1301_v42  ;;  %1810 = vst.msk [vmem:[%s3084_s3 + $0x84] sm:$0xf] %vm1776_vm2, %v2064_v24  ;;  %v1235_v39 = vmul.f32 %v2683_v21, %v1166_v55 }
 0x1f3   : > { %v2065_v10 = vpack.c.bf16 %v1490_v32, %v1490_v32  ;;  %v1491_v19 = vsel %vm1363_vm8, %v1299_v63, %v1427_v51  ;;  %vm1366_vm11 = vcmp.ge.f32.partialorder %v1302_v17, 0.0  ;;  %v1430_v56 = vmul.f32 0.2, %v1302_v17  ;;  %v1176_v43 = vld [vmem:[#allocation2 + $0xa8] sm:$0xff] }
 0x1f4   : > { %v2066_v34 = vpack.c.bf16 %v1491_v19, %v1491_v19  ;;  %v1492_v25 = vsel %vm1364_vm9, %v1300_v57, %v1428_v9  ;;  %v1493_v61 = vsel %vm1365_vm10, %v1301_v42, %v1429_v52  ;;  %vm1367_vm12 = vcmp.ge.f32.partialorder %v1303_v62, 0.0  ;;  %v1178_v9 = vld [vmem:[#allocation2 + $0x170] sm:$0xff] }
 0x1f5   : > { %1811 = vst.msk [vmem:[%s3084_s3 + $0x88] sm:$0xf] %vm1776_vm2, %v2065_v10  ;;  %v2067_v29 = vpack.c.bf16 %v1492_v25, %v1492_v25  ;;  %v2068_v5 = vpack.c.bf16 %v1493_v61, %v1493_v61  ;;  %v1494_v6 = vsel %vm1366_vm11, %v1302_v17, %v1430_v56  ;;  %v1431_v44 = vmul.f32 0.2, %v1303_v62 }
 0x1f6   : > { %1812 = vst.msk [vmem:[%s3084_s3 + $0x8c] sm:$0xf] %vm1776_vm2, %v2066_v34  ;;  %v2069_v60 = vpack.c.bf16 %v1494_v6, %v1494_v6  ;;  %v1236_v12 = vmul.f32 %v2683_v21, %v1167_v59  ;;  %v1304_v13 = vadd.f32 %v2689_v26, %v1235_v39  ;;  %v1237_v8 = vmul.f32 %v2683_v21, %v1168_v0  ;;  %v1179_v0 = vld [vmem:[#allocation2 + $0x178] sm:$0xff] }
 0x1f7   : > { %1813 = vst.msk [vmem:[%s3084_s3 + $0x90] sm:$0xf] %vm1776_vm2, %v2067_v29  ;;  %1814 = vst.msk [vmem:[%s3084_s3 + $0x94] sm:$0xf] %vm1776_vm2, %v2068_v5  ;;  %v1238_v48 = vmul.f32 %v2683_v21, %v1169_v47  ;;  %v1239_v54 = vmul.f32 %v2683_v21, %v1170_v3  ;;  %v1495_v16 = vsel %vm1367_vm12, %v1303_v62, %v1431_v44 }
 0x1f8   : > { %1815 = vst.msk [vmem:[%s3084_s3 + $0x98] sm:$0xf] %vm1776_vm2, %v2069_v60  ;;  %v1305_v18 = vadd.f32 %v2689_v26, %v1236_v12  ;;  %v1240_v2 = vmul.f32 %v2683_v21, %v1171_v7  ;;  %v1241_v41 = vmul.f32 %v2683_v21, %v1172_v11  ;;  %v2070_v20 = vpack.c.bf16 %v1495_v16, %v1495_v16  ;;  %v1180_v12 = vld [vmem:[#allocation2 + $0x68] sm:$0xff]  ;;  %v1182_v16 = vld [vmem:[#allocation2 + $0x198] sm:$0xff] }
 0x1f9   : > { %vm1368_vm13 = vcmp.ge.f32.partialorder %v1304_v13, 0.0  ;;  %v1432_v22 = vmul.f32 0.2, %v1304_v13  ;;  %v1306_v46 = vadd.f32 %v2689_v26, %v1237_v8  ;;  %v1307_v33 = vadd.f32 %v2689_v26, %v1238_v48 }
 0x1fa   : > { %vm1369_vm14 = vcmp.ge.f32.partialorder %v1305_v18, 0.0  ;;  %v1433_v23 = vmul.f32 0.2, %v1305_v18  ;;  %v1308_v15 = vadd.f32 %v2689_v26, %v1239_v54  ;;  %1816 = vst.msk [vmem:[%s3084_s3 + $0x9c] sm:$0xf] %vm1776_vm2, %v2070_v20  ;;  %v1309_v27 = vadd.f32 %v2689_v26, %v1240_v2  ;;  %v1181_v54 = vld [vmem:[#allocation2 + $0x190] sm:$0xff] }
 0x1fb   : > { %v1496_v58 = vsel %vm1368_vm13, %v1304_v13, %v1432_v22  ;;  %vm1370_vm15 = vcmp.ge.f32.partialorder %v1306_v46, 0.0  ;;  %v1434_v28 = vmul.f32 0.2, %v1306_v46  ;;  %vm1371_vm0 = vcmp.ge.f32.partialorder %v1307_v33, 0.0 }
 0x1fc   : > { %v2071_v30 = vpack.c.bf16 %v1496_v58, %v1496_v58  ;;  %v1497_v31 = vsel %vm1369_vm14, %v1305_v18, %v1433_v23  ;;  %v1435_v50 = vmul.f32 0.2, %v1307_v33  ;;  %vm1372_vm1 = vcmp.ge.f32.partialorder %v1308_v15, 0.0 }
 0x1fd   : > { %v2072_v35 = vpack.c.bf16 %v1497_v31, %v1497_v31  ;;  %v1498_v53 = vsel %vm1370_vm15, %v1306_v46, %v1434_v28  ;;  %v1436_v1 = vmul.f32 0.2, %v1308_v15  ;;  %vm1373_vm3 = vcmp.ge.f32.partialorder %v1309_v27, 0.0  ;;  %v1183_v28 = vld [vmem:[#allocation2 + $0x38] sm:$0xff] }
 0x1fe   : > { %1817 = vst.msk [vmem:[%s3084_s3 + $0xa0] sm:$0xf] %vm1776_vm2, %v2071_v30  ;;  %v2073_v37 = vpack.c.bf16 %v1498_v53, %v1498_v53  ;;  %v1499_v63 = vsel %vm1371_vm0, %v1307_v33, %v1435_v50  ;;  %v1437_v57 = vmul.f32 0.2, %v1309_v27  ;;  %v1310_v17 = vadd.f32 %v2689_v26, %v1241_v41  ;;  %v1185_v30 = vld [vmem:[#allocation2 + $0x1c0] sm:$0xff] }
 0x1ff   : > { %1818 = vst.msk [vmem:[%s3084_s3 + $0xa4] sm:$0xf] %vm1776_vm2, %v2072_v35  ;;  %v2074_v38 = vpack.c.bf16 %v1499_v63, %v1499_v63  ;;  %v1500_v42 = vsel %vm1372_vm1, %v1308_v15, %v1436_v1  ;;  %v1242_v14 = vmul.f32 %v2683_v21, %v1173_v4  ;;  %v1243_v51 = vmul.f32 %v2683_v21, %v1174_v36 }
 0x200   : > { %1819 = vst.msk [vmem:[%s3084_s3 + $0xa8] sm:$0xf] %vm1776_vm2, %v2073_v37  ;;  %v2075_v49 = vpack.c.bf16 %v1500_v42, %v1500_v42  ;;  %v1501_v24 = vsel %vm1373_vm3, %v1309_v27, %v1437_v57  ;;  %v1244_v32 = vmul.f32 %v2683_v21, %v1175_v40  ;;  %vm1374_vm4 = vcmp.ge.f32.partialorder %v1310_v17, 0.0  ;;  %v1184_v27 = vld [vmem:[#allocation2 + $0xc0] sm:$0xff] }
 0x201   : > { %1820 = vst.msk [vmem:[%s3084_s3 + $0xac] sm:$0xf] %vm1776_vm2, %v2074_v38  ;;  %v2076_v52 = vpack.c.bf16 %v1501_v24, %v1501_v24  ;;  %v1438_v55 = vmul.f32 0.2, %v1310_v17  ;;  %v1311_v10 = vadd.f32 %v2689_v26, %v1242_v14  ;;  %v1312_v19 = vadd.f32 %v2689_v26, %v1243_v51  ;;  %v1186_v38 = vld [vmem:[#allocation2 + $0x158] sm:$0xff] }
 0x202   : > { %1821 = vst.msk [vmem:[%s3084_s3 + $0xb0] sm:$0xf] %vm1776_vm2, %v2075_v49  ;;  %v1313_v56 = vadd.f32 %v2689_v26, %v1244_v32  ;;  %v1245_v59 = vmul.f32 %v2683_v21, %v1176_v43  ;;  %v1246_v34 = vmul.f32 %v2683_v21, %v1177_v45  ;;  %v1247_v62 = vmul.f32 %v2683_v21, %v1178_v9 }
 0x203   : > { %1822 = vst.msk [vmem:[%s3084_s3 + $0xb4] sm:$0xf] %vm1776_vm2, %v2076_v52  ;;  %v1502_v25 = vsel %vm1374_vm4, %v1310_v17, %v1438_v55  ;;  %vm1375_vm5 = vcmp.ge.f32.partialorder %v1311_v10, 0.0  ;;  %v1439_v61 = vmul.f32 0.2, %v1311_v10  ;;  %vm1376_vm6 = vcmp.ge.f32.partialorder %v1312_v19, 0.0 }
 0x204   : > { %v2077_v47 = vpack.c.bf16 %v1502_v25, %v1502_v25  ;;  %v1440_v3 = vmul.f32 0.2, %v1312_v19  ;;  %vm1377_vm7 = vcmp.ge.f32.partialorder %v1313_v56, 0.0  ;;  %v1441_v5 = vmul.f32 0.2, %v1313_v56 }
 0x205   : > { %v1503_v29 = vsel %vm1375_vm5, %v1311_v10, %v1439_v61  ;;  %v1314_v6 = vadd.f32 %v2689_v26, %v1245_v59  ;;  %v1315_v39 = vadd.f32 %v2689_v26, %v1246_v34  ;;  %v1316_v60 = vadd.f32 %v2689_v26, %v1247_v62  ;;  %v1187_v10 = vld [vmem:[#allocation2 + $0x10] sm:$0xff] }
 0x206   : > { %1823 = vst.msk [vmem:[%s3084_s3 + $0xb8] sm:$0xf] %vm1776_vm2, %v2077_v47  ;;  %v2078_v7 = vpack.c.bf16 %v1503_v29, %v1503_v29  ;;  %v1504_v11 = vsel %vm1376_vm6, %v1312_v19, %v1440_v3  ;;  %v1248_v44 = vmul.f32 %v2683_v21, %v1179_v0  ;;  %v1505_v8 = vsel %vm1377_vm7, %v1313_v56, %v1441_v5  ;;  %v1188_v19 = vld [vmem:[#allocation2 + $0x58] sm:$0xff]  ;;  %v1189_v56 = vld [vmem:[#allocation2 + $0xa0] sm:$0xff] }
 0x207   : > { %v2079_v13 = vpack.c.bf16 %v1504_v11, %v1504_v11  ;;  %vm1378_vm8 = vcmp.ge.f32.partialorder %v1314_v6, 0.0  ;;  %v1442_v48 = vmul.f32 0.2, %v1314_v6  ;;  %v2080_v18 = vpack.c.bf16 %v1505_v8, %v1505_v8 }
 0x208   : > { %1824 = vst.msk [vmem:[%s3084_s3 + $0xbc] sm:$0xf] %vm1776_vm2, %v2078_v7  ;;  %vm1379_vm9 = vcmp.ge.f32.partialorder %v1315_v39, 0.0  ;;  %v1443_v2 = vmul.f32 0.2, %v1315_v39  ;;  %vm1380_vm10 = vcmp.ge.f32.partialorder %v1316_v60, 0.0  ;;  %v1317_v22 = vadd.f32 %v2689_v26, %v1248_v44 }
 0x209   : > { %1825 = vst.msk [vmem:[%s3084_s3 + $0xc0] sm:$0xf] %vm1776_vm2, %v2079_v13  ;;  %v1506_v41 = vsel %vm1378_vm8, %v1314_v6, %v1442_v48  ;;  %v1444_v20 = vmul.f32 0.2, %v1316_v60  ;;  %v1249_v46 = vmul.f32 %v2683_v21, %v1180_v12  ;;  %1826 = vst.msk [vmem:[%s3084_s3 + $0xc4] sm:$0xf] %vm1776_vm2, %v2080_v18  ;;  %v1250_v15 = vmul.f32 %v2683_v21, %v1181_v54 }
 0x20a   : > { %v2081_v23 = vpack.c.bf16 %v1506_v41, %v1506_v41  ;;  %v1507_v33 = vsel %vm1379_vm9, %v1315_v39, %v1443_v2  ;;  %v1251_v58 = vmul.f32 %v2683_v21, %v1182_v16  ;;  %vm1381_vm11 = vcmp.ge.f32.partialorder %v1317_v22, 0.0 }
 0x20b   : > { %v2082_v31 = vpack.c.bf16 %v1507_v33, %v1507_v33  ;;  %v1508_v50 = vsel %vm1380_vm10, %v1316_v60, %v1444_v20  ;;  %v1445_v4 = vmul.f32 0.2, %v1317_v22  ;;  %v1318_v53 = vadd.f32 %v2689_v26, %v1249_v46 }
 0x20c   : > { %1827 = vst.msk [vmem:[%s3084_s3 + $0xc8] sm:$0xf] %vm1776_vm2, %v2081_v23  ;;  %v2083_v35 = vpack.c.bf16 %v1508_v50, %v1508_v50  ;;  %v1319_v1 = vadd.f32 %v2689_v26, %v1250_v15  ;;  %v1320_v36 = vadd.f32 %v2689_v26, %v1251_v58  ;;  %v1252_v37 = vmul.f32 %v2683_v21, %v1183_v28 }
 0x20d   : > { %1828 = vst.msk [vmem:[%s3084_s3 + $0xcc] sm:$0xf] %vm1776_vm2, %v2082_v31  ;;  %v1509_v40 = vsel %vm1381_vm11, %v1317_v22, %v1445_v4  ;;  %v1253_v63 = vmul.f32 %v2683_v21, %v1184_v27  ;;  %v1254_v57 = vmul.f32 %v2683_v21, %v1185_v30  ;;  %vm1382_vm12 = vcmp.ge.f32.partialorder %v1318_v53, 0.0 }
 0x20e   : > { %1829 = vst.msk [vmem:[%s3084_s3 + $0xd0] sm:$0xf] %vm1776_vm2, %v2083_v35  ;;  %v2084_v42 = vpack.c.bf16 %v1509_v40, %v1509_v40  ;;  %v1446_v17 = vmul.f32 0.2, %v1318_v53  ;;  %vm1383_vm13 = vcmp.ge.f32.partialorder %v1319_v1, 0.0  ;;  %vm1384_vm14 = vcmp.ge.f32.partialorder %v1320_v36, 0.0 }
 0x20f   : > { %v1447_v14 = vmul.f32 0.2, %v1319_v1  ;;  %v1448_v43 = vmul.f32 0.2, %v1320_v36  ;;  %v1321_v45 = vadd.f32 %v2689_v26, %v1252_v37  ;;  %v1322_v24 = vadd.f32 %v2689_v26, %v1253_v63 }
 0x210   : > { %1830 = vst.msk [vmem:[%s3084_s3 + $0xd4] sm:$0xf] %vm1776_vm2, %v2084_v42  ;;  %v1510_v49 = vsel %vm1382_vm12, %v1318_v53, %v1446_v17  ;;  %v1323_v51 = vadd.f32 %v2689_v26, %v1254_v57  ;;  %v1255_v32 = vmul.f32 %v2683_v21, %v1186_v38  ;;  %v1256_v3 = vmul.f32 %v2683_v21, %v1187_v10 }
 0x211   : > { %v2085_v9 = vpack.c.bf16 %v1510_v49, %v1510_v49  ;;  %v1511_v52 = vsel %vm1383_vm13, %v1319_v1, %v1447_v14  ;;  %v1512_v55 = vsel %vm1384_vm14, %v1320_v36, %v1448_v43  ;;  %vm1385_vm15 = vcmp.ge.f32.partialorder %v1321_v45, 0.0 }
 0x212   : > { %v2086_v59 = vpack.c.bf16 %v1511_v52, %v1511_v52  ;;  %v2087_v34 = vpack.c.bf16 %v1512_v55, %v1512_v55  ;;  %v1449_v25 = vmul.f32 0.2, %v1321_v45  ;;  %vm1386_vm0 = vcmp.ge.f32.partialorder %v1322_v24, 0.0 }
 0x213   : > { %1831 = vst.msk [vmem:[%s3084_s3 + $0xd8] sm:$0xf] %vm1776_vm2, %v2085_v9  ;;  %v1450_v61 = vmul.f32 0.2, %v1322_v24  ;;  %vm1387_vm1 = vcmp.ge.f32.partialorder %v1323_v51, 0.0  ;;  %v1324_v0 = vadd.f32 %v2689_v26, %v1255_v32  ;;  %v1257_v29 = vmul.f32 %v2683_v21, %v1188_v19 }
 0x214   : > { %v1451_v62 = vmul.f32 0.2, %v1323_v51  ;;  %1832 = vst.msk [vmem:[%s3084_s3 + $0xdc] sm:$0xf] %vm1776_vm2, %v2086_v59  ;;  %1833 = vst.msk [vmem:[%s3084_s3 + $0xe0] sm:$0xf] %vm1776_vm2, %v2087_v34  ;;  %v1513_v47 = vsel %vm1385_vm15, %v1321_v45, %v1449_v25  ;;  %v1258_v5 = vmul.f32 %v2683_v21, %v1189_v56  ;;  %v1325_v12 = vadd.f32 %v2689_v26, %v1256_v3 }
 0x215   : > { %v2088_v6 = vpack.c.bf16 %v1513_v47, %v1513_v47  ;;  %v1514_v39 = vsel %vm1386_vm0, %v1322_v24, %v1450_v61  ;;  %vm1388_vm3 = vcmp.ge.f32.partialorder %v1324_v0, 0.0  ;;  %v1452_v44 = vmul.f32 0.2, %v1324_v0 }
 0x216   : > { %v1515_v7 = vsel %vm1387_vm1, %v1323_v51, %v1451_v62  ;;  %v2089_v11 = vpack.c.bf16 %v1514_v39, %v1514_v39  ;;  %v1326_v13 = vadd.f32 %v2689_v26, %v1257_v29  ;;  %v1327_v8 = vadd.f32 %v2689_v26, %v1258_v5 }
 0x217   : > { %v2090_v60 = vpack.c.bf16 %v1515_v7, %v1515_v7  ;;  %1834 = vst.msk [vmem:[%s3084_s3 + $0xe4] sm:$0xf] %vm1776_vm2, %v2088_v6  ;;  %v1516_v21 = vsel %vm1388_vm3, %v1324_v0, %v1452_v44  ;;  %vm1389_vm4 = vcmp.ge.f32.partialorder %v1325_v12, 0.0  ;;  %v1453_v48 = vmul.f32 0.2, %v1325_v12 }
 0x218   : > { %1835 = vst.msk [vmem:[%s3084_s3 + $0xe8] sm:$0xf] %vm1776_vm2, %v2089_v11  ;;  %v2091_v54 = vpack.c.bf16 %v1516_v21, %v1516_v21  ;;  %vm1390_vm5 = vcmp.ge.f32.partialorder %v1326_v13, 0.0  ;;  %v1454_v16 = vmul.f32 0.2, %v1326_v13  ;;  %vm1391_vm6 = vcmp.ge.f32.partialorder %v1327_v8, 0.0 }
 0x219   : > { %1836 = vst.msk [vmem:[%s3084_s3 + $0xec] sm:$0xf] %vm1776_vm2, %v2090_v60  ;;  %v1517_v18 = vsel %vm1389_vm4, %v1325_v12, %v1453_v48  ;;  %v1455_v2 = vmul.f32 0.2, %v1327_v8 }
 0x21a   : > { %1837 = vst.msk [vmem:[%s3084_s3 + $0xf0] sm:$0xf] %vm1776_vm2, %v2091_v54  ;;  %v2092_v26 = vpack.c.bf16 %v1517_v18, %v1517_v18  ;;  %v1518_v41 = vsel %vm1390_vm5, %v1326_v13, %v1454_v16 }
 0x21b   : > { %v2093_v20 = vpack.c.bf16 %v1518_v41, %v1518_v41  ;;  %v1519_v22 = vsel %vm1391_vm6, %v1327_v8, %v1455_v2 }
 0x21c   : > { %1838 = vst.msk [vmem:[%s3084_s3 + $0xf4] sm:$0xf] %vm1776_vm2, %v2092_v26  ;;  %v2094_v46 = vpack.c.bf16 %v1519_v22, %v1519_v22 }
 0x21d   : > { %1839 = vst.msk [vmem:[%s3084_s3 + $0xf8] sm:$0xf] %vm1776_vm2, %v2093_v20 }
 0x21e   : > { %1840 = vst.msk [vmem:[%s3084_s3 + $0xfc] sm:$0xf] %vm1776_vm2, %v2094_v46 }
 0x21f PF: > { %s13_s14 = sadd.s32 1, %s2320_s14   ;;  %s3085_s12 = smov %s2316_s13 }
 0x220   : > { %p10_p6 = scmp.ge.s32.totalorder %s13_s14, 4   ;;  %s3086_s13 = smov %s3088_s15 }
 0x222   :  { %12 = sbr.rel (!%p10_p6) target bundleno = 2 (0x2), region = 80 }

// kernel: discriminator_forward.5
= control target key start
LH: loop header
LB: loop body
LE: loop exit
PB: predicated region body
PF: predicated region fallthrough
CT: control target
= control target key end

     0   :  { %s1178_s12 = smov 0   ;;  %s1180_s13 = smov 0   ;;  %s1436_s0 = inlined_call_operand.vmem [shape: bf16[128,256], index: 0, kind: input, shape index: {}]   ;;  %s1437_s1 = inlined_call_operand.vmem [shape: bf16[256,128], index: 1, kind: input, shape index: {}]   ;;  %s1438_s2 = inlined_call_operand.vmem [shape: f32[2,128], index: 2, kind: input, shape index: {}]   ;;  %s1439_s3 = inlined_call_operand.vmem [shape: bf16[128,32], index: 3, kind: output, shape index: {}]  }
   0x1   :  { %s1182_s14 = smov 0  }
   0x2 LB: > { %s25_s15 = sadd.s32 1, %s1151_s13  ;;  %p913_p0 = scmp.ge.s32.totalorder %s1155_s14, 1  ;;  %s1155_s14 = sphi %s1182_s14, %s13_s14   ;;  %s1151_s13 = sphi %s1180_s13, %s1441_s13   ;;  %s1147_s12 = sphi %s1178_s12, %s1440_s12  }
   0x3   : > { %p27_p1 = scmp.ge.s32.totalorder %s25_s15, 2  ;;  %p161_p2 = scmp.lt.s32.totalorder %s1155_s14, 3 }
   0x5   : > { %s1443_s15 = smov (%p27_p1, %s25_s15), 0  ;;  %p162_p3 = pnand %p913_p0, %p161_p2 }
   0x6   : > { %p914_p4 = scmp.ne.s32.totalorder (!%p162_p3), %s1147_s12, 0 }
   0x7   : > { %165 = sbr.rel (%p162_p3) target bundleno = 390 (0x186), region = 32 }
   0xc   : > { %213 = sbr.rel (%p914_p4) target bundleno = 311 (0x137), region = 36 }
  0x11   : > { %v1091_v0 = vld [vmem:[%s1437_s1 + $0x78] sm:$0xff]   ;;  %v1093_v2 = vld [vmem:[%s1437_s1 + $0x70] sm:$0xff]   ;;  %v1095_v4 = vld [vmem:[%s1437_s1 + $0x68] sm:$0xff]   ;;  %v1157_v32 = vmov 0.0   ;;  %vm616_vm0 = vcmask 1040384  }
  0x12   : > { %v1092_v1 = vld [vmem:[%s1437_s1 + $0x38] sm:$0xff]   ;;  %986 = vmatprep.subr.bf16.mxu0 %v1091_v0  ;;  %1050 = vmatprep.subr.bf16.mxu1 %v1091_v0  ;;  %v1094_v3 = vld [vmem:[%s1437_s1 + $0x30] sm:$0xff]   ;;  %v1096_v5 = vld [vmem:[%s1437_s1 + $0x28] sm:$0xff]   ;;  %218 = vst [vmem:[#allocation3] sm:$0x3] %v1157_v32 }
  0x13   : > { %987 = vmatpush3.bf16.msra.mxu0 %v1092_v1  ;;  %1058 = vmatpush3.bf16.msra.mxu1 %v1092_v1  ;;  %v1097_v6 = vld [vmem:[%s1437_s1 + $0x60] sm:$0xff]   ;;  %v1099_v8 = vld [vmem:[%s1437_s1 + $0x58] sm:$0xff]   ;;  %v1101_v10 = vld [vmem:[%s1437_s1 + $0x50] sm:$0xff]  }
  0x14   : > { %988 = vmatprep.subr.bf16.mxu0 %v1093_v2  ;;  %1051 = vmatprep.subr.bf16.mxu1 %v1093_v2  ;;  %v1098_v7 = vld [vmem:[%s1437_s1 + $0x20] sm:$0xff]   ;;  %v1100_v9 = vld [vmem:[%s1437_s1 + $0x18] sm:$0xff]   ;;  %v1102_v12 = vld [vmem:[%s1437_s1 + $0x10] sm:$0xff]  }
  0x15   : > { %v1109_v11 = vld [vmem:[%s1436_s0 + $0x4] ss:$8 sps:$4 sm:$0xff]   ;;  %v1107_v18 = vld [vmem:[%s1436_s0] ss:$8 sps:$4 sm:$0xff]   ;;  %v1110_v20 = vld [vmem:[%s1436_s0 + $0x14] ss:$8 sps:$4 sm:$0xff]  }
  0x16   : > { %v1115_v13 = vld [vmem:[%s1436_s0 + $0x44] ss:$8 sps:$4 sm:$0xff]   ;;  %475 = vmatprep.mubr.bf16.mxu0 %v1109_v11  ;;  %v1113_v19 = vld [vmem:[%s1436_s0 + $0x40] ss:$8 sps:$4 sm:$0xff]   ;;  %v1119_v21 = vld [vmem:[%s1436_s0 + $0x54] ss:$8 sps:$4 sm:$0xff]  }
  0x17   : > { %989 = vmatpush3.bf16.msra.mxu0 %v1094_v3  ;;  %1059 = vmatpush3.bf16.msra.mxu1 %v1094_v3  ;;  %v1103_v14 = vld [vmem:[%s1437_s1 + $0x48] sm:$0xff]   ;;  %v1105_v16 = vld [vmem:[%s1437_s1 + $0x40] sm:$0xff]   ;;  %v1112_v22 = vld [vmem:[%s1436_s0 + $0x10] ss:$8 sps:$4 sm:$0xff]  }
  0x18   : > { %990 = vmatprep.subr.bf16.mxu0 %v1095_v4  ;;  %1052 = vmatprep.subr.bf16.mxu1 %v1095_v4  ;;  %v1104_v15 = vld [vmem:[%s1437_s1 + $0x8] sm:$0xff]   ;;  %v1106_v17 = vld [vmem:[%s1437_s1] sm:$0xff]   ;;  %v1121_v23 = vld [vmem:[%s1436_s0 + $0x50] ss:$8 sps:$4 sm:$0xff]  }
  0x19   : > { %507 = vmatprep.mubr.bf16.mxu1 %v1115_v13  ;;  %v1116_v24 = vld [vmem:[%s1436_s0 + $0x24] ss:$8 sps:$4 sm:$0xff]   ;;  %v1118_v26 = vld [vmem:[%s1436_s0 + $0x20] ss:$8 sps:$4 sm:$0xff]   ;;  %v1122_v28 = vld [vmem:[%s1436_s0 + $0x34] ss:$8 sps:$4 sm:$0xff]  }
  0x1a   : > { %v1125_v25 = vld [vmem:[%s1436_s0 + $0x64] ss:$8 sps:$4 sm:$0xff]   ;;  %v1127_v27 = vld [vmem:[%s1436_s0 + $0x60] ss:$8 sps:$4 sm:$0xff]   ;;  %v1128_v29 = vld [vmem:[%s1436_s0 + $0x74] ss:$8 sps:$4 sm:$0xff]  }
  0x1b   : > { %991 = vmatpush3.bf16.msra.mxu0 %v1096_v5  ;;  %1060 = vmatpush3.bf16.msra.mxu1 %v1096_v5  ;;  %v1124_v30 = vld [vmem:[%s1436_s0 + $0x30] ss:$8 sps:$4 sm:$0xff]  }
  0x1c   : > { %992 = vmatprep.subr.bf16.mxu0 %v1097_v6  ;;  %1053 = vmatprep.subr.bf16.mxu1 %v1097_v6  ;;  %v1130_v31 = vld [vmem:[%s1436_s0 + $0x70] ss:$8 sps:$4 sm:$0xff]  }
  0x1f   : > { %993 = vmatpush3.bf16.msra.mxu0 %v1098_v7  ;;  %1061 = vmatpush3.bf16.msra.mxu1 %v1098_v7 }
  0x20   : > { %994 = vmatprep.subr.bf16.mxu0 %v1099_v8  ;;  %1054 = vmatprep.subr.bf16.mxu1 %v1099_v8 }
  0x23   : > { %995 = vmatpush3.bf16.msra.mxu0 %v1100_v9  ;;  %1062 = vmatpush3.bf16.msra.mxu1 %v1100_v9 }
  0x24   : > { %996 = vmatprep.subr.bf16.mxu0 %v1101_v10  ;;  %1055 = vmatprep.subr.bf16.mxu1 %v1101_v10 }
  0x27   : > { %997 = vmatpush3.bf16.msra.mxu0 %v1102_v12  ;;  %1063 = vmatpush3.bf16.msra.mxu1 %v1102_v12 }
  0x28   : > { %998 = vmatprep.subr.bf16.mxu0 %v1103_v14  ;;  %1056 = vmatprep.subr.bf16.mxu1 %v1103_v14 }
  0x2b   : > { %999 = vmatpush3.bf16.msra.mxu0 %v1104_v15  ;;  %1064 = vmatpush3.bf16.msra.mxu1 %v1104_v15 }
  0x2c   : > { %1000 = vmatprep.subr.bf16.mxu0 %v1105_v16  ;;  %1057 = vmatprep.subr.bf16.mxu1 %v1105_v16 }
  0x2f   : > { %1001 = vmatpush3.bf16.msra.mxu0 %v1106_v17  ;;  %1065 = vmatpush3.bf16.msra.mxu1 %v1106_v17 }
  0x32   : > { %476 = vmatmul.mubr.bf16.vlgmr.msra.gmra.mxu0 %v1107_v18  ;;  %508 = vmatmul.mubr.bf16.vlgmr.msra.gmra.mxu1 %v1113_v19 }
  0x33   : > { %483 = vmatprep.mubr.bf16.mxu0 %v1110_v20  ;;  %515 = vmatprep.mubr.bf16.mxu1 %v1119_v21 }
  0x3a   : > { %484 = vmatmul.mubr.bf16.gmra.mxu0 %v1112_v22  ;;  %516 = vmatmul.mubr.bf16.gmra.mxu1 %v1121_v23 }
  0x3b   : > { %491 = vmatprep.mubr.bf16.mxu0 %v1116_v24  ;;  %523 = vmatprep.mubr.bf16.mxu1 %v1125_v25 }
  0x42   : > { %492 = vmatmul.mubr.bf16.gmra.mxu0 %v1118_v26  ;;  %524 = vmatmul.mubr.bf16.gmra.mxu1 %v1127_v27 }
  0x43   : > { %499 = vmatprep.mubr.bf16.mxu0 %v1122_v28  ;;  %531 = vmatprep.mubr.bf16.mxu1 %v1128_v29 }
  0x4a   : > { %500 = vmatmul.mubr.bf16.gmra.mxu0 %v1124_v30  ;;  %532 = vmatmul.mubr.bf16.gmra.mxu1 %v1130_v31 }
  0xf2   : > { %v1002_v33 = vpop.f32.mrf.mxu0  ;;  %v1026_v34 = vpop.f32.mrf.mxu1 }
  0xf4   : > { %v1003_v35 = vpop.f32.mrf.mxu0  ;;  %v1027_v36 = vpop.f32.mrf.mxu1 }
  0xf5   : > { %v1004_v37 = vadd.f32 %v1003_v35, %v1002_v33  ;;  %v1295_v38 = vadd.f32 %v1027_v36, %v1026_v34 }
  0xf6   : > { %v1005_v39 = vpop.f32.mrf.mxu0  ;;  %v1029_v40 = vpop.f32.mrf.mxu1 }
  0xf7   : > { %541 = vst [vmem:[#allocation2 + $0x30] sm:$0xff] %v1004_v37  ;;  %549 = vst [vmem:[#allocation2 + $0x40] sm:$0xff] %v1295_v38  ;;  %v579_v0 = vmul.f32 %v1004_v37, %v1004_v37 }
  0xf8   : > { %v1006_v41 = vpop.f32.mrf.mxu0  ;;  %v1030_v42 = vpop.f32.mrf.mxu1 }
  0xf9   : > { %v1007_v43 = vadd.f32 %v1006_v41, %v1005_v39  ;;  %v1298_v44 = vadd.f32 %v1030_v42, %v1029_v40  ;;  %v587_v39 = vmul.f32 %v1295_v38, %v1295_v38 }
  0xfa   : > { %v1008_v45 = vpop.f32.mrf.mxu0  ;;  %v1032_v46 = vpop.f32.mrf.mxu1 }
  0xfb   : > { %542 = vst [vmem:[#allocation2] sm:$0xff] %v1007_v43  ;;  %550 = vst [vmem:[#allocation2 + $0x20] sm:$0xff] %v1298_v44  ;;  %v580_v59 = vmul.f32 %v1007_v43, %v1007_v43  ;;  %v558_v4 = vadd.f32 %v1007_v43, %v1004_v37  ;;  %v588_v42 = vmul.f32 %v1298_v44, %v1298_v44 }
  0xfc   : > { %v1009_v47 = vpop.f32.mrf.mxu0  ;;  %v1033_v48 = vpop.f32.mrf.mxu1 }
  0xfd   : > { %v1010_v49 = vadd.f32 %v1009_v47, %v1008_v45  ;;  %v1301_v50 = vadd.f32 %v1033_v48, %v1032_v46  ;;  %v595_v5 = vadd.f32 %v580_v59, %v579_v0 }
  0xfe   : > { %v1011_v51 = vpop.f32.mrf.mxu0  ;;  %v1035_v52 = vpop.f32.mrf.mxu1 }
  0xff   : > { %543 = vst [vmem:[#allocation2 + $0x58] sm:$0xff] %v1010_v49  ;;  %551 = vst [vmem:[#allocation2 + $0x10] sm:$0xff] %v1301_v50  ;;  %v581_v1 = vmul.f32 %v1010_v49, %v1010_v49  ;;  %v559_v9 = vadd.f32 %v1010_v49, %v558_v4  ;;  %v589_v46 = vmul.f32 %v1301_v50, %v1301_v50 }
 0x100   : > { %v1012_v53 = vpop.f32.mrf.mxu0  ;;  %v1036_v54 = vpop.f32.mrf.mxu1 }
 0x101   : > { %v1013_v55 = vadd.f32 %v1012_v53, %v1011_v51  ;;  %v1304_v56 = vadd.f32 %v1036_v54, %v1035_v52  ;;  %v596_v12 = vadd.f32 %v595_v5, %v581_v1 }
 0x102   : > { %v1014_v57 = vpop.f32.mrf.mxu0  ;;  %v1038_v58 = vpop.f32.mrf.mxu1 }
 0x103   : > { %544 = vst [vmem:[#allocation2 + $0x18] sm:$0xff] %v1013_v55  ;;  %552 = vst [vmem:[#allocation2 + $0x38] sm:$0xff] %v1304_v56  ;;  %v582_v6 = vmul.f32 %v1013_v55, %v1013_v55  ;;  %v560_v15 = vadd.f32 %v1013_v55, %v559_v9  ;;  %v590_v49 = vmul.f32 %v1304_v56, %v1304_v56  ;;  %v557_v9 = vld [vmem:[#allocation3] sm:$0x3] }
 0x104   : > { %v1015_v60 = vpop.f32.mrf.mxu0  ;;  %v1039_v61 = vpop.f32.mrf.mxu1 }
 0x105   : > { %v1016_v62 = vadd.f32 %v1015_v60, %v1014_v57  ;;  %v1040_v63 = vadd.f32 %v1039_v61, %v1038_v58  ;;  %v597_v17 = vadd.f32 %v596_v12, %v582_v6 }
 0x106   : > { %v1017_v2 = vpop.f32.mrf.mxu0  ;;  %v1041_v3 = vpop.f32.mrf.mxu1 }
 0x107   : > { %545 = vst [vmem:[#allocation2 + $0x50] sm:$0xff] %v1016_v62  ;;  %553 = vst [vmem:[#allocation2 + $0x60] sm:$0xff] %v1040_v63  ;;  %v583_v16 = vmul.f32 %v1016_v62, %v1016_v62  ;;  %v561_v20 = vadd.f32 %v1016_v62, %v560_v15 }
 0x108   : > { %v1018_v7 = vpop.f32.mrf.mxu0  ;;  %v1042_v8 = vpop.f32.mrf.mxu1 }
 0x109   : > { %v1019_v10 = vadd.f32 %v1018_v7, %v1017_v2  ;;  %v1043_v11 = vadd.f32 %v1042_v8, %v1041_v3  ;;  %v598_v26 = vadd.f32 %v597_v17, %v583_v16 }
 0x10a   : > { %v1020_v13 = vpop.f32.mrf.mxu0  ;;  %v1044_v14 = vpop.f32.mrf.mxu1 }
 0x10b   : > { %546 = vst [vmem:[#allocation2 + $0x68] sm:$0xff] %v1019_v10  ;;  %554 = vst [vmem:[#allocation2 + $0x70] sm:$0xff] %v1043_v11  ;;  %v584_v21 = vmul.f32 %v1019_v10, %v1019_v10  ;;  %v562_v27 = vadd.f32 %v1019_v10, %v561_v20  ;;  %v592_v57 = vmul.f32 %v1043_v11, %v1043_v11 }
 0x10c   : > { %v1021_v18 = vpop.f32.mrf.mxu0  ;;  %v1045_v19 = vpop.f32.mrf.mxu1 }
 0x10d   : > { %v1022_v22 = vadd.f32 %v1021_v18, %v1020_v13  ;;  %v1046_v23 = vadd.f32 %v1045_v19, %v1044_v14  ;;  %v599_v31 = vadd.f32 %v598_v26, %v584_v21 }
 0x10e   : > { %v1023_v24 = vpop.f32.mrf.mxu0  ;;  %v1047_v25 = vpop.f32.mrf.mxu1 }
 0x10f   : > { %547 = vst [vmem:[#allocation2 + $0x8] sm:$0xff] %v1022_v22  ;;  %v585_v28 = vmul.f32 %v1022_v22, %v1022_v22  ;;  %555 = vst [vmem:[#allocation2 + $0x78] sm:$0xff] %v1046_v23  ;;  %v563_v32 = vadd.f32 %v1022_v22, %v562_v27  ;;  %v593_v60 = vmul.f32 %v1046_v23, %v1046_v23 }
 0x110   : > { %v1024_v29 = vpop.f32.mrf.mxu0  ;;  %v1048_v30 = vpop.f32.mrf.mxu1 }
 0x111   : > { %v1025_v33 = vadd.f32 %v1024_v29, %v1023_v24  ;;  %v1049_v34 = vadd.f32 %v1048_v30, %v1047_v25  ;;  %v600_v35 = vadd.f32 %v599_v31, %v585_v28 }
 0x113   : > { %548 = vst [vmem:[#allocation2 + $0x48] sm:$0xff] %v1025_v33  ;;  %v564_v36 = vadd.f32 %v1025_v33, %v563_v32  ;;  %v586_v37 = vmul.f32 %v1025_v33, %v1025_v33  ;;  %556 = vst [vmem:[#allocation2 + $0x28] sm:$0xff] %v1049_v34  ;;  %v594_v0 = vmul.f32 %v1049_v34, %v1049_v34 }
 0x115   : > { %v565_v40 = vadd.f32 %v1295_v38, %v564_v36  ;;  %v601_v41 = vadd.f32 %v600_v35, %v586_v37  ;;  %v591_v38 = vmul.f32 %v1040_v63, %v1040_v63 }
 0x117   : > { %v566_v43 = vadd.f32 %v1298_v44, %v565_v40  ;;  %v602_v45 = vadd.f32 %v601_v41, %v587_v39 }
 0x119   : > { %v603_v47 = vadd.f32 %v602_v45, %v588_v42  ;;  %v567_v48 = vadd.f32 %v1301_v50, %v566_v43 }
 0x11b   : > { %v568_v51 = vadd.f32 %v1304_v56, %v567_v48  ;;  %v604_v52 = vadd.f32 %v603_v47, %v589_v46 }
 0x11d   : > { %v569_v53 = vadd.f32 %v1040_v63, %v568_v51  ;;  %v605_v54 = vadd.f32 %v604_v52, %v590_v49 }
 0x11f   : > { %v570_v55 = vadd.f32 %v1043_v11, %v569_v53  ;;  %v606_v58 = vadd.f32 %v605_v54, %v591_v38 }
 0x121   : > { %v607_v44 = vadd.f32 %v606_v58, %v592_v57  ;;  %v571_v59 = vadd.f32 %v1046_v23, %v570_v55 }
 0x123   : > { %v608_v61 = vadd.f32 %v607_v44, %v593_v60  ;;  %v572_v62 = vadd.f32 %v1049_v34, %v571_v59 }
 0x125   : > { %v573_v1 = vrot.slane %v572_v62, 4  ;;  %v609_v50 = vadd.f32 %v608_v61, %v594_v0 }
 0x127   : > { %v574_v2 = vadd.f32 %v573_v1, %v572_v62  ;;  %v610_v3 = vrot.slane %v609_v50, 4 }
 0x129   : > { %v575_v4 = vrot.slane %v574_v2, 2  ;;  %v611_v5 = vadd.f32 %v610_v3, %v609_v50 }
 0x12b   : > { %v576_v56 = vadd.f32 %v575_v4, %v574_v2  ;;  %v612_v6 = vrot.slane %v611_v5, 2 }
 0x12d   : > { %v577_v7 = vrot.slane %v576_v56, 1  ;;  %v613_v63 = vadd.f32 %v612_v6, %v611_v5 }
 0x12f   : > { %v614_v8 = vrot.slane %v613_v63, 1  ;;  %v578_v10 = vadd.f32 %v577_v7, %v576_v56 }
 0x131   : > { %v615_v11 = vadd.f32 %v614_v8, %v613_v63 }
 0x133   : > { %v617_v12 = vsel %vm616_vm0, %v578_v10, %v615_v11 }
 0x134   : > { %v618_v13 = vadd.f32 %v617_v12, %v557_v9 }
 0x136   : > { %619 = vst [vmem:[#allocation3] sm:$0x3] %v618_v13 }
 0x137 PF: > { %p947_p5 = scmp.ne.s32.totalorder %s1147_s12, 1 }
 0x139   : > { %623 = sbr.rel (%p947_p5) target bundleno = 390 (0x186), region = 44 }
 0x13e   : > { %v628_v14 = vld [vmem:[#allocation3] sm:$0x1]  ;;  %v630_v15 = vld [vmem:[#allocation3 + $0x1] sm:$0x1]  ;;  %vm645_vm1 = vcmask 1040384   ;;  %v649_v30 = vld [vmem:[#allocation2 + $0x30] sm:$0xff] }
 0x13f   : > { %v629_v16 = vmul.f32 0.0078125, %v628_v14  ;;  %v631_v17 = vmul.f32 0.0078125, %v630_v15  ;;  %v635_v22 = vld [vmem:[%s1438_s2] sm:$0x1]  ;;  %v639_v25 = vld [vmem:[%s1438_s2 + $0x1] sm:$0x1] }
 0x140   : > { %v650_v31 = vld [vmem:[#allocation2] sm:$0xff]  ;;  %v651_v32 = vld [vmem:[#allocation2 + $0x58] sm:$0xff]  ;;  %v653_v34 = vld [vmem:[#allocation2 + $0x50] sm:$0xff]  ;;  %vm819_vm2 = vcmask 257024  }
 0x141   : > { %v632_v18 = vmul.f32 %v629_v16, %v629_v16  ;;  %v652_v33 = vld [vmem:[#allocation2 + $0x18] sm:$0xff]  ;;  %v654_v35 = vld [vmem:[#allocation2 + $0x68] sm:$0xff]  ;;  %v657_v5 = vld [vmem:[#allocation2 + $0x40] sm:$0xff] }
 0x142   : > { %v655_v36 = vld [vmem:[#allocation2 + $0x8] sm:$0xff]  ;;  %v658_v56 = vld [vmem:[#allocation2 + $0x20] sm:$0xff]  ;;  %v659_v8 = vld [vmem:[#allocation2 + $0x10] sm:$0xff] }
 0x143   : > { %v633_v19 = vsub.f32 %v631_v17, %v632_v18  ;;  %v656_v37 = vld [vmem:[#allocation2 + $0x48] sm:$0xff]  ;;  %v660_v9 = vld [vmem:[#allocation2 + $0x38] sm:$0xff] }
 0x145   : > { %v634_v20 = vmax.f32 %v633_v19, 0.0 }
 0x147   : > { %v636_v21 = vadd.f32 1e-05, %v634_v20  ;;  %v661_v20 = vld [vmem:[#allocation2 + $0x60] sm:$0xff] }
 0x149   : > { %1131 = vrsqrt.f32 %v636_v21  ;;  %v662_v21 = vld [vmem:[#allocation2 + $0x70] sm:$0xff] }
 0x156   : > { %v1132_v23 = vpop.eup %1131 }
 0x157   : > { %v638_v24 = vmul.f32 %v1132_v23, %v635_v22 }
 0x159   : > { %v640_v26 = vmul.f32 %v638_v24, %v629_v16 }
 0x15b   : > { %v641_v27 = vsub.f32 %v639_v25, %v640_v26 }
 0x15d   : > { %v643_v28 = vrot.slane %v641_v27, 7 }
 0x15f   : > { %v646_v29 = vsel %vm645_vm1, %v638_v24, %v643_v28 }
 0x160   : > { %647 = vst [vmem:[#allocation4] sm:$0x3] %v646_v29 }
 0x167   : > { %v1326_v39 = vld [vmem:[#allocation4] ss:$0 sm:$0xff]  ;;  %v1332_v45 = vld [vmem:[#allocation4 + $0x1] ss:$0 sm:$0xff] }
 0x168   : > { %v670_v40 = vmul.f32 %v1326_v39, %v649_v30  ;;  %v671_v41 = vmul.f32 %v1326_v39, %v650_v31  ;;  %v672_v42 = vmul.f32 %v1326_v39, %v651_v32  ;;  %v673_v43 = vmul.f32 %v1326_v39, %v652_v33 }
 0x169   : > { %v674_v46 = vmul.f32 %v1326_v39, %v653_v34  ;;  %v675_v47 = vmul.f32 %v1326_v39, %v654_v35  ;;  %v676_v48 = vmul.f32 %v1326_v39, %v655_v36  ;;  %v677_v49 = vmul.f32 %v1326_v39, %v656_v37 }
 0x16a   : > { %v691_v51 = vadd.f32 %v1332_v45, %v670_v40  ;;  %v692_v52 = vadd.f32 %v1332_v45, %v671_v41  ;;  %v693_v38 = vadd.f32 %v1332_v45, %v672_v42  ;;  %v694_v53 = vadd.f32 %v1332_v45, %v673_v43 }
 0x16b   : > { %v695_v54 = vadd.f32 %v1332_v45, %v674_v46  ;;  %v696_v55 = vadd.f32 %v1332_v45, %v675_v47  ;;  %v697_v57 = vadd.f32 %v1332_v45, %v676_v48  ;;  %v698_v58 = vadd.f32 %v1332_v45, %v677_v49  ;;  %v663_v46 = vld [vmem:[#allocation2 + $0x78] sm:$0xff]  ;;  %v664_v47 = vld [vmem:[#allocation2 + $0x28] sm:$0xff] }
 0x16c   : > { %vm707_vm3 = vcmp.ge.f32.partialorder %v691_v51, 0.0  ;;  %v723_v44 = vmul.f32 0.2, %v691_v51  ;;  %vm708_vm4 = vcmp.ge.f32.partialorder %v692_v52, 0.0  ;;  %v724_v59 = vmul.f32 0.2, %v692_v52 }
 0x16d   : > { %vm709_vm5 = vcmp.ge.f32.partialorder %v693_v38, 0.0  ;;  %v725_v60 = vmul.f32 0.2, %v693_v38  ;;  %vm710_vm6 = vcmp.ge.f32.partialorder %v694_v53, 0.0  ;;  %v726_v61 = vmul.f32 0.2, %v694_v53 }
 0x16e   : > { %v739_v62 = vsel %vm707_vm3, %v691_v51, %v723_v44  ;;  %v740_v0 = vsel %vm708_vm4, %v692_v52, %v724_v59  ;;  %vm711_vm7 = vcmp.ge.f32.partialorder %v695_v54, 0.0  ;;  %v727_v1 = vmul.f32 0.2, %v695_v54 }
 0x16f   : > { %v970_v50 = vpack.c.bf16 %v739_v62, %v739_v62  ;;  %v971_v2 = vpack.c.bf16 %v740_v0, %v740_v0  ;;  %v741_v3 = vsel %vm709_vm5, %v693_v38, %v725_v60  ;;  %v742_v4 = vsel %vm710_vm6, %v694_v53, %v726_v61 }
 0x170   : > { %v972_v6 = vpack.c.bf16 %v741_v3, %v741_v3  ;;  %v973_v7 = vpack.c.bf16 %v742_v4, %v742_v4  ;;  %v743_v63 = vsel %vm711_vm7, %v695_v54, %v727_v1  ;;  %vm712_vm8 = vcmp.ge.f32.partialorder %v696_v55, 0.0 }
 0x171   : > { %820 = vst.msk [vmem:[%s1439_s3] sm:$0xf] %vm819_vm2, %v970_v50  ;;  %821 = vst.msk [vmem:[%s1439_s3 + $0x4] sm:$0xf] %vm819_vm2, %v971_v2  ;;  %v974_v10 = vpack.c.bf16 %v743_v63, %v743_v63  ;;  %v728_v11 = vmul.f32 0.2, %v696_v55  ;;  %v678_v14 = vmul.f32 %v1326_v39, %v657_v5  ;;  %v679_v15 = vmul.f32 %v1326_v39, %v658_v56 }
 0x172   : > { %vm713_vm9 = vcmp.ge.f32.partialorder %v697_v57, 0.0  ;;  %v729_v12 = vmul.f32 0.2, %v697_v57  ;;  %822 = vst.msk [vmem:[%s1439_s3 + $0x8] sm:$0xf] %vm819_vm2, %v972_v6  ;;  %vm714_vm10 = vcmp.ge.f32.partialorder %v698_v58, 0.0  ;;  %v680_v18 = vmul.f32 %v1326_v39, %v659_v8 }
 0x173   : > { %823 = vst.msk [vmem:[%s1439_s3 + $0xc] sm:$0xf] %vm819_vm2, %v973_v7  ;;  %v730_v13 = vmul.f32 0.2, %v698_v58  ;;  %824 = vst.msk [vmem:[%s1439_s3 + $0x10] sm:$0xf] %vm819_vm2, %v974_v10  ;;  %v744_v16 = vsel %vm712_vm8, %v696_v55, %v728_v11  ;;  %v681_v19 = vmul.f32 %v1326_v39, %v660_v9  ;;  %v699_v25 = vadd.f32 %v1332_v45, %v678_v14 }
 0x174   : > { %v745_v17 = vsel %vm713_vm9, %v697_v57, %v729_v12  ;;  %v975_v22 = vpack.c.bf16 %v744_v16, %v744_v16  ;;  %v700_v27 = vadd.f32 %v1332_v45, %v679_v15  ;;  %v701_v28 = vadd.f32 %v1332_v45, %v680_v18 }
 0x175   : > { %v976_v23 = vpack.c.bf16 %v745_v17, %v745_v17  ;;  %v746_v24 = vsel %vm714_vm10, %v698_v58, %v730_v13  ;;  %v702_v29 = vadd.f32 %v1332_v45, %v681_v19  ;;  %vm715_vm11 = vcmp.ge.f32.partialorder %v699_v25, 0.0 }
 0x176   : > { %v977_v26 = vpack.c.bf16 %v746_v24, %v746_v24  ;;  %825 = vst.msk [vmem:[%s1439_s3 + $0x14] sm:$0xf] %vm819_vm2, %v975_v22  ;;  %v731_v30 = vmul.f32 0.2, %v699_v25  ;;  %v682_v31 = vmul.f32 %v1326_v39, %v661_v20  ;;  %v683_v32 = vmul.f32 %v1326_v39, %v662_v21 }
 0x177   : > { %826 = vst.msk [vmem:[%s1439_s3 + $0x18] sm:$0xf] %vm819_vm2, %v976_v23  ;;  %vm716_vm12 = vcmp.ge.f32.partialorder %v700_v27, 0.0  ;;  %v732_v33 = vmul.f32 0.2, %v700_v27  ;;  %vm717_vm13 = vcmp.ge.f32.partialorder %v701_v28, 0.0  ;;  %v684_v54 = vmul.f32 %v1326_v39, %v663_v46 }
 0x178   : > { %827 = vst.msk [vmem:[%s1439_s3 + $0x1c] sm:$0xf] %vm819_vm2, %v977_v26  ;;  %v733_v34 = vmul.f32 0.2, %v701_v28  ;;  %v747_v35 = vsel %vm715_vm11, %v699_v25, %v731_v30  ;;  %vm718_vm14 = vcmp.ge.f32.partialorder %v702_v29, 0.0  ;;  %v703_v37 = vadd.f32 %v1332_v45, %v682_v31 }
 0x179   : > { %v734_v36 = vmul.f32 0.2, %v702_v29  ;;  %v978_v40 = vpack.c.bf16 %v747_v35, %v747_v35  ;;  %v748_v41 = vsel %vm716_vm12, %v700_v27, %v732_v33  ;;  %v704_v43 = vadd.f32 %v1332_v45, %v683_v32 }
 0x17a   : > { %v749_v42 = vsel %vm717_vm13, %v701_v28, %v733_v34  ;;  %v979_v48 = vpack.c.bf16 %v748_v41, %v748_v41  ;;  %vm719_vm15 = vcmp.ge.f32.partialorder %v703_v37, 0.0  ;;  %v735_v38 = vmul.f32 0.2, %v703_v37 }
 0x17b   : > { %v980_v49 = vpack.c.bf16 %v749_v42, %v749_v42  ;;  %v750_v51 = vsel %vm718_vm14, %v702_v29, %v734_v36  ;;  %828 = vst.msk [vmem:[%s1439_s3 + $0x20] sm:$0xf] %vm819_vm2, %v978_v40  ;;  %vm720_vm0 = vcmp.ge.f32.partialorder %v704_v43, 0.0  ;;  %v736_v53 = vmul.f32 0.2, %v704_v43 }
 0x17c   : > { %v981_v52 = vpack.c.bf16 %v750_v51, %v750_v51  ;;  %829 = vst.msk [vmem:[%s1439_s3 + $0x24] sm:$0xf] %vm819_vm2, %v979_v48  ;;  %v685_v55 = vmul.f32 %v1326_v39, %v664_v47  ;;  %v751_v57 = vsel %vm719_vm15, %v703_v37, %v735_v38  ;;  %v705_v60 = vadd.f32 %v1332_v45, %v684_v54 }
 0x17d   : > { %830 = vst.msk [vmem:[%s1439_s3 + $0x28] sm:$0xf] %vm819_vm2, %v980_v49  ;;  %v752_v58 = vsel %vm720_vm0, %v704_v43, %v736_v53  ;;  %v982_v44 = vpack.c.bf16 %v751_v57, %v751_v57 }
 0x17e   : > { %831 = vst.msk [vmem:[%s1439_s3 + $0x2c] sm:$0xf] %vm819_vm2, %v981_v52  ;;  %v983_v59 = vpack.c.bf16 %v752_v58, %v752_v58  ;;  %v706_v61 = vadd.f32 %v1332_v45, %v685_v55  ;;  %vm721_vm1 = vcmp.ge.f32.partialorder %v705_v60, 0.0  ;;  %v737_v39 = vmul.f32 0.2, %v705_v60 }
 0x17f   : > { %832 = vst.msk [vmem:[%s1439_s3 + $0x30] sm:$0xf] %vm819_vm2, %v982_v44 }
 0x180   : > { %833 = vst.msk [vmem:[%s1439_s3 + $0x34] sm:$0xf] %vm819_vm2, %v983_v59  ;;  %vm722_vm3 = vcmp.ge.f32.partialorder %v706_v61, 0.0  ;;  %v738_v62 = vmul.f32 0.2, %v706_v61  ;;  %v753_v0 = vsel %vm721_vm1, %v705_v60, %v737_v39 }
 0x181   : > { %v984_v50 = vpack.c.bf16 %v753_v0, %v753_v0 }
 0x182   : > { %v754_v1 = vsel %vm722_vm3, %v706_v61, %v738_v62 }
 0x183   : > { %v985_v2 = vpack.c.bf16 %v754_v1, %v754_v1  ;;  %834 = vst.msk [vmem:[%s1439_s3 + $0x38] sm:$0xf] %vm819_vm2, %v984_v50 }
 0x185   : > { %835 = vst.msk [vmem:[%s1439_s3 + $0x3c] sm:$0xf] %vm819_vm2, %v985_v2 }
 0x186 PF: > { %s13_s14 = sadd.s32 1, %s1155_s14   ;;  %s1440_s12 = smov %s1151_s13 }
 0x187   : > { %p10_p6 = scmp.ge.s32.totalorder %s13_s14, 4   ;;  %s1441_s13 = smov %s1443_s15 }
 0x189   :  { %12 = sbr.rel (!%p10_p6) target bundleno = 2 (0x2), region = 80 }

// kernel: discriminator_forward.7
= control target key start
LH: loop header
LB: loop body
LE: loop exit
PB: predicated region body
PF: predicated region fallthrough
CT: control target
= control target key end

     0   :  { %v40_v0 = vlaneseq  ;;  %vm156_vm0 = vcmask 7168   ;;  %s219_s0 = inlined_call_operand.vmem [shape: bf16[16,1024], index: 0, kind: input, shape index: {}]   ;;  %s220_s1 = inlined_call_operand.vmem [shape: bf16[1,1024], index: 1, kind: input, shape index: {}]   ;;  %s221_s2 = inlined_call_operand.vmem [shape: f32[16,1], index: 2, kind: output, shape index: {}]  }
   0x1   :  { %v11_v1 = vld [vmem:[%s219_s0] sm:$0xff]  ;;  %v12_v3 = vld [vmem:[%s219_s0 + $0x8] sm:$0xff]  ;;  %v13_v18 = vld [vmem:[%s219_s0 + $0x10] sm:$0xff] }
   0x2   :  { %v35_v2 = vld [vmem:[%s220_s1] sm:$0xff]  ;;  %v41_v5 = vshrl.u32 %v40_v0, 7  ;;  %v19_v7 = vunpack.c.l.bf16 %v11_v1  ;;  %v16_v13 = vld [vmem:[%s219_s0 + $0x28] sm:$0xff]  ;;  %v20_v14 = vunpack.c.h.bf16 %v11_v1  ;;  %v21_v15 = vunpack.c.l.bf16 %v12_v3  ;;  %v17_v31 = vld [vmem:[%s219_s0 + $0x30] sm:$0xff] }
   0x3   :  { %v36_v4 = vunpack.c.l.bf16 %v35_v2  ;;  %v15_v6 = vld [vmem:[%s219_s0 + $0x20] sm:$0xff]  ;;  %v37_v8 = vunpack.c.h.bf16 %v35_v2  ;;  %v22_v16 = vunpack.c.h.bf16 %v12_v3  ;;  %v29_v26 = vunpack.c.l.bf16 %v16_v13  ;;  %v14_v36 = vld [vmem:[%s219_s0 + $0x18] sm:$0xff] }
   0x4   :  { %v42_v9 = vsub.s32 0, %v41_v5  ;;  %v46_v10 = vsub.s32 2, %v41_v5  ;;  %v50_v11 = vsub.s32 4, %v41_v5  ;;  %v54_v12 = vsub.s32 6, %v41_v5  ;;  %v18_v46 = vld [vmem:[%s219_s0 + $0x38] sm:$0xff] }
   0x5   :  { %v27_v17 = vunpack.c.l.bf16 %v15_v6  ;;  %v28_v25 = vunpack.c.h.bf16 %v15_v6  ;;  %v23_v32 = vunpack.c.l.bf16 %v13_v18  ;;  %v24_v33 = vunpack.c.h.bf16 %v13_v18 }
   0x6   :  { %v43_v19 = vrot.slane %v36_v4, %v42_v9  ;;  %v47_v20 = vrot.slane %v36_v4, %v46_v10  ;;  %v51_v21 = vrot.slane %v36_v4, %v50_v11  ;;  %v55_v22 = vrot.slane %v36_v4, %v54_v12 }
   0x7   :  { %v59_v23 = vrot.slane %v37_v8, %v42_v9  ;;  %v63_v24 = vrot.slane %v37_v8, %v46_v10  ;;  %v67_v34 = vrot.slane %v37_v8, %v50_v11  ;;  %v30_v35 = vunpack.c.h.bf16 %v16_v13 }
   0x8   :  { %v83_v27 = vrot.slane %v43_v19, %v42_v9  ;;  %v87_v28 = vrot.slane %v47_v20, %v42_v9  ;;  %v91_v29 = vrot.slane %v51_v21, %v42_v9  ;;  %v95_v30 = vrot.slane %v55_v22, %v42_v9 }
   0x9   :  { %v99_v37 = vrot.slane %v59_v23, %v42_v9  ;;  %v71_v41 = vrot.slane %v37_v8, %v54_v12  ;;  %v103_v42 = vrot.slane %v63_v24, %v42_v9  ;;  %v31_v44 = vunpack.c.l.bf16 %v17_v31 }
   0xa   :  { %v112_v38 = vmul.f32 %v83_v27, %v19_v7  ;;  %v113_v39 = vmul.f32 %v87_v28, %v20_v14  ;;  %v114_v40 = vmul.f32 %v91_v29, %v21_v15  ;;  %v115_v43 = vmul.f32 %v95_v30, %v22_v16 }
   0xb   :  { %v120_v47 = vmul.f32 %v83_v27, %v27_v17  ;;  %v121_v48 = vmul.f32 %v87_v28, %v28_v25  ;;  %v122_v49 = vmul.f32 %v91_v29, %v29_v26  ;;  %v25_v50 = vunpack.c.l.bf16 %v14_v36 }
   0xc   :  { %v128_v45 = vadd.f32 %v113_v39, %v112_v38  ;;  %v107_v51 = vrot.slane %v67_v34, %v42_v9  ;;  %v32_v52 = vunpack.c.h.bf16 %v17_v31  ;;  %v116_v53 = vmul.f32 %v99_v37, %v23_v32 }
   0xd   :  { %v123_v55 = vmul.f32 %v95_v30, %v30_v35  ;;  %v137_v56 = vadd.f32 %v121_v48, %v120_v47  ;;  %v26_v57 = vunpack.c.h.bf16 %v14_v36  ;;  %v111_v58 = vrot.slane %v71_v41, %v42_v9 }
   0xe   :  { %v129_v54 = vadd.f32 %v128_v45, %v114_v40  ;;  %v33_v59 = vunpack.c.l.bf16 %v18_v46  ;;  %v117_v60 = vmul.f32 %v103_v42, %v24_v33  ;;  %v124_v62 = vmul.f32 %v99_v37, %v31_v44 }
   0xf   :  { %v138_v63 = vadd.f32 %v137_v56, %v122_v49  ;;  %v34_v0 = vunpack.c.h.bf16 %v18_v46  ;;  %v118_v1 = vmul.f32 %v107_v51, %v25_v50  ;;  %v125_v3 = vmul.f32 %v103_v42, %v32_v52 }
  0x10   :  { %v130_v61 = vadd.f32 %v129_v54, %v115_v43  ;;  %v119_v5 = vmul.f32 %v111_v58, %v26_v57  ;;  %v126_v7 = vmul.f32 %v107_v51, %v33_v59 }
  0x11   :  { %v139_v4 = vadd.f32 %v138_v63, %v123_v55  ;;  %v127_v11 = vmul.f32 %v111_v58, %v34_v0 }
  0x12   :  { %v131_v2 = vadd.f32 %v130_v61, %v116_v53 }
  0x13   :  { %v140_v8 = vadd.f32 %v139_v4, %v124_v62 }
  0x14   :  { %v132_v6 = vadd.f32 %v131_v2, %v117_v60 }
  0x15   :  { %v141_v12 = vadd.f32 %v140_v8, %v125_v3 }
  0x16   :  { %v133_v10 = vadd.f32 %v132_v6, %v118_v1 }
  0x17   :  { %v142_v14 = vadd.f32 %v141_v12, %v126_v7 }
  0x18   :  { %v134_v13 = vadd.f32 %v133_v10, %v119_v5 }
  0x19   :  { %v143_v9 = vadd.f32 %v142_v14, %v127_v11 }
  0x1a   :  { %135 = vadd.xlane.f32.xlu0 %v134_v13 }
  0x1e   :  { %144 = vadd.xlane.f32.xlu0 %v143_v9 }
  0xa3   :  { %v136_v15 = vpop.xlane.xlu0 %135 }
  0xa4   :  { %v146_v16 = vsub.f32 0.0, %v136_v15 }
  0xa6   :  { %v148_v17 = vmul.f32 1.442695, %v146_v16 }
  0xa7   :  { %v145_v18 = vpop.xlane.xlu0 %144 }
  0xa8   :  { %163 = vpow2.f32 %v148_v17  ;;  %v147_v19 = vsub.f32 0.0, %v145_v18 }
  0xaa   :  { %v150_v20 = vmul.f32 1.442695, %v147_v19 }
  0xac   :  { %165 = vpow2.f32 %v150_v20 }
  0xb5   :  { %v164_v21 = vpop.eup %163 }
  0xb6   :  { %v152_v22 = vadd.f32 1.0, %v164_v21 }
  0xb8   :  { %167 = vrcp.f32 %v152_v22 }
  0xb9   :  { %v166_v23 = vpop.eup %165 }
  0xba   :  { %v153_v24 = vadd.f32 1.0, %v166_v23 }
  0xbc   :  { %169 = vrcp.f32 %v153_v24 }
  0xc5   :  { %v168_v25 = vpop.eup %167 }
  0xc6   :  { %157 = vst.msk [vmem:[%s221_s2] sm:$0xff] %vm156_vm0, %v168_v25 }
  0xc9   :  { %v170_v26 = vpop.eup %169 }
  0xca   :  { %158 = vst.msk [vmem:[%s221_s2 + $0x8] sm:$0xff] %vm156_vm0, %v170_v26 }

// kernel: discriminator_forward.6
= control target key start
LH: loop header
LB: loop body
LE: loop exit
PB: predicated region body
PF: predicated region fallthrough
CT: control target
= control target key end

     0   :  { %s1043_s12 = smov 0   ;;  %s1045_s13 = smov 0   ;;  %s1212_s0 = inlined_call_operand.vmem [shape: bf16[32,512], index: 0, kind: input, shape index: {}]   ;;  %s1213_s1 = inlined_call_operand.vmem [shape: bf16[512,128], index: 1, kind: input, shape index: {}]   ;;  %s1214_s2 = inlined_call_operand.vmem [shape: f32[2,128], index: 2, kind: input, shape index: {}]   ;;  %s1215_s3 = inlined_call_operand.vmem [shape: bf16[32,64], index: 3, kind: output, shape index: {}]  }
   0x1   :  { %s1047_s14 = smov 0  }
   0x2 LB: > { %s25_s15 = sadd.s32 1, %s1016_s13  ;;  %p814_p0 = scmp.ge.s32.totalorder %s1020_s14, 1  ;;  %s1020_s14 = sphi %s1047_s14, %s13_s14   ;;  %s1016_s13 = sphi %s1045_s13, %s1217_s13   ;;  %s1012_s12 = sphi %s1043_s12, %s1216_s12  }
   0x3   : > { %p27_p1 = scmp.ge.s32.totalorder %s25_s15, 2  ;;  %p161_p2 = scmp.lt.s32.totalorder %s1020_s14, 3 }
   0x5   : > { %s1219_s15 = smov (%p27_p1, %s25_s15), 0  ;;  %p162_p3 = pnand %p814_p0, %p161_p2 }
   0x6   : > { %p815_p4 = scmp.ne.s32.totalorder (!%p162_p3), %s1012_s12, 0 }
   0x7   : > { %165 = sbr.rel (%p162_p3) target bundleno = 343 (0x157), region = 32 }
   0xc   : > { %213 = sbr.rel (%p815_p4) target bundleno = 283 (0x11b), region = 36 }
  0x11   : > { %v952_v0 = vld [vmem:[%s1213_s1 + $0x78] sm:$0xff]   ;;  %v956_v4 = vld [vmem:[%s1213_s1 + $0x70] sm:$0xff]   ;;  %v960_v8 = vld [vmem:[%s1213_s1 + $0x68] sm:$0xff]   ;;  %v1022_v40 = vmov 0.0   ;;  %vm649_vm0 = vcmask 1040384  }
  0x12   : > { %v953_v1 = vld [vmem:[%s1213_s1 + $0xf8] sm:$0xff]   ;;  %871 = vmatprep.subr.bf16.mxu0 %v952_v0  ;;  %v957_v5 = vld [vmem:[%s1213_s1 + $0xf0] sm:$0xff]   ;;  %v961_v9 = vld [vmem:[%s1213_s1 + $0xe8] sm:$0xff]   ;;  %218 = vst [vmem:[#allocation3] sm:$0x3] %v1022_v40 }
  0x13   : > { %v954_v2 = vld [vmem:[%s1213_s1 + $0x38] sm:$0xff]   ;;  %899 = vmatprep.subr.bf16.mxu1 %v953_v1  ;;  %v958_v6 = vld [vmem:[%s1213_s1 + $0x30] sm:$0xff]   ;;  %v962_v10 = vld [vmem:[%s1213_s1 + $0x28] sm:$0xff]  }
  0x14   : > { %v955_v3 = vld [vmem:[%s1213_s1 + $0xb8] sm:$0xff]   ;;  %872 = vmatpush3.bf16.msra.mxu0 %v954_v2  ;;  %v959_v7 = vld [vmem:[%s1213_s1 + $0xb0] sm:$0xff]   ;;  %v963_v11 = vld [vmem:[%s1213_s1 + $0xa8] sm:$0xff]  }
  0x15   : > { %900 = vmatpush3.bf16.msra.mxu1 %v955_v3  ;;  %873 = vmatprep.subr.bf16.mxu0 %v956_v4  ;;  %v964_v12 = vld [vmem:[%s1213_s1 + $0x60] sm:$0xff]   ;;  %v968_v16 = vld [vmem:[%s1213_s1 + $0x58] sm:$0xff]   ;;  %v972_v20 = vld [vmem:[%s1213_s1 + $0x50] sm:$0xff]  }
  0x16   : > { %901 = vmatprep.subr.bf16.mxu1 %v957_v5  ;;  %v965_v13 = vld [vmem:[%s1213_s1 + $0xe0] sm:$0xff]   ;;  %v969_v17 = vld [vmem:[%s1213_s1 + $0xd8] sm:$0xff]   ;;  %v973_v21 = vld [vmem:[%s1213_s1 + $0xd0] sm:$0xff]  }
  0x17   : > { %v966_v14 = vld [vmem:[%s1213_s1 + $0x20] sm:$0xff]   ;;  %v970_v18 = vld [vmem:[%s1213_s1 + $0x18] sm:$0xff]   ;;  %v974_v22 = vld [vmem:[%s1213_s1 + $0x10] sm:$0xff]  }
  0x18   : > { %874 = vmatpush3.bf16.msra.mxu0 %v958_v6  ;;  %v967_v15 = vld [vmem:[%s1213_s1 + $0xa0] sm:$0xff]   ;;  %v971_v19 = vld [vmem:[%s1213_s1 + $0x98] sm:$0xff]   ;;  %v975_v23 = vld [vmem:[%s1213_s1 + $0x90] sm:$0xff]  }
  0x19   : > { %902 = vmatpush3.bf16.msra.mxu1 %v959_v7  ;;  %875 = vmatprep.subr.bf16.mxu0 %v960_v8  ;;  %v976_v24 = vld [vmem:[%s1213_s1 + $0x48] sm:$0xff]   ;;  %v980_v28 = vld [vmem:[%s1213_s1 + $0x40] sm:$0xff]  }
  0x1a   : > { %903 = vmatprep.subr.bf16.mxu1 %v961_v9  ;;  %v977_v25 = vld [vmem:[%s1213_s1 + $0xc8] sm:$0xff]   ;;  %v981_v29 = vld [vmem:[%s1213_s1 + $0xc0] sm:$0xff]  }
  0x1b   : > { %v978_v26 = vld [vmem:[%s1213_s1 + $0x8] sm:$0xff]   ;;  %v982_v30 = vld [vmem:[%s1213_s1] sm:$0xff]  }
  0x1c   : > { %876 = vmatpush3.bf16.msra.mxu0 %v962_v10  ;;  %v979_v27 = vld [vmem:[%s1213_s1 + $0x88] sm:$0xff]   ;;  %v983_v31 = vld [vmem:[%s1213_s1 + $0x80] sm:$0xff]  }
  0x1d   : > { %904 = vmatpush3.bf16.msra.mxu1 %v963_v11  ;;  %877 = vmatprep.subr.bf16.mxu0 %v964_v12  ;;  %v984_v32 = vld [vmem:[%s1212_s0] ss:$16 sps:$4 sm:$0xff]   ;;  %v986_v33 = vld [vmem:[%s1212_s0 + $0x4] ss:$16 sps:$4 sm:$0xff]   ;;  %v987_v34 = vld [vmem:[%s1212_s0 + $0x8] ss:$16 sps:$4 sm:$0xff]  }
  0x1e   : > { %905 = vmatprep.subr.bf16.mxu1 %v965_v13  ;;  %v989_v35 = vld [vmem:[%s1212_s0 + $0xc] ss:$16 sps:$4 sm:$0xff]   ;;  %555 = vmatprep.mubr.bf16.mxu0 %v986_v33  ;;  %v990_v36 = vld [vmem:[%s1212_s0 + $0x24] ss:$16 sps:$4 sm:$0xff]   ;;  %v994_v38 = vld [vmem:[%s1212_s0 + $0x20] ss:$16 sps:$4 sm:$0xff]  }
  0x1f   : > { %604 = vmatprep.mubr.bf16.mxu1 %v989_v35  ;;  %v992_v37 = vld [vmem:[%s1212_s0 + $0x2c] ss:$16 sps:$4 sm:$0xff]   ;;  %v995_v39 = vld [vmem:[%s1212_s0 + $0x28] ss:$16 sps:$4 sm:$0xff]  }
  0x20   : > { %878 = vmatpush3.bf16.msra.mxu0 %v966_v14 }
  0x21   : > { %906 = vmatpush3.bf16.msra.mxu1 %v967_v15  ;;  %879 = vmatprep.subr.bf16.mxu0 %v968_v16 }
  0x22   : > { %907 = vmatprep.subr.bf16.mxu1 %v969_v17 }
  0x24   : > { %880 = vmatpush3.bf16.msra.mxu0 %v970_v18 }
  0x25   : > { %908 = vmatpush3.bf16.msra.mxu1 %v971_v19  ;;  %881 = vmatprep.subr.bf16.mxu0 %v972_v20 }
  0x26   : > { %909 = vmatprep.subr.bf16.mxu1 %v973_v21 }
  0x28   : > { %882 = vmatpush3.bf16.msra.mxu0 %v974_v22 }
  0x29   : > { %910 = vmatpush3.bf16.msra.mxu1 %v975_v23  ;;  %883 = vmatprep.subr.bf16.mxu0 %v976_v24 }
  0x2a   : > { %911 = vmatprep.subr.bf16.mxu1 %v977_v25  ;;  %v626_v25 = vld [vmem:[#allocation3] sm:$0x3] }
  0x2c   : > { %884 = vmatpush3.bf16.msra.mxu0 %v978_v26 }
  0x2d   : > { %912 = vmatpush3.bf16.msra.mxu1 %v979_v27  ;;  %885 = vmatprep.subr.bf16.mxu0 %v980_v28 }
  0x2e   : > { %913 = vmatprep.subr.bf16.mxu1 %v981_v29 }
  0x30   : > { %886 = vmatpush3.bf16.msra.mxu0 %v982_v30 }
  0x31   : > { %914 = vmatpush3.bf16.msra.mxu1 %v983_v31 }
  0x33   : > { %556 = vmatmul.mubr.bf16.vlgmr.msra.gmra.mxu0 %v984_v32 }
  0x34   : > { %605 = vmatmul.mubr.bf16.vlgmr.msra.gmra.mxu1 %v987_v34  ;;  %563 = vmatprep.mubr.bf16.mxu0 %v990_v36 }
  0x35   : > { %612 = vmatprep.mubr.bf16.mxu1 %v992_v37 }
  0x3b   : > { %564 = vmatmul.mubr.bf16.gmra.mxu0 %v994_v38 }
  0x3c   : > { %613 = vmatmul.mubr.bf16.gmra.mxu1 %v995_v39 }
  0xf3   : > { %v887_v41 = vpop.f32.mrf.mxu0 }
  0xf4   : > { %v915_v42 = vpop.f32.mrf.mxu1 }
  0xf5   : > { %v888_v43 = vpop.f32.mrf.mxu0 }
  0xf6   : > { %v889_v44 = vadd.f32 %v888_v43, %v887_v41  ;;  %v916_v45 = vpop.f32.mrf.mxu1 }
  0xf7   : > { %v917_v46 = vadd.f32 %v916_v45, %v915_v42  ;;  %v890_v47 = vpop.f32.mrf.mxu0 }
  0xf8   : > { %v918_v48 = vpop.f32.mrf.mxu1 }
  0xf9   : > { %v607_v49 = vadd.f32 %v917_v46, %v889_v44  ;;  %v891_v50 = vpop.f32.mrf.mxu0 }
  0xfa   : > { %v892_v51 = vadd.f32 %v891_v50, %v890_v47  ;;  %v919_v52 = vpop.f32.mrf.mxu1 }
  0xfb   : > { %622 = vst [vmem:[#allocation2 + $0x10] sm:$0xff] %v607_v49  ;;  %v920_v53 = vadd.f32 %v919_v52, %v918_v48  ;;  %v893_v54 = vpop.f32.mrf.mxu0  ;;  %v636_v4 = vmul.f32 %v607_v49, %v607_v49 }
  0xfc   : > { %v921_v55 = vpop.f32.mrf.mxu1 }
  0xfd   : > { %v610_v56 = vadd.f32 %v920_v53, %v892_v51  ;;  %v894_v57 = vpop.f32.mrf.mxu0 }
  0xfe   : > { %v895_v58 = vadd.f32 %v894_v57, %v893_v54  ;;  %v922_v59 = vpop.f32.mrf.mxu1 }
  0xff   : > { %623 = vst [vmem:[#allocation2] sm:$0xff] %v610_v56  ;;  %v923_v60 = vadd.f32 %v922_v59, %v921_v55  ;;  %v896_v61 = vpop.f32.mrf.mxu0  ;;  %v637_v63 = vmul.f32 %v610_v56, %v610_v56  ;;  %v627_v5 = vadd.f32 %v610_v56, %v607_v49 }
 0x100   : > { %v924_v62 = vpop.f32.mrf.mxu1 }
 0x101   : > { %v615_v0 = vadd.f32 %v923_v60, %v895_v58  ;;  %v897_v1 = vpop.f32.mrf.mxu0  ;;  %v640_v8 = vadd.f32 %v637_v63, %v636_v4 }
 0x102   : > { %v898_v2 = vadd.f32 %v897_v1, %v896_v61  ;;  %v925_v3 = vpop.f32.mrf.mxu1 }
 0x103   : > { %624 = vst [vmem:[#allocation2 + $0x18] sm:$0xff] %v615_v0  ;;  %v638_v6 = vmul.f32 %v615_v0, %v615_v0  ;;  %v926_v7 = vadd.f32 %v925_v3, %v924_v62  ;;  %v628_v9 = vadd.f32 %v627_v5, %v615_v0 }
 0x105   : > { %v618_v10 = vadd.f32 %v926_v7, %v898_v2  ;;  %v641_v11 = vadd.f32 %v640_v8, %v638_v6 }
 0x107   : > { %625 = vst [vmem:[#allocation2 + $0x8] sm:$0xff] %v618_v10  ;;  %v629_v12 = vadd.f32 %v628_v9, %v618_v10  ;;  %v639_v13 = vmul.f32 %v618_v10, %v618_v10 }
 0x109   : > { %v630_v14 = vrot.slane %v629_v12, 4  ;;  %v642_v15 = vadd.f32 %v641_v11, %v639_v13 }
 0x10b   : > { %v631_v16 = vadd.f32 %v630_v14, %v629_v12  ;;  %v643_v17 = vrot.slane %v642_v15, 4 }
 0x10d   : > { %v632_v18 = vrot.slane %v631_v16, 2  ;;  %v644_v19 = vadd.f32 %v643_v17, %v642_v15 }
 0x10f   : > { %v633_v20 = vadd.f32 %v632_v18, %v631_v16  ;;  %v645_v21 = vrot.slane %v644_v19, 2 }
 0x111   : > { %v634_v22 = vrot.slane %v633_v20, 1  ;;  %v646_v23 = vadd.f32 %v645_v21, %v644_v19 }
 0x113   : > { %v647_v24 = vrot.slane %v646_v23, 1  ;;  %v635_v26 = vadd.f32 %v634_v22, %v633_v20 }
 0x115   : > { %v648_v27 = vadd.f32 %v647_v24, %v646_v23 }
 0x117   : > { %v650_v28 = vsel %vm649_vm0, %v635_v26, %v648_v27 }
 0x118   : > { %v651_v29 = vadd.f32 %v650_v28, %v626_v25 }
 0x11a   : > { %652 = vst [vmem:[#allocation3] sm:$0x3] %v651_v29 }
 0x11b PF: > { %p856_p5 = scmp.ne.s32.totalorder %s1012_s12, 1 }
 0x11d   : > { %656 = sbr.rel (%p856_p5) target bundleno = 343 (0x157), region = 44 }
 0x122   : > { %v661_v30 = vld [vmem:[#allocation3] sm:$0x1]  ;;  %v663_v31 = vld [vmem:[#allocation3 + $0x1] sm:$0x1]  ;;  %vm678_vm1 = vcmask 1040384   ;;  %v682_v46 = vld [vmem:[#allocation2 + $0x10] sm:$0xff] }
 0x123   : > { %v662_v32 = vmul.f32 0.03125, %v661_v30  ;;  %v664_v33 = vmul.f32 0.03125, %v663_v31  ;;  %v668_v38 = vld [vmem:[%s1214_s2] sm:$0x1]  ;;  %v672_v41 = vld [vmem:[%s1214_s2 + $0x1] sm:$0x1] }
 0x124   : > { %v683_v47 = vld [vmem:[#allocation2] sm:$0xff]  ;;  %v684_v48 = vld [vmem:[#allocation2 + $0x18] sm:$0xff]  ;;  %v685_v49 = vld [vmem:[#allocation2 + $0x8] sm:$0xff]  ;;  %vm732_vm6 = vcmask 519168  }
 0x125   : > { %v665_v34 = vmul.f32 %v662_v32, %v662_v32 }
 0x127   : > { %v666_v35 = vsub.f32 %v664_v33, %v665_v34 }
 0x129   : > { %v667_v36 = vmax.f32 %v666_v35, 0.0 }
 0x12b   : > { %v669_v37 = vadd.f32 1e-05, %v667_v36 }
 0x12d   : > { %996 = vrsqrt.f32 %v669_v37 }
 0x13a   : > { %v997_v39 = vpop.eup %996 }
 0x13b   : > { %v671_v40 = vmul.f32 %v997_v39, %v668_v38 }
 0x13d   : > { %v673_v42 = vmul.f32 %v671_v40, %v662_v32 }
 0x13f   : > { %v674_v43 = vsub.f32 %v672_v41, %v673_v42 }
 0x141   : > { %v676_v44 = vrot.slane %v674_v43, 7 }
 0x143   : > { %v679_v45 = vsel %vm678_vm1, %v671_v40, %v676_v44 }
 0x144   : > { %680 = vst [vmem:[#allocation4] sm:$0x3] %v679_v45 }
 0x14b   : > { %v857_v50 = vld [vmem:[#allocation4] ss:$0 sm:$0xff]  ;;  %v858_v55 = vld [vmem:[#allocation4 + $0x1] ss:$0 sm:$0xff] }
 0x14c   : > { %v691_v51 = vmul.f32 %v857_v50, %v682_v46  ;;  %v692_v52 = vmul.f32 %v857_v50, %v683_v47  ;;  %v693_v53 = vmul.f32 %v857_v50, %v684_v48  ;;  %v694_v54 = vmul.f32 %v857_v50, %v685_v49 }
 0x14e   : > { %v700_v56 = vadd.f32 %v858_v55, %v691_v51  ;;  %v701_v57 = vadd.f32 %v858_v55, %v692_v52  ;;  %v702_v58 = vadd.f32 %v858_v55, %v693_v53  ;;  %v703_v59 = vadd.f32 %v858_v55, %v694_v54 }
 0x150   : > { %vm704_vm2 = vcmp.ge.f32.partialorder %v700_v56, 0.0  ;;  %v708_v60 = vmul.f32 0.2, %v700_v56  ;;  %vm705_vm3 = vcmp.ge.f32.partialorder %v701_v57, 0.0  ;;  %v709_v61 = vmul.f32 0.2, %v701_v57 }
 0x151   : > { %vm706_vm4 = vcmp.ge.f32.partialorder %v702_v58, 0.0  ;;  %v710_v62 = vmul.f32 0.2, %v702_v58  ;;  %vm707_vm5 = vcmp.ge.f32.partialorder %v703_v59, 0.0  ;;  %v711_v63 = vmul.f32 0.2, %v703_v59 }
 0x152   : > { %v712_v0 = vsel %vm704_vm2, %v700_v56, %v708_v60  ;;  %v713_v1 = vsel %vm705_vm3, %v701_v57, %v709_v61 }
 0x153   : > { %v867_v2 = vpack.c.bf16 %v712_v0, %v712_v0  ;;  %v868_v3 = vpack.c.bf16 %v713_v1, %v713_v1  ;;  %v714_v4 = vsel %vm706_vm4, %v702_v58, %v710_v62  ;;  %v715_v5 = vsel %vm707_vm5, %v703_v59, %v711_v63 }
 0x154   : > { %v869_v6 = vpack.c.bf16 %v714_v4, %v714_v4  ;;  %v870_v7 = vpack.c.bf16 %v715_v5, %v715_v5 }
 0x155   : > { %733 = vst.msk [vmem:[%s1215_s3] sm:$0xf] %vm732_vm6, %v867_v2  ;;  %734 = vst.msk [vmem:[%s1215_s3 + $0x4] sm:$0xf] %vm732_vm6, %v868_v3 }
 0x156   : > { %735 = vst.msk [vmem:[%s1215_s3 + $0x8] sm:$0xf] %vm732_vm6, %v869_v6  ;;  %736 = vst.msk [vmem:[%s1215_s3 + $0xc] sm:$0xf] %vm732_vm6, %v870_v7 }
 0x157 PF: > { %s13_s14 = sadd.s32 1, %s1020_s14   ;;  %s1216_s12 = smov %s1016_s13 }
 0x158   : > { %p10_p6 = scmp.ge.s32.totalorder %s13_s14, 4   ;;  %s1217_s13 = smov %s1219_s15 }
 0x15a   :  { %12 = sbr.rel (!%p10_p6) target bundleno = 2 (0x2), region = 80 }

</bundles_post_ra>
